<compile_context>
chip_gen: v7x
topology: tpu7x:2x2x1
jax: 0.10.0
libtpu: 0.0.40
codegen_flags: <defaults>
</compile_context>

<pallas_src>
import math
from functools import partial

import jax
import jax.numpy as jnp
from jax.experimental import pallas as pl
from jax.experimental.pallas import tpu as pltpu


# ----------------------------------------------------------------------------
# Fused BiGRU kernel
# ----------------------------------------------------------------------------
def _gru_cell(gi, gh, h_prev, H):
    # PyTorch gate order [r, z, n]; n-gate uses r * (h @ W_hn + b_hn).
    r = jax.nn.sigmoid(gi[:, 0:H] + gh[:, 0:H])
    z = jax.nn.sigmoid(gi[:, H:2 * H] + gh[:, H:2 * H])
    n = jnp.tanh(gi[:, 2 * H:3 * H] + r * gh[:, 2 * H:3 * H])
    return (1.0 - z) * n + z * h_prev


def _bigru_kernel(*refs, T, Bp, H, B, L):
    # refs = [x2] + [wih_t, whh_t, bih, bhh] * (2 dirs * L layers) + [fcw_t, fcb]
    #        + [o_ref] + [gif_scr, gib_scr, outf_scr, outb_scr]
    n_in = 1 + 8 * L + 2
    x_ref = refs[0]
    cell_refs = refs[1:1 + 8 * L]
    fcw_ref, fcb_ref = refs[1 + 8 * L], refs[2 + 8 * L]
    o_ref = refs[n_in]
    gif_scr, gib_scr, outf_scr, outb_scr = refs[n_in + 1:]

    def run_layer(x_in, fwd_refs, bwd_refs, store_seq):
        wih_f, whh_f, bih_f, bhh_f = [r[...] for r in fwd_refs]
        wih_b, whh_b, bih_b, bhh_b = [r[...] for r in bwd_refs]

        # Hoisted input->hidden projection for the entire sequence (both dirs).
        gif_scr[...] = jnp.dot(x_in, wih_f, preferred_element_type=jnp.float32) + bih_f
        gib_scr[...] = jnp.dot(x_in, wih_b, preferred_element_type=jnp.float32) + bih_b

        # Hoist bias broadcasts out of the serial recurrence.
        bhh_f = jnp.broadcast_to(bhh_f, (Bp, 3 * H))
        bhh_b = jnp.broadcast_to(bhh_b, (Bp, 3 * H))

        h_f = jnp.zeros((Bp, H), jnp.float32)   # h_0 = 0 (matches torch.zeros h_0)
        h_b = jnp.zeros((Bp, H), jnp.float32)
        for i in range(T):                      # fully unrolled, static 8-aligned slices
            j = T - 1 - i
            gh_f = jnp.dot(h_f, whh_f, preferred_element_type=jnp.float32) + bhh_f
            h_f = _gru_cell(gif_scr[i * Bp:(i + 1) * Bp, :], gh_f, h_f, H)
            gh_b = jnp.dot(h_b, whh_b, preferred_element_type=jnp.float32) + bhh_b
            h_b = _gru_cell(gib_scr[j * Bp:(j + 1) * Bp, :], gh_b, h_b, H)
            if store_seq:
                outf_scr[i * Bp:(i + 1) * Bp, :] = h_f
                outb_scr[j * Bp:(j + 1) * Bp, :] = h_b
        return h_f, h_b

    x_in = x_ref[...]                           # (T*Bp, D_in) time-major, batch padded
    h_f = h_b = None
    for layer in range(L):
        base = 8 * layer
        fwd_refs = cell_refs[base:base + 4]
        bwd_refs = cell_refs[base + 4:base + 8]
        last = layer == L - 1
        h_f, h_b = run_layer(x_in, fwd_refs, bwd_refs, store_seq=not last)
        if not last:
            # Next layer's input: [fwd_out | bwd_out] per timestep.
            x_in = jnp.concatenate([outf_scr[...], outb_scr[...]], axis=-1)

    # torch: cat(out_gru[:, -1, :H], out_gru[:, 0, H:]) == final fwd & bwd hidden
    feat = jnp.concatenate([h_f, h_b], axis=-1)                      # (Bp, 2H)
    logits = jnp.dot(feat, fcw_ref[...],
                     preferred_element_type=jnp.float32) + fcb_ref[...]
    o_ref[...] = logits[0:B, :]


def bigru_forward(params, x_btd):
    """x_btd: (B, T, D) as in PyTorch batch_first. Returns (B, num_classes)."""
    H = params["hidden_size"]
    L = params["num_layers"]
    B, T, D = x_btd.shape
    C = params["fc_w"].shape[0]
    Bp = ((B + 7) // 8) * 8                     # pad batch to a full sublane

    x = jnp.transpose(x_btd, (1, 0, 2)).astype(jnp.float32)          # (T, B, D)
    x = jnp.pad(x, ((0, 0), (0, Bp - B), (0, 0)))                    # (T, Bp, D)
    x2 = x.reshape(T * Bp, D)                                        # time-major rows

    inputs = [x2]
    for layer in range(L):
        for direction in ("fwd", "bwd"):
            w_ih, w_hh, b_ih, b_hh = params[f"l{layer}_{direction}"]
            inputs += [jnp.transpose(w_ih),      # (D_in, 3H)
                       jnp.transpose(w_hh),      # (H, 3H)
                       b_ih[None, :],            # (1, 3H)
                       b_hh[None, :]]            # (1, 3H)
    inputs += [jnp.transpose(params["fc_w"]),    # (2H, C)
               params["fc_b"][None, :]]          # (1, C)

    kernel = partial(_bigru_kernel, T=T, Bp=Bp, H=H, B=B, L=L)
    in_specs = [pl.BlockSpec(a.shape, lambda i: (0, 0)) for a in inputs]

    return pl.pallas_call(
        kernel,
        out_shape=jax.ShapeDtypeStruct((B, C), jnp.float32),
        grid_spec=pltpu.PrefetchScalarGridSpec(
            num_scalar_prefetch=0,
            grid=(1,),
            in_specs=in_specs,
            out_specs=pl.BlockSpec((B, C), lambda i: (0, 0)),
            scratch_shapes=[
                pltpu.VMEM((T * Bp, 3 * H), jnp.float32),   # gi (fwd), reused per layer
                pltpu.VMEM((T * Bp, 3 * H), jnp.float32),   # gi (bwd), reused per layer
                pltpu.VMEM((T * Bp, H), jnp.float32),       # layer fwd output sequence
                pltpu.VMEM((T * Bp, H), jnp.float32),       # layer bwd output sequence
            ],
        ),
        compiler_params=pltpu.CompilerParams(
            dimension_semantics=("arbitrary",)),
    )(*inputs)


# ----------------------------------------------------------------------------
# Parameter init (PyTorch-style uniform)
# ----------------------------------------------------------------------------
def init_bigru_params(key, input_size, hidden_size, num_layers, num_classes=4):
    params = {"hidden_size": hidden_size, "num_layers": num_layers}
    stdv = 1.0 / math.sqrt(hidden_size)
    keys = jax.random.split(key, num_layers * 2 * 4 + 2)
    kidx = 0
    for layer in range(num_layers):
        d_in = input_size if layer == 0 else 2 * hidden_size
        for direction in ("fwd", "bwd"):
            w_ih = jax.random.uniform(keys[kidx], (3 * hidden_size, d_in),
                                      minval=-stdv, maxval=stdv, dtype=jnp.float32); kidx += 1
            w_hh = jax.random.uniform(keys[kidx], (3 * hidden_size, hidden_size),
                                      minval=-stdv, maxval=stdv, dtype=jnp.float32); kidx += 1
            b_ih = jax.random.uniform(keys[kidx], (3 * hidden_size,),
                                      minval=-stdv, maxval=stdv, dtype=jnp.float32); kidx += 1
            b_hh = jax.random.uniform(keys[kidx], (3 * hidden_size,),
                                      minval=-stdv, maxval=stdv, dtype=jnp.float32); kidx += 1
            params[f"l{layer}_{direction}"] = (w_ih, w_hh, b_ih, b_hh)
    fc_stdv = 1.0 / math.sqrt(2 * hidden_size)
    params["fc_w"] = jax.random.uniform(keys[kidx], (num_classes, 2 * hidden_size),
                                        minval=-fc_stdv, maxval=fc_stdv, dtype=jnp.float32); kidx += 1
    params["fc_b"] = jax.random.uniform(keys[kidx], (num_classes,),
                                        minval=-fc_stdv, maxval=fc_stdv, dtype=jnp.float32)
    return params


# ----------------------------------------------------------------------------
# Pure-JAX reference (lax.scan) for correctness check
# ----------------------------------------------------------------------------
def _gru_layer_ref(x_tbd, w_ih, w_hh, b_ih, b_hh):
    H = w_hh.shape[1]

    def step(h, x_t):
        gi = x_t @ w_ih.T + b_ih
        gh = h @ w_hh.T + b_hh
        r = jax.nn.sigmoid(gi[:, :H] + gh[:, :H])
        z = jax.nn.sigmoid(gi[:, H:2 * H] + gh[:, H:2 * H])
        n = jnp.tanh(gi[:, 2 * H:] + r * gh[:, 2 * H:])
        h_new = (1.0 - z) * n + z * h
        return h_new, h_new

    h0 = jnp.zeros((x_tbd.shape[1], H), jnp.float32)
    _, out = jax.lax.scan(step, h0, x_tbd)
    return out


def bigru_forward_ref(params, x_btd):
    H = params["hidden_size"]
    x = jnp.transpose(x_btd, (1, 0, 2)).astype(jnp.float32)
    for layer in range(params["num_layers"]):
        out_f = _gru_layer_ref(x, *params[f"l{layer}_fwd"])
        out_b = _gru_layer_ref(x[::-1], *params[f"l{layer}_bwd"])[::-1]
        x = jnp.concatenate([out_f, out_b], axis=-1)
    feat = jnp.concatenate([x[-1, :, :H], x[0, :, H:]], axis=-1)
    return feat @ params["fc_w"].T + params["fc_b"]


# ----------------------------------------------------------------------------
if __name__ == "__main__":
    # Small shapes consistent with the module's forward (batch_first, input_size=3)
    B, T, D, H, L = 2, 8, 3, 32, 2

    key = jax.random.PRNGKey(0)
    key_p, key_x = jax.random.split(key)
    params = init_bigru_params(key_p, input_size=D, hidden_size=H, num_layers=L)
    X = jax.random.normal(key_x, (B, T, D), dtype=jnp.float32)

    out = jax.block_until_ready(bigru_forward(params, X))
    ref = jax.block_until_ready(bigru_forward_ref(params, X))

    assert out.shape == (B, 4), out.shape
    assert jnp.allclose(out, ref, rtol=1e-4, atol=1e-4), (out, ref)

    print("KERNEL_OK")
</pallas_src>

<mosaic_0001>
module attributes {stable_mosaic.version = 11 : i64} {
  func.func @_bigru_kernel(%arg0: i32, %arg1: memref<64x3xf32, #tpu.memory_space<vmem>>, %arg2: memref<3x96xf32, #tpu.memory_space<vmem>>, %arg3: memref<32x96xf32, #tpu.memory_space<vmem>>, %arg4: memref<1x96xf32, #tpu.memory_space<vmem>>, %arg5: memref<1x96xf32, #tpu.memory_space<vmem>>, %arg6: memref<3x96xf32, #tpu.memory_space<vmem>>, %arg7: memref<32x96xf32, #tpu.memory_space<vmem>>, %arg8: memref<1x96xf32, #tpu.memory_space<vmem>>, %arg9: memref<1x96xf32, #tpu.memory_space<vmem>>, %arg10: memref<64x96xf32, #tpu.memory_space<vmem>>, %arg11: memref<32x96xf32, #tpu.memory_space<vmem>>, %arg12: memref<1x96xf32, #tpu.memory_space<vmem>>, %arg13: memref<1x96xf32, #tpu.memory_space<vmem>>, %arg14: memref<64x96xf32, #tpu.memory_space<vmem>>, %arg15: memref<32x96xf32, #tpu.memory_space<vmem>>, %arg16: memref<1x96xf32, #tpu.memory_space<vmem>>, %arg17: memref<1x96xf32, #tpu.memory_space<vmem>>, %arg18: memref<64x4xf32, #tpu.memory_space<vmem>>, %arg19: memref<1x4xf32, #tpu.memory_space<vmem>>, %arg20: memref<2x4xf32, #tpu.memory_space<vmem>>, %arg21: memref<64x96xf32, #tpu.memory_space<vmem>>, %arg22: memref<64x96xf32, #tpu.memory_space<vmem>>, %arg23: memref<64x32xf32, #tpu.memory_space<vmem>>, %arg24: memref<64x32xf32, #tpu.memory_space<vmem>>) attributes {dimension_semantics = [#tpu.dimension_semantics<arbitrary>], iteration_bounds = array<i64: 1>, scalar_prefetch = 0 : i64, scratch_operands = 4 : i64, tpu.core_type = #tpu.core_type<tc>, window_params = [{pipeline_mode = #tpu.pipeline_mode<synchronous>, transform_indices = @transform_0, window_bounds = array<i64: 64, 3>}, {pipeline_mode = #tpu.pipeline_mode<synchronous>, transform_indices = @transform_1, window_bounds = array<i64: 3, 96>}, {pipeline_mode = #tpu.pipeline_mode<synchronous>, transform_indices = @transform_2, window_bounds = array<i64: 32, 96>}, {pipeline_mode = #tpu.pipeline_mode<synchronous>, transform_indices = @transform_3, window_bounds = array<i64: 1, 96>}, {pipeline_mode = #tpu.pipeline_mode<synchronous>, transform_indices = @transform_4, window_bounds = array<i64: 1, 96>}, {pipeline_mode = #tpu.pipeline_mode<synchronous>, transform_indices = @transform_5, window_bounds = array<i64: 3, 96>}, {pipeline_mode = #tpu.pipeline_mode<synchronous>, transform_indices = @transform_6, window_bounds = array<i64: 32, 96>}, {pipeline_mode = #tpu.pipeline_mode<synchronous>, transform_indices = @transform_7, window_bounds = array<i64: 1, 96>}, {pipeline_mode = #tpu.pipeline_mode<synchronous>, transform_indices = @transform_8, window_bounds = array<i64: 1, 96>}, {pipeline_mode = #tpu.pipeline_mode<synchronous>, transform_indices = @transform_9, window_bounds = array<i64: 64, 96>}, {pipeline_mode = #tpu.pipeline_mode<synchronous>, transform_indices = @transform_10, window_bounds = array<i64: 32, 96>}, {pipeline_mode = #tpu.pipeline_mode<synchronous>, transform_indices = @transform_11, window_bounds = array<i64: 1, 96>}, {pipeline_mode = #tpu.pipeline_mode<synchronous>, transform_indices = @transform_12, window_bounds = array<i64: 1, 96>}, {pipeline_mode = #tpu.pipeline_mode<synchronous>, transform_indices = @transform_13, window_bounds = array<i64: 64, 96>}, {pipeline_mode = #tpu.pipeline_mode<synchronous>, transform_indices = @transform_14, window_bounds = array<i64: 32, 96>}, {pipeline_mode = #tpu.pipeline_mode<synchronous>, transform_indices = @transform_15, window_bounds = array<i64: 1, 96>}, {pipeline_mode = #tpu.pipeline_mode<synchronous>, transform_indices = @transform_16, window_bounds = array<i64: 1, 96>}, {pipeline_mode = #tpu.pipeline_mode<synchronous>, transform_indices = @transform_17, window_bounds = array<i64: 64, 4>}, {pipeline_mode = #tpu.pipeline_mode<synchronous>, transform_indices = @transform_18, window_bounds = array<i64: 1, 4>}, {pipeline_mode = #tpu.pipeline_mode<synchronous>, transform_indices = @transform_19, window_bounds = array<i64: 2, 4>}]} {
    %c0 = arith.constant 0 : index
    %c0_0 = arith.constant 0 : index
    %0 = vector.load %arg1[%c0, %c0_0] : memref<64x3xf32, #tpu.memory_space<vmem>>, vector<64x3xf32>
    %c0_1 = arith.constant 0 : index
    %c0_2 = arith.constant 0 : index
    %1 = vector.load %arg2[%c0_1, %c0_2] : memref<3x96xf32, #tpu.memory_space<vmem>>, vector<3x96xf32>
    %c0_3 = arith.constant 0 : index
    %c0_4 = arith.constant 0 : index
    %2 = vector.load %arg3[%c0_3, %c0_4] : memref<32x96xf32, #tpu.memory_space<vmem>>, vector<32x96xf32>
    %c0_5 = arith.constant 0 : index
    %c0_6 = arith.constant 0 : index
    %3 = vector.load %arg4[%c0_5, %c0_6] : memref<1x96xf32, #tpu.memory_space<vmem>>, vector<1x96xf32>
    %c0_7 = arith.constant 0 : index
    %c0_8 = arith.constant 0 : index
    %4 = vector.load %arg5[%c0_7, %c0_8] : memref<1x96xf32, #tpu.memory_space<vmem>>, vector<1x96xf32>
    %c0_9 = arith.constant 0 : index
    %c0_10 = arith.constant 0 : index
    %5 = vector.load %arg6[%c0_9, %c0_10] : memref<3x96xf32, #tpu.memory_space<vmem>>, vector<3x96xf32>
    %c0_11 = arith.constant 0 : index
    %c0_12 = arith.constant 0 : index
    %6 = vector.load %arg7[%c0_11, %c0_12] : memref<32x96xf32, #tpu.memory_space<vmem>>, vector<32x96xf32>
    %c0_13 = arith.constant 0 : index
    %c0_14 = arith.constant 0 : index
    %7 = vector.load %arg8[%c0_13, %c0_14] : memref<1x96xf32, #tpu.memory_space<vmem>>, vector<1x96xf32>
    %c0_15 = arith.constant 0 : index
    %c0_16 = arith.constant 0 : index
    %8 = vector.load %arg9[%c0_15, %c0_16] : memref<1x96xf32, #tpu.memory_space<vmem>>, vector<1x96xf32>
    %cst = arith.constant dense<0.000000e+00> : vector<64x96xf32>
    %9 = tpu.matmul %0, %1, %cst {dimension_numbers = #tpu.dot_dimension_numbers<[1], [0], [0], [1], [0, 0, 1, 1], [], []>} : vector<64x3xf32>, vector<3x96xf32>, vector<64x96xf32> -> vector<64x96xf32>
    %10 = vector.broadcast %3 : vector<1x96xf32> to vector<64x96xf32>
    %11 = arith.addf %9, %10 : vector<64x96xf32>
    %c0_17 = arith.constant 0 : index
    %c0_18 = arith.constant 0 : index
    %12 = vector.load %arg21[%c0_17, %c0_18] : memref<64x96xf32, #tpu.memory_space<vmem>>, vector<64x96xf32>
    tpu.vector_store %arg21[%c0_17, %c0_18], %11 {strides = array<i32>} : memref<64x96xf32, #tpu.memory_space<vmem>>, vector<64x96xf32>,
    %cst_19 = arith.constant dense<0.000000e+00> : vector<64x96xf32>
    %13 = tpu.matmul %0, %5, %cst_19 {dimension_numbers = #tpu.dot_dimension_numbers<[1], [0], [0], [1], [0, 0, 1, 1], [], []>} : vector<64x3xf32>, vector<3x96xf32>, vector<64x96xf32> -> vector<64x96xf32>
    %14 = vector.broadcast %7 : vector<1x96xf32> to vector<64x96xf32>
    %15 = arith.addf %13, %14 : vector<64x96xf32>
    %c0_20 = arith.constant 0 : index
    %c0_21 = arith.constant 0 : index
    %16 = vector.load %arg22[%c0_20, %c0_21] : memref<64x96xf32, #tpu.memory_space<vmem>>, vector<64x96xf32>
    tpu.vector_store %arg22[%c0_20, %c0_21], %15 {strides = array<i32>} : memref<64x96xf32, #tpu.memory_space<vmem>>, vector<64x96xf32>,
    %17 = vector.shape_cast %4 : vector<1x96xf32> to vector<1x96xf32>
    %18 = vector.broadcast %17 : vector<1x96xf32> to vector<8x96xf32>
    %19 = vector.shape_cast %8 : vector<1x96xf32> to vector<1x96xf32>
    %20 = vector.broadcast %19 : vector<1x96xf32> to vector<8x96xf32>
    %cst_22 = arith.constant 0.000000e+00 : f32
    %21 = vector.broadcast %cst_22 : f32 to vector<8x32xf32>
    %cst_23 = arith.constant 0.000000e+00 : f32
    %22 = vector.broadcast %cst_23 : f32 to vector<8x32xf32>
    %cst_24 = arith.constant dense<0.000000e+00> : vector<8x96xf32>
    %23 = tpu.matmul %21, %2, %cst_24 {dimension_numbers = #tpu.dot_dimension_numbers<[1], [0], [0], [1], [0, 0, 1, 1], [], []>} : vector<8x32xf32>, vector<32x96xf32>, vector<8x96xf32> -> vector<8x96xf32>
    %24 = arith.addf %23, %18 : vector<8x96xf32>
    %c0_25 = arith.constant 0 : index
    %c0_26 = arith.constant 0 : index
    %25 = vector.load %arg21[%c0_25, %c0_26] : memref<64x96xf32, #tpu.memory_space<vmem>>, vector<8x96xf32>
    %26 = vector.extract_strided_slice %25 {offsets = [0, 0], sizes = [8, 32], strides = [1, 1]} : vector<8x96xf32> to vector<8x32xf32>
    %27 = vector.extract_strided_slice %24 {offsets = [0, 0], sizes = [8, 32], strides = [1, 1]} : vector<8x96xf32> to vector<8x32xf32>
    %28 = arith.addf %26, %27 : vector<8x32xf32>
    %29 = arith.negf %28 : vector<8x32xf32>
    %30 = math.exp %29 : vector<8x32xf32>
    %cst_27 = arith.constant 1.000000e+00 : f32
    %31 = vector.broadcast %cst_27 : f32 to vector<8x32xf32>
    %32 = arith.addf %31, %30 : vector<8x32xf32>
    %33 = arith.divf %31, %32 : vector<8x32xf32>
    %34 = vector.extract_strided_slice %25 {offsets = [0, 32], sizes = [8, 32], strides = [1, 1]} : vector<8x96xf32> to vector<8x32xf32>
    %35 = vector.extract_strided_slice %24 {offsets = [0, 32], sizes = [8, 32], strides = [1, 1]} : vector<8x96xf32> to vector<8x32xf32>
    %36 = arith.addf %34, %35 : vector<8x32xf32>
    %37 = arith.negf %36 : vector<8x32xf32>
    %38 = math.exp %37 : vector<8x32xf32>
    %cst_28 = arith.constant 1.000000e+00 : f32
    %39 = vector.broadcast %cst_28 : f32 to vector<8x32xf32>
    %40 = arith.addf %39, %38 : vector<8x32xf32>
    %41 = arith.divf %39, %40 : vector<8x32xf32>
    %42 = vector.extract_strided_slice %25 {offsets = [0, 64], sizes = [8, 32], strides = [1, 1]} : vector<8x96xf32> to vector<8x32xf32>
    %43 = vector.extract_strided_slice %24 {offsets = [0, 64], sizes = [8, 32], strides = [1, 1]} : vector<8x96xf32> to vector<8x32xf32>
    %44 = arith.mulf %33, %43 : vector<8x32xf32>
    %45 = arith.addf %42, %44 : vector<8x32xf32>
    %46 = math.tanh %45 : vector<8x32xf32>
    %cst_29 = arith.constant 1.000000e+00 : f32
    %47 = vector.broadcast %cst_29 : f32 to vector<8x32xf32>
    %48 = arith.subf %47, %41 : vector<8x32xf32>
    %49 = arith.mulf %48, %46 : vector<8x32xf32>
    %50 = arith.mulf %41, %21 : vector<8x32xf32>
    %51 = arith.addf %49, %50 : vector<8x32xf32>
    %cst_30 = arith.constant dense<0.000000e+00> : vector<8x96xf32>
    %52 = tpu.matmul %22, %6, %cst_30 {dimension_numbers = #tpu.dot_dimension_numbers<[1], [0], [0], [1], [0, 0, 1, 1], [], []>} : vector<8x32xf32>, vector<32x96xf32>, vector<8x96xf32> -> vector<8x96xf32>
    %53 = arith.addf %52, %20 : vector<8x96xf32>
    %c56 = arith.constant 56 : index
    %c0_31 = arith.constant 0 : index
    %54 = vector.load %arg22[%c56, %c0_31] : memref<64x96xf32, #tpu.memory_space<vmem>>, vector<8x96xf32>
    %55 = vector.extract_strided_slice %54 {offsets = [0, 0], sizes = [8, 32], strides = [1, 1]} : vector<8x96xf32> to vector<8x32xf32>
    %56 = vector.extract_strided_slice %53 {offsets = [0, 0], sizes = [8, 32], strides = [1, 1]} : vector<8x96xf32> to vector<8x32xf32>
    %57 = arith.addf %55, %56 : vector<8x32xf32>
    %58 = arith.negf %57 : vector<8x32xf32>
    %59 = math.exp %58 : vector<8x32xf32>
    %cst_32 = arith.constant 1.000000e+00 : f32
    %60 = vector.broadcast %cst_32 : f32 to vector<8x32xf32>
    %61 = arith.addf %60, %59 : vector<8x32xf32>
    %62 = arith.divf %60, %61 : vector<8x32xf32>
    %63 = vector.extract_strided_slice %54 {offsets = [0, 32], sizes = [8, 32], strides = [1, 1]} : vector<8x96xf32> to vector<8x32xf32>
    %64 = vector.extract_strided_slice %53 {offsets = [0, 32], sizes = [8, 32], strides = [1, 1]} : vector<8x96xf32> to vector<8x32xf32>
    %65 = arith.addf %63, %64 : vector<8x32xf32>
    %66 = arith.negf %65 : vector<8x32xf32>
    %67 = math.exp %66 : vector<8x32xf32>
    %cst_33 = arith.constant 1.000000e+00 : f32
    %68 = vector.broadcast %cst_33 : f32 to vector<8x32xf32>
    %69 = arith.addf %68, %67 : vector<8x32xf32>
    %70 = arith.divf %68, %69 : vector<8x32xf32>
    %71 = vector.extract_strided_slice %54 {offsets = [0, 64], sizes = [8, 32], strides = [1, 1]} : vector<8x96xf32> to vector<8x32xf32>
    %72 = vector.extract_strided_slice %53 {offsets = [0, 64], sizes = [8, 32], strides = [1, 1]} : vector<8x96xf32> to vector<8x32xf32>
    %73 = arith.mulf %62, %72 : vector<8x32xf32>
    %74 = arith.addf %71, %73 : vector<8x32xf32>
    %75 = math.tanh %74 : vector<8x32xf32>
    %cst_34 = arith.constant 1.000000e+00 : f32
    %76 = vector.broadcast %cst_34 : f32 to vector<8x32xf32>
    %77 = arith.subf %76, %70 : vector<8x32xf32>
    %78 = arith.mulf %77, %75 : vector<8x32xf32>
    %79 = arith.mulf %70, %22 : vector<8x32xf32>
    %80 = arith.addf %78, %79 : vector<8x32xf32>
    %c0_35 = arith.constant 0 : index
    %c0_36 = arith.constant 0 : index
    %81 = vector.load %arg23[%c0_35, %c0_36] : memref<64x32xf32, #tpu.memory_space<vmem>>, vector<8x32xf32>
    tpu.vector_store %arg23[%c0_35, %c0_36], %51 {strides = array<i32>} : memref<64x32xf32, #tpu.memory_space<vmem>>, vector<8x32xf32>,
    %c56_37 = arith.constant 56 : index
    %c0_38 = arith.constant 0 : index
    %82 = vector.load %arg24[%c56_37, %c0_38] : memref<64x32xf32, #tpu.memory_space<vmem>>, vector<8x32xf32>
    tpu.vector_store %arg24[%c56_37, %c0_38], %80 {strides = array<i32>} : memref<64x32xf32, #tpu.memory_space<vmem>>, vector<8x32xf32>,
    %cst_39 = arith.constant dense<0.000000e+00> : vector<8x96xf32>
    %83 = tpu.matmul %51, %2, %cst_39 {dimension_numbers = #tpu.dot_dimension_numbers<[1], [0], [0], [1], [0, 0, 1, 1], [], []>} : vector<8x32xf32>, vector<32x96xf32>, vector<8x96xf32> -> vector<8x96xf32>
    %84 = arith.addf %83, %18 : vector<8x96xf32>
    %c8 = arith.constant 8 : index
    %c0_40 = arith.constant 0 : index
    %85 = vector.load %arg21[%c8, %c0_40] : memref<64x96xf32, #tpu.memory_space<vmem>>, vector<8x96xf32>
    %86 = vector.extract_strided_slice %85 {offsets = [0, 0], sizes = [8, 32], strides = [1, 1]} : vector<8x96xf32> to vector<8x32xf32>
    %87 = vector.extract_strided_slice %84 {offsets = [0, 0], sizes = [8, 32], strides = [1, 1]} : vector<8x96xf32> to vector<8x32xf32>
    %88 = arith.addf %86, %87 : vector<8x32xf32>
    %89 = arith.negf %88 : vector<8x32xf32>
    %90 = math.exp %89 : vector<8x32xf32>
    %cst_41 = arith.constant 1.000000e+00 : f32
    %91 = vector.broadcast %cst_41 : f32 to vector<8x32xf32>
    %92 = arith.addf %91, %90 : vector<8x32xf32>
    %93 = arith.divf %91, %92 : vector<8x32xf32>
    %94 = vector.extract_strided_slice %85 {offsets = [0, 32], sizes = [8, 32], strides = [1, 1]} : vector<8x96xf32> to vector<8x32xf32>
    %95 = vector.extract_strided_slice %84 {offsets = [0, 32], sizes = [8, 32], strides = [1, 1]} : vector<8x96xf32> to vector<8x32xf32>
    %96 = arith.addf %94, %95 : vector<8x32xf32>
    %97 = arith.negf %96 : vector<8x32xf32>
    %98 = math.exp %97 : vector<8x32xf32>
    %cst_42 = arith.constant 1.000000e+00 : f32
    %99 = vector.broadcast %cst_42 : f32 to vector<8x32xf32>
    %100 = arith.addf %99, %98 : vector<8x32xf32>
    %101 = arith.divf %99, %100 : vector<8x32xf32>
    %102 = vector.extract_strided_slice %85 {offsets = [0, 64], sizes = [8, 32], strides = [1, 1]} : vector<8x96xf32> to vector<8x32xf32>
    %103 = vector.extract_strided_slice %84 {offsets = [0, 64], sizes = [8, 32], strides = [1, 1]} : vector<8x96xf32> to vector<8x32xf32>
    %104 = arith.mulf %93, %103 : vector<8x32xf32>
    %105 = arith.addf %102, %104 : vector<8x32xf32>
    %106 = math.tanh %105 : vector<8x32xf32>
    %cst_43 = arith.constant 1.000000e+00 : f32
    %107 = vector.broadcast %cst_43 : f32 to vector<8x32xf32>
    %108 = arith.subf %107, %101 : vector<8x32xf32>
    %109 = arith.mulf %108, %106 : vector<8x32xf32>
    %110 = arith.mulf %101, %51 : vector<8x32xf32>
    %111 = arith.addf %109, %110 : vector<8x32xf32>
    %cst_44 = arith.constant dense<0.000000e+00> : vector<8x96xf32>
    %112 = tpu.matmul %80, %6, %cst_44 {dimension_numbers = #tpu.dot_dimension_numbers<[1], [0], [0], [1], [0, 0, 1, 1], [], []>} : vector<8x32xf32>, vector<32x96xf32>, vector<8x96xf32> -> vector<8x96xf32>
    %113 = arith.addf %112, %20 : vector<8x96xf32>
    %c48 = arith.constant 48 : index
    %c0_45 = arith.constant 0 : index
    %114 = vector.load %arg22[%c48, %c0_45] : memref<64x96xf32, #tpu.memory_space<vmem>>, vector<8x96xf32>
    %115 = vector.extract_strided_slice %114 {offsets = [0, 0], sizes = [8, 32], strides = [1, 1]} : vector<8x96xf32> to vector<8x32xf32>
    %116 = vector.extract_strided_slice %113 {offsets = [0, 0], sizes = [8, 32], strides = [1, 1]} : vector<8x96xf32> to vector<8x32xf32>
    %117 = arith.addf %115, %116 : vector<8x32xf32>
    %118 = arith.negf %117 : vector<8x32xf32>
    %119 = math.exp %118 : vector<8x32xf32>
    %cst_46 = arith.constant 1.000000e+00 : f32
    %120 = vector.broadcast %cst_46 : f32 to vector<8x32xf32>
    %121 = arith.addf %120, %119 : vector<8x32xf32>
    %122 = arith.divf %120, %121 : vector<8x32xf32>
    %123 = vector.extract_strided_slice %114 {offsets = [0, 32], sizes = [8, 32], strides = [1, 1]} : vector<8x96xf32> to vector<8x32xf32>
    %124 = vector.extract_strided_slice %113 {offsets = [0, 32], sizes = [8, 32], strides = [1, 1]} : vector<8x96xf32> to vector<8x32xf32>
    %125 = arith.addf %123, %124 : vector<8x32xf32>
    %126 = arith.negf %125 : vector<8x32xf32>
    %127 = math.exp %126 : vector<8x32xf32>
    %cst_47 = arith.constant 1.000000e+00 : f32
    %128 = vector.broadcast %cst_47 : f32 to vector<8x32xf32>
    %129 = arith.addf %128, %127 : vector<8x32xf32>
    %130 = arith.divf %128, %129 : vector<8x32xf32>
    %131 = vector.extract_strided_slice %114 {offsets = [0, 64], sizes = [8, 32], strides = [1, 1]} : vector<8x96xf32> to vector<8x32xf32>
    %132 = vector.extract_strided_slice %113 {offsets = [0, 64], sizes = [8, 32], strides = [1, 1]} : vector<8x96xf32> to vector<8x32xf32>
    %133 = arith.mulf %122, %132 : vector<8x32xf32>
    %134 = arith.addf %131, %133 : vector<8x32xf32>
    %135 = math.tanh %134 : vector<8x32xf32>
    %cst_48 = arith.constant 1.000000e+00 : f32
    %136 = vector.broadcast %cst_48 : f32 to vector<8x32xf32>
    %137 = arith.subf %136, %130 : vector<8x32xf32>
    %138 = arith.mulf %137, %135 : vector<8x32xf32>
    %139 = arith.mulf %130, %80 : vector<8x32xf32>
    %140 = arith.addf %138, %139 : vector<8x32xf32>
    %c8_49 = arith.constant 8 : index
    %c0_50 = arith.constant 0 : index
    %141 = vector.load %arg23[%c8_49, %c0_50] : memref<64x32xf32, #tpu.memory_space<vmem>>, vector<8x32xf32>
    tpu.vector_store %arg23[%c8_49, %c0_50], %111 {strides = array<i32>} : memref<64x32xf32, #tpu.memory_space<vmem>>, vector<8x32xf32>,
    %c48_51 = arith.constant 48 : index
    %c0_52 = arith.constant 0 : index
    %142 = vector.load %arg24[%c48_51, %c0_52] : memref<64x32xf32, #tpu.memory_space<vmem>>, vector<8x32xf32>
    tpu.vector_store %arg24[%c48_51, %c0_52], %140 {strides = array<i32>} : memref<64x32xf32, #tpu.memory_space<vmem>>, vector<8x32xf32>,
    %cst_53 = arith.constant dense<0.000000e+00> : vector<8x96xf32>
    %143 = tpu.matmul %111, %2, %cst_53 {dimension_numbers = #tpu.dot_dimension_numbers<[1], [0], [0], [1], [0, 0, 1, 1], [], []>} : vector<8x32xf32>, vector<32x96xf32>, vector<8x96xf32> -> vector<8x96xf32>
    %144 = arith.addf %143, %18 : vector<8x96xf32>
    %c16 = arith.constant 16 : index
    %c0_54 = arith.constant 0 : index
    %145 = vector.load %arg21[%c16, %c0_54] : memref<64x96xf32, #tpu.memory_space<vmem>>, vector<8x96xf32>
    %146 = vector.extract_strided_slice %145 {offsets = [0, 0], sizes = [8, 32], strides = [1, 1]} : vector<8x96xf32> to vector<8x32xf32>
    %147 = vector.extract_strided_slice %144 {offsets = [0, 0], sizes = [8, 32], strides = [1, 1]} : vector<8x96xf32> to vector<8x32xf32>
    %148 = arith.addf %146, %147 : vector<8x32xf32>
    %149 = arith.negf %148 : vector<8x32xf32>
    %150 = math.exp %149 : vector<8x32xf32>
    %cst_55 = arith.constant 1.000000e+00 : f32
    %151 = vector.broadcast %cst_55 : f32 to vector<8x32xf32>
    %152 = arith.addf %151, %150 : vector<8x32xf32>
    %153 = arith.divf %151, %152 : vector<8x32xf32>
    %154 = vector.extract_strided_slice %145 {offsets = [0, 32], sizes = [8, 32], strides = [1, 1]} : vector<8x96xf32> to vector<8x32xf32>
    %155 = vector.extract_strided_slice %144 {offsets = [0, 32], sizes = [8, 32], strides = [1, 1]} : vector<8x96xf32> to vector<8x32xf32>
    %156 = arith.addf %154, %155 : vector<8x32xf32>
    %157 = arith.negf %156 : vector<8x32xf32>
    %158 = math.exp %157 : vector<8x32xf32>
    %cst_56 = arith.constant 1.000000e+00 : f32
    %159 = vector.broadcast %cst_56 : f32 to vector<8x32xf32>
    %160 = arith.addf %159, %158 : vector<8x32xf32>
    %161 = arith.divf %159, %160 : vector<8x32xf32>
    %162 = vector.extract_strided_slice %145 {offsets = [0, 64], sizes = [8, 32], strides = [1, 1]} : vector<8x96xf32> to vector<8x32xf32>
    %163 = vector.extract_strided_slice %144 {offsets = [0, 64], sizes = [8, 32], strides = [1, 1]} : vector<8x96xf32> to vector<8x32xf32>
    %164 = arith.mulf %153, %163 : vector<8x32xf32>
    %165 = arith.addf %162, %164 : vector<8x32xf32>
    %166 = math.tanh %165 : vector<8x32xf32>
    %cst_57 = arith.constant 1.000000e+00 : f32
    %167 = vector.broadcast %cst_57 : f32 to vector<8x32xf32>
    %168 = arith.subf %167, %161 : vector<8x32xf32>
    %169 = arith.mulf %168, %166 : vector<8x32xf32>
    %170 = arith.mulf %161, %111 : vector<8x32xf32>
    %171 = arith.addf %169, %170 : vector<8x32xf32>
    %cst_58 = arith.constant dense<0.000000e+00> : vector<8x96xf32>
    %172 = tpu.matmul %140, %6, %cst_58 {dimension_numbers = #tpu.dot_dimension_numbers<[1], [0], [0], [1], [0, 0, 1, 1], [], []>} : vector<8x32xf32>, vector<32x96xf32>, vector<8x96xf32> -> vector<8x96xf32>
    %173 = arith.addf %172, %20 : vector<8x96xf32>
    %c40 = arith.constant 40 : index
    %c0_59 = arith.constant 0 : index
    %174 = vector.load %arg22[%c40, %c0_59] : memref<64x96xf32, #tpu.memory_space<vmem>>, vector<8x96xf32>
    %175 = vector.extract_strided_slice %174 {offsets = [0, 0], sizes = [8, 32], strides = [1, 1]} : vector<8x96xf32> to vector<8x32xf32>
    %176 = vector.extract_strided_slice %173 {offsets = [0, 0], sizes = [8, 32], strides = [1, 1]} : vector<8x96xf32> to vector<8x32xf32>
    %177 = arith.addf %175, %176 : vector<8x32xf32>
    %178 = arith.negf %177 : vector<8x32xf32>
    %179 = math.exp %178 : vector<8x32xf32>
    %cst_60 = arith.constant 1.000000e+00 : f32
    %180 = vector.broadcast %cst_60 : f32 to vector<8x32xf32>
    %181 = arith.addf %180, %179 : vector<8x32xf32>
    %182 = arith.divf %180, %181 : vector<8x32xf32>
    %183 = vector.extract_strided_slice %174 {offsets = [0, 32], sizes = [8, 32], strides = [1, 1]} : vector<8x96xf32> to vector<8x32xf32>
    %184 = vector.extract_strided_slice %173 {offsets = [0, 32], sizes = [8, 32], strides = [1, 1]} : vector<8x96xf32> to vector<8x32xf32>
    %185 = arith.addf %183, %184 : vector<8x32xf32>
    %186 = arith.negf %185 : vector<8x32xf32>
    %187 = math.exp %186 : vector<8x32xf32>
    %cst_61 = arith.constant 1.000000e+00 : f32
    %188 = vector.broadcast %cst_61 : f32 to vector<8x32xf32>
    %189 = arith.addf %188, %187 : vector<8x32xf32>
    %190 = arith.divf %188, %189 : vector<8x32xf32>
    %191 = vector.extract_strided_slice %174 {offsets = [0, 64], sizes = [8, 32], strides = [1, 1]} : vector<8x96xf32> to vector<8x32xf32>
    %192 = vector.extract_strided_slice %173 {offsets = [0, 64], sizes = [8, 32], strides = [1, 1]} : vector<8x96xf32> to vector<8x32xf32>
    %193 = arith.mulf %182, %192 : vector<8x32xf32>
    %194 = arith.addf %191, %193 : vector<8x32xf32>
    %195 = math.tanh %194 : vector<8x32xf32>
    %cst_62 = arith.constant 1.000000e+00 : f32
    %196 = vector.broadcast %cst_62 : f32 to vector<8x32xf32>
    %197 = arith.subf %196, %190 : vector<8x32xf32>
    %198 = arith.mulf %197, %195 : vector<8x32xf32>
    %199 = arith.mulf %190, %140 : vector<8x32xf32>
    %200 = arith.addf %198, %199 : vector<8x32xf32>
    %c16_63 = arith.constant 16 : index
    %c0_64 = arith.constant 0 : index
    %201 = vector.load %arg23[%c16_63, %c0_64] : memref<64x32xf32, #tpu.memory_space<vmem>>, vector<8x32xf32>
    tpu.vector_store %arg23[%c16_63, %c0_64], %171 {strides = array<i32>} : memref<64x32xf32, #tpu.memory_space<vmem>>, vector<8x32xf32>,
    %c40_65 = arith.constant 40 : index
    %c0_66 = arith.constant 0 : index
    %202 = vector.load %arg24[%c40_65, %c0_66] : memref<64x32xf32, #tpu.memory_space<vmem>>, vector<8x32xf32>
    tpu.vector_store %arg24[%c40_65, %c0_66], %200 {strides = array<i32>} : memref<64x32xf32, #tpu.memory_space<vmem>>, vector<8x32xf32>,
    %cst_67 = arith.constant dense<0.000000e+00> : vector<8x96xf32>
    %203 = tpu.matmul %171, %2, %cst_67 {dimension_numbers = #tpu.dot_dimension_numbers<[1], [0], [0], [1], [0, 0, 1, 1], [], []>} : vector<8x32xf32>, vector<32x96xf32>, vector<8x96xf32> -> vector<8x96xf32>
    %204 = arith.addf %203, %18 : vector<8x96xf32>
    %c24 = arith.constant 24 : index
    %c0_68 = arith.constant 0 : index
    %205 = vector.load %arg21[%c24, %c0_68] : memref<64x96xf32, #tpu.memory_space<vmem>>, vector<8x96xf32>
    %206 = vector.extract_strided_slice %205 {offsets = [0, 0], sizes = [8, 32], strides = [1, 1]} : vector<8x96xf32> to vector<8x32xf32>
    %207 = vector.extract_strided_slice %204 {offsets = [0, 0], sizes = [8, 32], strides = [1, 1]} : vector<8x96xf32> to vector<8x32xf32>
    %208 = arith.addf %206, %207 : vector<8x32xf32>
    %209 = arith.negf %208 : vector<8x32xf32>
    %210 = math.exp %209 : vector<8x32xf32>
    %cst_69 = arith.constant 1.000000e+00 : f32
    %211 = vector.broadcast %cst_69 : f32 to vector<8x32xf32>
    %212 = arith.addf %211, %210 : vector<8x32xf32>
    %213 = arith.divf %211, %212 : vector<8x32xf32>
    %214 = vector.extract_strided_slice %205 {offsets = [0, 32], sizes = [8, 32], strides = [1, 1]} : vector<8x96xf32> to vector<8x32xf32>
    %215 = vector.extract_strided_slice %204 {offsets = [0, 32], sizes = [8, 32], strides = [1, 1]} : vector<8x96xf32> to vector<8x32xf32>
    %216 = arith.addf %214, %215 : vector<8x32xf32>
    %217 = arith.negf %216 : vector<8x32xf32>
    %218 = math.exp %217 : vector<8x32xf32>
    %cst_70 = arith.constant 1.000000e+00 : f32
    %219 = vector.broadcast %cst_70 : f32 to vector<8x32xf32>
    %220 = arith.addf %219, %218 : vector<8x32xf32>
    %221 = arith.divf %219, %220 : vector<8x32xf32>
    %222 = vector.extract_strided_slice %205 {offsets = [0, 64], sizes = [8, 32], strides = [1, 1]} : vector<8x96xf32> to vector<8x32xf32>
    %223 = vector.extract_strided_slice %204 {offsets = [0, 64], sizes = [8, 32], strides = [1, 1]} : vector<8x96xf32> to vector<8x32xf32>
    %224 = arith.mulf %213, %223 : vector<8x32xf32>
    %225 = arith.addf %222, %224 : vector<8x32xf32>
    %226 = math.tanh %225 : vector<8x32xf32>
    %cst_71 = arith.constant 1.000000e+00 : f32
    %227 = vector.broadcast %cst_71 : f32 to vector<8x32xf32>
    %228 = arith.subf %227, %221 : vector<8x32xf32>
    %229 = arith.mulf %228, %226 : vector<8x32xf32>
    %230 = arith.mulf %221, %171 : vector<8x32xf32>
    %231 = arith.addf %229, %230 : vector<8x32xf32>
    %cst_72 = arith.constant dense<0.000000e+00> : vector<8x96xf32>
    %232 = tpu.matmul %200, %6, %cst_72 {dimension_numbers = #tpu.dot_dimension_numbers<[1], [0], [0], [1], [0, 0, 1, 1], [], []>} : vector<8x32xf32>, vector<32x96xf32>, vector<8x96xf32> -> vector<8x96xf32>
    %233 = arith.addf %232, %20 : vector<8x96xf32>
    %c32 = arith.constant 32 : index
    %c0_73 = arith.constant 0 : index
    %234 = vector.load %arg22[%c32, %c0_73] : memref<64x96xf32, #tpu.memory_space<vmem>>, vector<8x96xf32>
    %235 = vector.extract_strided_slice %234 {offsets = [0, 0], sizes = [8, 32], strides = [1, 1]} : vector<8x96xf32> to vector<8x32xf32>
    %236 = vector.extract_strided_slice %233 {offsets = [0, 0], sizes = [8, 32], strides = [1, 1]} : vector<8x96xf32> to vector<8x32xf32>
    %237 = arith.addf %235, %236 : vector<8x32xf32>
    %238 = arith.negf %237 : vector<8x32xf32>
    %239 = math.exp %238 : vector<8x32xf32>
    %cst_74 = arith.constant 1.000000e+00 : f32
    %240 = vector.broadcast %cst_74 : f32 to vector<8x32xf32>
    %241 = arith.addf %240, %239 : vector<8x32xf32>
    %242 = arith.divf %240, %241 : vector<8x32xf32>
    %243 = vector.extract_strided_slice %234 {offsets = [0, 32], sizes = [8, 32], strides = [1, 1]} : vector<8x96xf32> to vector<8x32xf32>
    %244 = vector.extract_strided_slice %233 {offsets = [0, 32], sizes = [8, 32], strides = [1, 1]} : vector<8x96xf32> to vector<8x32xf32>
    %245 = arith.addf %243, %244 : vector<8x32xf32>
    %246 = arith.negf %245 : vector<8x32xf32>
    %247 = math.exp %246 : vector<8x32xf32>
    %cst_75 = arith.constant 1.000000e+00 : f32
    %248 = vector.broadcast %cst_75 : f32 to vector<8x32xf32>
    %249 = arith.addf %248, %247 : vector<8x32xf32>
    %250 = arith.divf %248, %249 : vector<8x32xf32>
    %251 = vector.extract_strided_slice %234 {offsets = [0, 64], sizes = [8, 32], strides = [1, 1]} : vector<8x96xf32> to vector<8x32xf32>
    %252 = vector.extract_strided_slice %233 {offsets = [0, 64], sizes = [8, 32], strides = [1, 1]} : vector<8x96xf32> to vector<8x32xf32>
    %253 = arith.mulf %242, %252 : vector<8x32xf32>
    %254 = arith.addf %251, %253 : vector<8x32xf32>
    %255 = math.tanh %254 : vector<8x32xf32>
    %cst_76 = arith.constant 1.000000e+00 : f32
    %256 = vector.broadcast %cst_76 : f32 to vector<8x32xf32>
    %257 = arith.subf %256, %250 : vector<8x32xf32>
    %258 = arith.mulf %257, %255 : vector<8x32xf32>
    %259 = arith.mulf %250, %200 : vector<8x32xf32>
    %260 = arith.addf %258, %259 : vector<8x32xf32>
    %c24_77 = arith.constant 24 : index
    %c0_78 = arith.constant 0 : index
    %261 = vector.load %arg23[%c24_77, %c0_78] : memref<64x32xf32, #tpu.memory_space<vmem>>, vector<8x32xf32>
    tpu.vector_store %arg23[%c24_77, %c0_78], %231 {strides = array<i32>} : memref<64x32xf32, #tpu.memory_space<vmem>>, vector<8x32xf32>,
    %c32_79 = arith.constant 32 : index
    %c0_80 = arith.constant 0 : index
    %262 = vector.load %arg24[%c32_79, %c0_80] : memref<64x32xf32, #tpu.memory_space<vmem>>, vector<8x32xf32>
    tpu.vector_store %arg24[%c32_79, %c0_80], %260 {strides = array<i32>} : memref<64x32xf32, #tpu.memory_space<vmem>>, vector<8x32xf32>,
    %cst_81 = arith.constant dense<0.000000e+00> : vector<8x96xf32>
    %263 = tpu.matmul %231, %2, %cst_81 {dimension_numbers = #tpu.dot_dimension_numbers<[1], [0], [0], [1], [0, 0, 1, 1], [], []>} : vector<8x32xf32>, vector<32x96xf32>, vector<8x96xf32> -> vector<8x96xf32>
    %264 = arith.addf %263, %18 : vector<8x96xf32>
    %c32_82 = arith.constant 32 : index
    %c0_83 = arith.constant 0 : index
    %265 = vector.load %arg21[%c32_82, %c0_83] : memref<64x96xf32, #tpu.memory_space<vmem>>, vector<8x96xf32>
    %266 = vector.extract_strided_slice %265 {offsets = [0, 0], sizes = [8, 32], strides = [1, 1]} : vector<8x96xf32> to vector<8x32xf32>
    %267 = vector.extract_strided_slice %264 {offsets = [0, 0], sizes = [8, 32], strides = [1, 1]} : vector<8x96xf32> to vector<8x32xf32>
    %268 = arith.addf %266, %267 : vector<8x32xf32>
    %269 = arith.negf %268 : vector<8x32xf32>
    %270 = math.exp %269 : vector<8x32xf32>
    %cst_84 = arith.constant 1.000000e+00 : f32
    %271 = vector.broadcast %cst_84 : f32 to vector<8x32xf32>
    %272 = arith.addf %271, %270 : vector<8x32xf32>
    %273 = arith.divf %271, %272 : vector<8x32xf32>
    %274 = vector.extract_strided_slice %265 {offsets = [0, 32], sizes = [8, 32], strides = [1, 1]} : vector<8x96xf32> to vector<8x32xf32>
    %275 = vector.extract_strided_slice %264 {offsets = [0, 32], sizes = [8, 32], strides = [1, 1]} : vector<8x96xf32> to vector<8x32xf32>
    %276 = arith.addf %274, %275 : vector<8x32xf32>
    %277 = arith.negf %276 : vector<8x32xf32>
    %278 = math.exp %277 : vector<8x32xf32>
    %cst_85 = arith.constant 1.000000e+00 : f32
    %279 = vector.broadcast %cst_85 : f32 to vector<8x32xf32>
    %280 = arith.addf %279, %278 : vector<8x32xf32>
    %281 = arith.divf %279, %280 : vector<8x32xf32>
    %282 = vector.extract_strided_slice %265 {offsets = [0, 64], sizes = [8, 32], strides = [1, 1]} : vector<8x96xf32> to vector<8x32xf32>
    %283 = vector.extract_strided_slice %264 {offsets = [0, 64], sizes = [8, 32], strides = [1, 1]} : vector<8x96xf32> to vector<8x32xf32>
    %284 = arith.mulf %273, %283 : vector<8x32xf32>
    %285 = arith.addf %282, %284 : vector<8x32xf32>
    %286 = math.tanh %285 : vector<8x32xf32>
    %cst_86 = arith.constant 1.000000e+00 : f32
    %287 = vector.broadcast %cst_86 : f32 to vector<8x32xf32>
    %288 = arith.subf %287, %281 : vector<8x32xf32>
    %289 = arith.mulf %288, %286 : vector<8x32xf32>
    %290 = arith.mulf %281, %231 : vector<8x32xf32>
    %291 = arith.addf %289, %290 : vector<8x32xf32>
    %cst_87 = arith.constant dense<0.000000e+00> : vector<8x96xf32>
    %292 = tpu.matmul %260, %6, %cst_87 {dimension_numbers = #tpu.dot_dimension_numbers<[1], [0], [0], [1], [0, 0, 1, 1], [], []>} : vector<8x32xf32>, vector<32x96xf32>, vector<8x96xf32> -> vector<8x96xf32>
    %293 = arith.addf %292, %20 : vector<8x96xf32>
    %c24_88 = arith.constant 24 : index
    %c0_89 = arith.constant 0 : index
    %294 = vector.load %arg22[%c24_88, %c0_89] : memref<64x96xf32, #tpu.memory_space<vmem>>, vector<8x96xf32>
    %295 = vector.extract_strided_slice %294 {offsets = [0, 0], sizes = [8, 32], strides = [1, 1]} : vector<8x96xf32> to vector<8x32xf32>
    %296 = vector.extract_strided_slice %293 {offsets = [0, 0], sizes = [8, 32], strides = [1, 1]} : vector<8x96xf32> to vector<8x32xf32>
    %297 = arith.addf %295, %296 : vector<8x32xf32>
    %298 = arith.negf %297 : vector<8x32xf32>
    %299 = math.exp %298 : vector<8x32xf32>
    %cst_90 = arith.constant 1.000000e+00 : f32
    %300 = vector.broadcast %cst_90 : f32 to vector<8x32xf32>
    %301 = arith.addf %300, %299 : vector<8x32xf32>
    %302 = arith.divf %300, %301 : vector<8x32xf32>
    %303 = vector.extract_strided_slice %294 {offsets = [0, 32], sizes = [8, 32], strides = [1, 1]} : vector<8x96xf32> to vector<8x32xf32>
    %304 = vector.extract_strided_slice %293 {offsets = [0, 32], sizes = [8, 32], strides = [1, 1]} : vector<8x96xf32> to vector<8x32xf32>
    %305 = arith.addf %303, %304 : vector<8x32xf32>
    %306 = arith.negf %305 : vector<8x32xf32>
    %307 = math.exp %306 : vector<8x32xf32>
    %cst_91 = arith.constant 1.000000e+00 : f32
    %308 = vector.broadcast %cst_91 : f32 to vector<8x32xf32>
    %309 = arith.addf %308, %307 : vector<8x32xf32>
    %310 = arith.divf %308, %309 : vector<8x32xf32>
    %311 = vector.extract_strided_slice %294 {offsets = [0, 64], sizes = [8, 32], strides = [1, 1]} : vector<8x96xf32> to vector<8x32xf32>
    %312 = vector.extract_strided_slice %293 {offsets = [0, 64], sizes = [8, 32], strides = [1, 1]} : vector<8x96xf32> to vector<8x32xf32>
    %313 = arith.mulf %302, %312 : vector<8x32xf32>
    %314 = arith.addf %311, %313 : vector<8x32xf32>
    %315 = math.tanh %314 : vector<8x32xf32>
    %cst_92 = arith.constant 1.000000e+00 : f32
    %316 = vector.broadcast %cst_92 : f32 to vector<8x32xf32>
    %317 = arith.subf %316, %310 : vector<8x32xf32>
    %318 = arith.mulf %317, %315 : vector<8x32xf32>
    %319 = arith.mulf %310, %260 : vector<8x32xf32>
    %320 = arith.addf %318, %319 : vector<8x32xf32>
    %c32_93 = arith.constant 32 : index
    %c0_94 = arith.constant 0 : index
    %321 = vector.load %arg23[%c32_93, %c0_94] : memref<64x32xf32, #tpu.memory_space<vmem>>, vector<8x32xf32>
    tpu.vector_store %arg23[%c32_93, %c0_94], %291 {strides = array<i32>} : memref<64x32xf32, #tpu.memory_space<vmem>>, vector<8x32xf32>,
    %c24_95 = arith.constant 24 : index
    %c0_96 = arith.constant 0 : index
    %322 = vector.load %arg24[%c24_95, %c0_96] : memref<64x32xf32, #tpu.memory_space<vmem>>, vector<8x32xf32>
    tpu.vector_store %arg24[%c24_95, %c0_96], %320 {strides = array<i32>} : memref<64x32xf32, #tpu.memory_space<vmem>>, vector<8x32xf32>,
    %cst_97 = arith.constant dense<0.000000e+00> : vector<8x96xf32>
    %323 = tpu.matmul %291, %2, %cst_97 {dimension_numbers = #tpu.dot_dimension_numbers<[1], [0], [0], [1], [0, 0, 1, 1], [], []>} : vector<8x32xf32>, vector<32x96xf32>, vector<8x96xf32> -> vector<8x96xf32>
    %324 = arith.addf %323, %18 : vector<8x96xf32>
    %c40_98 = arith.constant 40 : index
    %c0_99 = arith.constant 0 : index
    %325 = vector.load %arg21[%c40_98, %c0_99] : memref<64x96xf32, #tpu.memory_space<vmem>>, vector<8x96xf32>
    %326 = vector.extract_strided_slice %325 {offsets = [0, 0], sizes = [8, 32], strides = [1, 1]} : vector<8x96xf32> to vector<8x32xf32>
    %327 = vector.extract_strided_slice %324 {offsets = [0, 0], sizes = [8, 32], strides = [1, 1]} : vector<8x96xf32> to vector<8x32xf32>
    %328 = arith.addf %326, %327 : vector<8x32xf32>
    %329 = arith.negf %328 : vector<8x32xf32>
    %330 = math.exp %329 : vector<8x32xf32>
    %cst_100 = arith.constant 1.000000e+00 : f32
    %331 = vector.broadcast %cst_100 : f32 to vector<8x32xf32>
    %332 = arith.addf %331, %330 : vector<8x32xf32>
    %333 = arith.divf %331, %332 : vector<8x32xf32>
    %334 = vector.extract_strided_slice %325 {offsets = [0, 32], sizes = [8, 32], strides = [1, 1]} : vector<8x96xf32> to vector<8x32xf32>
    %335 = vector.extract_strided_slice %324 {offsets = [0, 32], sizes = [8, 32], strides = [1, 1]} : vector<8x96xf32> to vector<8x32xf32>
    %336 = arith.addf %334, %335 : vector<8x32xf32>
    %337 = arith.negf %336 : vector<8x32xf32>
    %338 = math.exp %337 : vector<8x32xf32>
    %cst_101 = arith.constant 1.000000e+00 : f32
    %339 = vector.broadcast %cst_101 : f32 to vector<8x32xf32>
    %340 = arith.addf %339, %338 : vector<8x32xf32>
    %341 = arith.divf %339, %340 : vector<8x32xf32>
    %342 = vector.extract_strided_slice %325 {offsets = [0, 64], sizes = [8, 32], strides = [1, 1]} : vector<8x96xf32> to vector<8x32xf32>
    %343 = vector.extract_strided_slice %324 {offsets = [0, 64], sizes = [8, 32], strides = [1, 1]} : vector<8x96xf32> to vector<8x32xf32>
    %344 = arith.mulf %333, %343 : vector<8x32xf32>
    %345 = arith.addf %342, %344 : vector<8x32xf32>
    %346 = math.tanh %345 : vector<8x32xf32>
    %cst_102 = arith.constant 1.000000e+00 : f32
    %347 = vector.broadcast %cst_102 : f32 to vector<8x32xf32>
    %348 = arith.subf %347, %341 : vector<8x32xf32>
    %349 = arith.mulf %348, %346 : vector<8x32xf32>
    %350 = arith.mulf %341, %291 : vector<8x32xf32>
    %351 = arith.addf %349, %350 : vector<8x32xf32>
    %cst_103 = arith.constant dense<0.000000e+00> : vector<8x96xf32>
    %352 = tpu.matmul %320, %6, %cst_103 {dimension_numbers = #tpu.dot_dimension_numbers<[1], [0], [0], [1], [0, 0, 1, 1], [], []>} : vector<8x32xf32>, vector<32x96xf32>, vector<8x96xf32> -> vector<8x96xf32>
    %353 = arith.addf %352, %20 : vector<8x96xf32>
    %c16_104 = arith.constant 16 : index
    %c0_105 = arith.constant 0 : index
    %354 = vector.load %arg22[%c16_104, %c0_105] : memref<64x96xf32, #tpu.memory_space<vmem>>, vector<8x96xf32>
    %355 = vector.extract_strided_slice %354 {offsets = [0, 0], sizes = [8, 32], strides = [1, 1]} : vector<8x96xf32> to vector<8x32xf32>
    %356 = vector.extract_strided_slice %353 {offsets = [0, 0], sizes = [8, 32], strides = [1, 1]} : vector<8x96xf32> to vector<8x32xf32>
    %357 = arith.addf %355, %356 : vector<8x32xf32>
    %358 = arith.negf %357 : vector<8x32xf32>
    %359 = math.exp %358 : vector<8x32xf32>
    %cst_106 = arith.constant 1.000000e+00 : f32
    %360 = vector.broadcast %cst_106 : f32 to vector<8x32xf32>
    %361 = arith.addf %360, %359 : vector<8x32xf32>
    %362 = arith.divf %360, %361 : vector<8x32xf32>
    %363 = vector.extract_strided_slice %354 {offsets = [0, 32], sizes = [8, 32], strides = [1, 1]} : vector<8x96xf32> to vector<8x32xf32>
    %364 = vector.extract_strided_slice %353 {offsets = [0, 32], sizes = [8, 32], strides = [1, 1]} : vector<8x96xf32> to vector<8x32xf32>
    %365 = arith.addf %363, %364 : vector<8x32xf32>
    %366 = arith.negf %365 : vector<8x32xf32>
    %367 = math.exp %366 : vector<8x32xf32>
    %cst_107 = arith.constant 1.000000e+00 : f32
    %368 = vector.broadcast %cst_107 : f32 to vector<8x32xf32>
    %369 = arith.addf %368, %367 : vector<8x32xf32>
    %370 = arith.divf %368, %369 : vector<8x32xf32>
    %371 = vector.extract_strided_slice %354 {offsets = [0, 64], sizes = [8, 32], strides = [1, 1]} : vector<8x96xf32> to vector<8x32xf32>
    %372 = vector.extract_strided_slice %353 {offsets = [0, 64], sizes = [8, 32], strides = [1, 1]} : vector<8x96xf32> to vector<8x32xf32>
    %373 = arith.mulf %362, %372 : vector<8x32xf32>
    %374 = arith.addf %371, %373 : vector<8x32xf32>
    %375 = math.tanh %374 : vector<8x32xf32>
    %cst_108 = arith.constant 1.000000e+00 : f32
    %376 = vector.broadcast %cst_108 : f32 to vector<8x32xf32>
    %377 = arith.subf %376, %370 : vector<8x32xf32>
    %378 = arith.mulf %377, %375 : vector<8x32xf32>
    %379 = arith.mulf %370, %320 : vector<8x32xf32>
    %380 = arith.addf %378, %379 : vector<8x32xf32>
    %c40_109 = arith.constant 40 : index
    %c0_110 = arith.constant 0 : index
    %381 = vector.load %arg23[%c40_109, %c0_110] : memref<64x32xf32, #tpu.memory_space<vmem>>, vector<8x32xf32>
    tpu.vector_store %arg23[%c40_109, %c0_110], %351 {strides = array<i32>} : memref<64x32xf32, #tpu.memory_space<vmem>>, vector<8x32xf32>,
    %c16_111 = arith.constant 16 : index
    %c0_112 = arith.constant 0 : index
    %382 = vector.load %arg24[%c16_111, %c0_112] : memref<64x32xf32, #tpu.memory_space<vmem>>, vector<8x32xf32>
    tpu.vector_store %arg24[%c16_111, %c0_112], %380 {strides = array<i32>} : memref<64x32xf32, #tpu.memory_space<vmem>>, vector<8x32xf32>,
    %cst_113 = arith.constant dense<0.000000e+00> : vector<8x96xf32>
    %383 = tpu.matmul %351, %2, %cst_113 {dimension_numbers = #tpu.dot_dimension_numbers<[1], [0], [0], [1], [0, 0, 1, 1], [], []>} : vector<8x32xf32>, vector<32x96xf32>, vector<8x96xf32> -> vector<8x96xf32>
    %384 = arith.addf %383, %18 : vector<8x96xf32>
    %c48_114 = arith.constant 48 : index
    %c0_115 = arith.constant 0 : index
    %385 = vector.load %arg21[%c48_114, %c0_115] : memref<64x96xf32, #tpu.memory_space<vmem>>, vector<8x96xf32>
    %386 = vector.extract_strided_slice %385 {offsets = [0, 0], sizes = [8, 32], strides = [1, 1]} : vector<8x96xf32> to vector<8x32xf32>
    %387 = vector.extract_strided_slice %384 {offsets = [0, 0], sizes = [8, 32], strides = [1, 1]} : vector<8x96xf32> to vector<8x32xf32>
    %388 = arith.addf %386, %387 : vector<8x32xf32>
    %389 = arith.negf %388 : vector<8x32xf32>
    %390 = math.exp %389 : vector<8x32xf32>
    %cst_116 = arith.constant 1.000000e+00 : f32
    %391 = vector.broadcast %cst_116 : f32 to vector<8x32xf32>
    %392 = arith.addf %391, %390 : vector<8x32xf32>
    %393 = arith.divf %391, %392 : vector<8x32xf32>
    %394 = vector.extract_strided_slice %385 {offsets = [0, 32], sizes = [8, 32], strides = [1, 1]} : vector<8x96xf32> to vector<8x32xf32>
    %395 = vector.extract_strided_slice %384 {offsets = [0, 32], sizes = [8, 32], strides = [1, 1]} : vector<8x96xf32> to vector<8x32xf32>
    %396 = arith.addf %394, %395 : vector<8x32xf32>
    %397 = arith.negf %396 : vector<8x32xf32>
    %398 = math.exp %397 : vector<8x32xf32>
    %cst_117 = arith.constant 1.000000e+00 : f32
    %399 = vector.broadcast %cst_117 : f32 to vector<8x32xf32>
    %400 = arith.addf %399, %398 : vector<8x32xf32>
    %401 = arith.divf %399, %400 : vector<8x32xf32>
    %402 = vector.extract_strided_slice %385 {offsets = [0, 64], sizes = [8, 32], strides = [1, 1]} : vector<8x96xf32> to vector<8x32xf32>
    %403 = vector.extract_strided_slice %384 {offsets = [0, 64], sizes = [8, 32], strides = [1, 1]} : vector<8x96xf32> to vector<8x32xf32>
    %404 = arith.mulf %393, %403 : vector<8x32xf32>
    %405 = arith.addf %402, %404 : vector<8x32xf32>
    %406 = math.tanh %405 : vector<8x32xf32>
    %cst_118 = arith.constant 1.000000e+00 : f32
    %407 = vector.broadcast %cst_118 : f32 to vector<8x32xf32>
    %408 = arith.subf %407, %401 : vector<8x32xf32>
    %409 = arith.mulf %408, %406 : vector<8x32xf32>
    %410 = arith.mulf %401, %351 : vector<8x32xf32>
    %411 = arith.addf %409, %410 : vector<8x32xf32>
    %cst_119 = arith.constant dense<0.000000e+00> : vector<8x96xf32>
    %412 = tpu.matmul %380, %6, %cst_119 {dimension_numbers = #tpu.dot_dimension_numbers<[1], [0], [0], [1], [0, 0, 1, 1], [], []>} : vector<8x32xf32>, vector<32x96xf32>, vector<8x96xf32> -> vector<8x96xf32>
    %413 = arith.addf %412, %20 : vector<8x96xf32>
    %c8_120 = arith.constant 8 : index
    %c0_121 = arith.constant 0 : index
    %414 = vector.load %arg22[%c8_120, %c0_121] : memref<64x96xf32, #tpu.memory_space<vmem>>, vector<8x96xf32>
    %415 = vector.extract_strided_slice %414 {offsets = [0, 0], sizes = [8, 32], strides = [1, 1]} : vector<8x96xf32> to vector<8x32xf32>
    %416 = vector.extract_strided_slice %413 {offsets = [0, 0], sizes = [8, 32], strides = [1, 1]} : vector<8x96xf32> to vector<8x32xf32>
    %417 = arith.addf %415, %416 : vector<8x32xf32>
    %418 = arith.negf %417 : vector<8x32xf32>
    %419 = math.exp %418 : vector<8x32xf32>
    %cst_122 = arith.constant 1.000000e+00 : f32
    %420 = vector.broadcast %cst_122 : f32 to vector<8x32xf32>
    %421 = arith.addf %420, %419 : vector<8x32xf32>
    %422 = arith.divf %420, %421 : vector<8x32xf32>
    %423 = vector.extract_strided_slice %414 {offsets = [0, 32], sizes = [8, 32], strides = [1, 1]} : vector<8x96xf32> to vector<8x32xf32>
    %424 = vector.extract_strided_slice %413 {offsets = [0, 32], sizes = [8, 32], strides = [1, 1]} : vector<8x96xf32> to vector<8x32xf32>
    %425 = arith.addf %423, %424 : vector<8x32xf32>
    %426 = arith.negf %425 : vector<8x32xf32>
    %427 = math.exp %426 : vector<8x32xf32>
    %cst_123 = arith.constant 1.000000e+00 : f32
    %428 = vector.broadcast %cst_123 : f32 to vector<8x32xf32>
    %429 = arith.addf %428, %427 : vector<8x32xf32>
    %430 = arith.divf %428, %429 : vector<8x32xf32>
    %431 = vector.extract_strided_slice %414 {offsets = [0, 64], sizes = [8, 32], strides = [1, 1]} : vector<8x96xf32> to vector<8x32xf32>
    %432 = vector.extract_strided_slice %413 {offsets = [0, 64], sizes = [8, 32], strides = [1, 1]} : vector<8x96xf32> to vector<8x32xf32>
    %433 = arith.mulf %422, %432 : vector<8x32xf32>
    %434 = arith.addf %431, %433 : vector<8x32xf32>
    %435 = math.tanh %434 : vector<8x32xf32>
    %cst_124 = arith.constant 1.000000e+00 : f32
    %436 = vector.broadcast %cst_124 : f32 to vector<8x32xf32>
    %437 = arith.subf %436, %430 : vector<8x32xf32>
    %438 = arith.mulf %437, %435 : vector<8x32xf32>
    %439 = arith.mulf %430, %380 : vector<8x32xf32>
    %440 = arith.addf %438, %439 : vector<8x32xf32>
    %c48_125 = arith.constant 48 : index
    %c0_126 = arith.constant 0 : index
    %441 = vector.load %arg23[%c48_125, %c0_126] : memref<64x32xf32, #tpu.memory_space<vmem>>, vector<8x32xf32>
    tpu.vector_store %arg23[%c48_125, %c0_126], %411 {strides = array<i32>} : memref<64x32xf32, #tpu.memory_space<vmem>>, vector<8x32xf32>,
    %c8_127 = arith.constant 8 : index
    %c0_128 = arith.constant 0 : index
    %442 = vector.load %arg24[%c8_127, %c0_128] : memref<64x32xf32, #tpu.memory_space<vmem>>, vector<8x32xf32>
    tpu.vector_store %arg24[%c8_127, %c0_128], %440 {strides = array<i32>} : memref<64x32xf32, #tpu.memory_space<vmem>>, vector<8x32xf32>,
    %cst_129 = arith.constant dense<0.000000e+00> : vector<8x96xf32>
    %443 = tpu.matmul %411, %2, %cst_129 {dimension_numbers = #tpu.dot_dimension_numbers<[1], [0], [0], [1], [0, 0, 1, 1], [], []>} : vector<8x32xf32>, vector<32x96xf32>, vector<8x96xf32> -> vector<8x96xf32>
    %444 = arith.addf %443, %18 : vector<8x96xf32>
    %c56_130 = arith.constant 56 : index
    %c0_131 = arith.constant 0 : index
    %445 = vector.load %arg21[%c56_130, %c0_131] : memref<64x96xf32, #tpu.memory_space<vmem>>, vector<8x96xf32>
    %446 = vector.extract_strided_slice %445 {offsets = [0, 0], sizes = [8, 32], strides = [1, 1]} : vector<8x96xf32> to vector<8x32xf32>
    %447 = vector.extract_strided_slice %444 {offsets = [0, 0], sizes = [8, 32], strides = [1, 1]} : vector<8x96xf32> to vector<8x32xf32>
    %448 = arith.addf %446, %447 : vector<8x32xf32>
    %449 = arith.negf %448 : vector<8x32xf32>
    %450 = math.exp %449 : vector<8x32xf32>
    %cst_132 = arith.constant 1.000000e+00 : f32
    %451 = vector.broadcast %cst_132 : f32 to vector<8x32xf32>
    %452 = arith.addf %451, %450 : vector<8x32xf32>
    %453 = arith.divf %451, %452 : vector<8x32xf32>
    %454 = vector.extract_strided_slice %445 {offsets = [0, 32], sizes = [8, 32], strides = [1, 1]} : vector<8x96xf32> to vector<8x32xf32>
    %455 = vector.extract_strided_slice %444 {offsets = [0, 32], sizes = [8, 32], strides = [1, 1]} : vector<8x96xf32> to vector<8x32xf32>
    %456 = arith.addf %454, %455 : vector<8x32xf32>
    %457 = arith.negf %456 : vector<8x32xf32>
    %458 = math.exp %457 : vector<8x32xf32>
    %cst_133 = arith.constant 1.000000e+00 : f32
    %459 = vector.broadcast %cst_133 : f32 to vector<8x32xf32>
    %460 = arith.addf %459, %458 : vector<8x32xf32>
    %461 = arith.divf %459, %460 : vector<8x32xf32>
    %462 = vector.extract_strided_slice %445 {offsets = [0, 64], sizes = [8, 32], strides = [1, 1]} : vector<8x96xf32> to vector<8x32xf32>
    %463 = vector.extract_strided_slice %444 {offsets = [0, 64], sizes = [8, 32], strides = [1, 1]} : vector<8x96xf32> to vector<8x32xf32>
    %464 = arith.mulf %453, %463 : vector<8x32xf32>
    %465 = arith.addf %462, %464 : vector<8x32xf32>
    %466 = math.tanh %465 : vector<8x32xf32>
    %cst_134 = arith.constant 1.000000e+00 : f32
    %467 = vector.broadcast %cst_134 : f32 to vector<8x32xf32>
    %468 = arith.subf %467, %461 : vector<8x32xf32>
    %469 = arith.mulf %468, %466 : vector<8x32xf32>
    %470 = arith.mulf %461, %411 : vector<8x32xf32>
    %471 = arith.addf %469, %470 : vector<8x32xf32>
    %cst_135 = arith.constant dense<0.000000e+00> : vector<8x96xf32>
    %472 = tpu.matmul %440, %6, %cst_135 {dimension_numbers = #tpu.dot_dimension_numbers<[1], [0], [0], [1], [0, 0, 1, 1], [], []>} : vector<8x32xf32>, vector<32x96xf32>, vector<8x96xf32> -> vector<8x96xf32>
    %473 = arith.addf %472, %20 : vector<8x96xf32>
    %c0_136 = arith.constant 0 : index
    %c0_137 = arith.constant 0 : index
    %474 = vector.load %arg22[%c0_136, %c0_137] : memref<64x96xf32, #tpu.memory_space<vmem>>, vector<8x96xf32>
    %475 = vector.extract_strided_slice %474 {offsets = [0, 0], sizes = [8, 32], strides = [1, 1]} : vector<8x96xf32> to vector<8x32xf32>
    %476 = vector.extract_strided_slice %473 {offsets = [0, 0], sizes = [8, 32], strides = [1, 1]} : vector<8x96xf32> to vector<8x32xf32>
    %477 = arith.addf %475, %476 : vector<8x32xf32>
    %478 = arith.negf %477 : vector<8x32xf32>
    %479 = math.exp %478 : vector<8x32xf32>
    %cst_138 = arith.constant 1.000000e+00 : f32
    %480 = vector.broadcast %cst_138 : f32 to vector<8x32xf32>
    %481 = arith.addf %480, %479 : vector<8x32xf32>
    %482 = arith.divf %480, %481 : vector<8x32xf32>
    %483 = vector.extract_strided_slice %474 {offsets = [0, 32], sizes = [8, 32], strides = [1, 1]} : vector<8x96xf32> to vector<8x32xf32>
    %484 = vector.extract_strided_slice %473 {offsets = [0, 32], sizes = [8, 32], strides = [1, 1]} : vector<8x96xf32> to vector<8x32xf32>
    %485 = arith.addf %483, %484 : vector<8x32xf32>
    %486 = arith.negf %485 : vector<8x32xf32>
    %487 = math.exp %486 : vector<8x32xf32>
    %cst_139 = arith.constant 1.000000e+00 : f32
    %488 = vector.broadcast %cst_139 : f32 to vector<8x32xf32>
    %489 = arith.addf %488, %487 : vector<8x32xf32>
    %490 = arith.divf %488, %489 : vector<8x32xf32>
    %491 = vector.extract_strided_slice %474 {offsets = [0, 64], sizes = [8, 32], strides = [1, 1]} : vector<8x96xf32> to vector<8x32xf32>
    %492 = vector.extract_strided_slice %473 {offsets = [0, 64], sizes = [8, 32], strides = [1, 1]} : vector<8x96xf32> to vector<8x32xf32>
    %493 = arith.mulf %482, %492 : vector<8x32xf32>
    %494 = arith.addf %491, %493 : vector<8x32xf32>
    %495 = math.tanh %494 : vector<8x32xf32>
    %cst_140 = arith.constant 1.000000e+00 : f32
    %496 = vector.broadcast %cst_140 : f32 to vector<8x32xf32>
    %497 = arith.subf %496, %490 : vector<8x32xf32>
    %498 = arith.mulf %497, %495 : vector<8x32xf32>
    %499 = arith.mulf %490, %440 : vector<8x32xf32>
    %500 = arith.addf %498, %499 : vector<8x32xf32>
    %c56_141 = arith.constant 56 : index
    %c0_142 = arith.constant 0 : index
    %501 = vector.load %arg23[%c56_141, %c0_142] : memref<64x32xf32, #tpu.memory_space<vmem>>, vector<8x32xf32>
    tpu.vector_store %arg23[%c56_141, %c0_142], %471 {strides = array<i32>} : memref<64x32xf32, #tpu.memory_space<vmem>>, vector<8x32xf32>,
    %c0_143 = arith.constant 0 : index
    %c0_144 = arith.constant 0 : index
    %502 = vector.load %arg24[%c0_143, %c0_144] : memref<64x32xf32, #tpu.memory_space<vmem>>, vector<8x32xf32>
    tpu.vector_store %arg24[%c0_143, %c0_144], %500 {strides = array<i32>} : memref<64x32xf32, #tpu.memory_space<vmem>>, vector<8x32xf32>,
    %c0_145 = arith.constant 0 : index
    %c0_146 = arith.constant 0 : index
    %503 = vector.load %arg23[%c0_145, %c0_146] : memref<64x32xf32, #tpu.memory_space<vmem>>, vector<64x32xf32>
    %c0_147 = arith.constant 0 : index
    %c0_148 = arith.constant 0 : index
    %504 = vector.load %arg24[%c0_147, %c0_148] : memref<64x32xf32, #tpu.memory_space<vmem>>, vector<64x32xf32>
    %505 = tpu.concatenate %503, %504 in 1 : vector<64x32xf32>, vector<64x32xf32> -> vector<64x64xf32>
    %c0_149 = arith.constant 0 : index
    %c0_150 = arith.constant 0 : index
    %506 = vector.load %arg10[%c0_149, %c0_150] : memref<64x96xf32, #tpu.memory_space<vmem>>, vector<64x96xf32>
    %c0_151 = arith.constant 0 : index
    %c0_152 = arith.constant 0 : index
    %507 = vector.load %arg11[%c0_151, %c0_152] : memref<32x96xf32, #tpu.memory_space<vmem>>, vector<32x96xf32>
    %c0_153 = arith.constant 0 : index
    %c0_154 = arith.constant 0 : index
    %508 = vector.load %arg12[%c0_153, %c0_154] : memref<1x96xf32, #tpu.memory_space<vmem>>, vector<1x96xf32>
    %c0_155 = arith.constant 0 : index
    %c0_156 = arith.constant 0 : index
    %509 = vector.load %arg13[%c0_155, %c0_156] : memref<1x96xf32, #tpu.memory_space<vmem>>, vector<1x96xf32>
    %c0_157 = arith.constant 0 : index
    %c0_158 = arith.constant 0 : index
    %510 = vector.load %arg14[%c0_157, %c0_158] : memref<64x96xf32, #tpu.memory_space<vmem>>, vector<64x96xf32>
    %c0_159 = arith.constant 0 : index
    %c0_160 = arith.constant 0 : index
    %511 = vector.load %arg15[%c0_159, %c0_160] : memref<32x96xf32, #tpu.memory_space<vmem>>, vector<32x96xf32>
    %c0_161 = arith.constant 0 : index
    %c0_162 = arith.constant 0 : index
    %512 = vector.load %arg16[%c0_161, %c0_162] : memref<1x96xf32, #tpu.memory_space<vmem>>, vector<1x96xf32>
    %c0_163 = arith.constant 0 : index
    %c0_164 = arith.constant 0 : index
    %513 = vector.load %arg17[%c0_163, %c0_164] : memref<1x96xf32, #tpu.memory_space<vmem>>, vector<1x96xf32>
    %cst_165 = arith.constant dense<0.000000e+00> : vector<64x96xf32>
    %514 = tpu.matmul %505, %506, %cst_165 {dimension_numbers = #tpu.dot_dimension_numbers<[1], [0], [0], [1], [0, 0, 1, 1], [], []>} : vector<64x64xf32>, vector<64x96xf32>, vector<64x96xf32> -> vector<64x96xf32>
    %515 = vector.broadcast %508 : vector<1x96xf32> to vector<64x96xf32>
    %516 = arith.addf %514, %515 : vector<64x96xf32>
    %c0_166 = arith.constant 0 : index
    %c0_167 = arith.constant 0 : index
    %517 = vector.load %arg21[%c0_166, %c0_167] : memref<64x96xf32, #tpu.memory_space<vmem>>, vector<64x96xf32>
    tpu.vector_store %arg21[%c0_166, %c0_167], %516 {strides = array<i32>} : memref<64x96xf32, #tpu.memory_space<vmem>>, vector<64x96xf32>,
    %cst_168 = arith.constant dense<0.000000e+00> : vector<64x96xf32>
    %518 = tpu.matmul %505, %510, %cst_168 {dimension_numbers = #tpu.dot_dimension_numbers<[1], [0], [0], [1], [0, 0, 1, 1], [], []>} : vector<64x64xf32>, vector<64x96xf32>, vector<64x96xf32> -> vector<64x96xf32>
    %519 = vector.broadcast %512 : vector<1x96xf32> to vector<64x96xf32>
    %520 = arith.addf %518, %519 : vector<64x96xf32>
    %c0_169 = arith.constant 0 : index
    %c0_170 = arith.constant 0 : index
    %521 = vector.load %arg22[%c0_169, %c0_170] : memref<64x96xf32, #tpu.memory_space<vmem>>, vector<64x96xf32>
    tpu.vector_store %arg22[%c0_169, %c0_170], %520 {strides = array<i32>} : memref<64x96xf32, #tpu.memory_space<vmem>>, vector<64x96xf32>,
    %522 = vector.shape_cast %509 : vector<1x96xf32> to vector<1x96xf32>
    %523 = vector.broadcast %522 : vector<1x96xf32> to vector<8x96xf32>
    %524 = vector.shape_cast %513 : vector<1x96xf32> to vector<1x96xf32>
    %525 = vector.broadcast %524 : vector<1x96xf32> to vector<8x96xf32>
    %cst_171 = arith.constant 0.000000e+00 : f32
    %526 = vector.broadcast %cst_171 : f32 to vector<8x32xf32>
    %cst_172 = arith.constant 0.000000e+00 : f32
    %527 = vector.broadcast %cst_172 : f32 to vector<8x32xf32>
    %cst_173 = arith.constant dense<0.000000e+00> : vector<8x96xf32>
    %528 = tpu.matmul %526, %507, %cst_173 {dimension_numbers = #tpu.dot_dimension_numbers<[1], [0], [0], [1], [0, 0, 1, 1], [], []>} : vector<8x32xf32>, vector<32x96xf32>, vector<8x96xf32> -> vector<8x96xf32>
    %529 = arith.addf %528, %523 : vector<8x96xf32>
    %c0_174 = arith.constant 0 : index
    %c0_175 = arith.constant 0 : index
    %530 = vector.load %arg21[%c0_174, %c0_175] : memref<64x96xf32, #tpu.memory_space<vmem>>, vector<8x96xf32>
    %531 = vector.extract_strided_slice %530 {offsets = [0, 0], sizes = [8, 32], strides = [1, 1]} : vector<8x96xf32> to vector<8x32xf32>
    %532 = vector.extract_strided_slice %529 {offsets = [0, 0], sizes = [8, 32], strides = [1, 1]} : vector<8x96xf32> to vector<8x32xf32>
    %533 = arith.addf %531, %532 : vector<8x32xf32>
    %534 = arith.negf %533 : vector<8x32xf32>
    %535 = math.exp %534 : vector<8x32xf32>
    %cst_176 = arith.constant 1.000000e+00 : f32
    %536 = vector.broadcast %cst_176 : f32 to vector<8x32xf32>
    %537 = arith.addf %536, %535 : vector<8x32xf32>
    %538 = arith.divf %536, %537 : vector<8x32xf32>
    %539 = vector.extract_strided_slice %530 {offsets = [0, 32], sizes = [8, 32], strides = [1, 1]} : vector<8x96xf32> to vector<8x32xf32>
    %540 = vector.extract_strided_slice %529 {offsets = [0, 32], sizes = [8, 32], strides = [1, 1]} : vector<8x96xf32> to vector<8x32xf32>
    %541 = arith.addf %539, %540 : vector<8x32xf32>
    %542 = arith.negf %541 : vector<8x32xf32>
    %543 = math.exp %542 : vector<8x32xf32>
    %cst_177 = arith.constant 1.000000e+00 : f32
    %544 = vector.broadcast %cst_177 : f32 to vector<8x32xf32>
    %545 = arith.addf %544, %543 : vector<8x32xf32>
    %546 = arith.divf %544, %545 : vector<8x32xf32>
    %547 = vector.extract_strided_slice %530 {offsets = [0, 64], sizes = [8, 32], strides = [1, 1]} : vector<8x96xf32> to vector<8x32xf32>
    %548 = vector.extract_strided_slice %529 {offsets = [0, 64], sizes = [8, 32], strides = [1, 1]} : vector<8x96xf32> to vector<8x32xf32>
    %549 = arith.mulf %538, %548 : vector<8x32xf32>
    %550 = arith.addf %547, %549 : vector<8x32xf32>
    %551 = math.tanh %550 : vector<8x32xf32>
    %cst_178 = arith.constant 1.000000e+00 : f32
    %552 = vector.broadcast %cst_178 : f32 to vector<8x32xf32>
    %553 = arith.subf %552, %546 : vector<8x32xf32>
    %554 = arith.mulf %553, %551 : vector<8x32xf32>
    %555 = arith.mulf %546, %526 : vector<8x32xf32>
    %556 = arith.addf %554, %555 : vector<8x32xf32>
    %cst_179 = arith.constant dense<0.000000e+00> : vector<8x96xf32>
    %557 = tpu.matmul %527, %511, %cst_179 {dimension_numbers = #tpu.dot_dimension_numbers<[1], [0], [0], [1], [0, 0, 1, 1], [], []>} : vector<8x32xf32>, vector<32x96xf32>, vector<8x96xf32> -> vector<8x96xf32>
    %558 = arith.addf %557, %525 : vector<8x96xf32>
    %c56_180 = arith.constant 56 : index
    %c0_181 = arith.constant 0 : index
    %559 = vector.load %arg22[%c56_180, %c0_181] : memref<64x96xf32, #tpu.memory_space<vmem>>, vector<8x96xf32>
    %560 = vector.extract_strided_slice %559 {offsets = [0, 0], sizes = [8, 32], strides = [1, 1]} : vector<8x96xf32> to vector<8x32xf32>
    %561 = vector.extract_strided_slice %558 {offsets = [0, 0], sizes = [8, 32], strides = [1, 1]} : vector<8x96xf32> to vector<8x32xf32>
    %562 = arith.addf %560, %561 : vector<8x32xf32>
    %563 = arith.negf %562 : vector<8x32xf32>
    %564 = math.exp %563 : vector<8x32xf32>
    %cst_182 = arith.constant 1.000000e+00 : f32
    %565 = vector.broadcast %cst_182 : f32 to vector<8x32xf32>
    %566 = arith.addf %565, %564 : vector<8x32xf32>
    %567 = arith.divf %565, %566 : vector<8x32xf32>
    %568 = vector.extract_strided_slice %559 {offsets = [0, 32], sizes = [8, 32], strides = [1, 1]} : vector<8x96xf32> to vector<8x32xf32>
    %569 = vector.extract_strided_slice %558 {offsets = [0, 32], sizes = [8, 32], strides = [1, 1]} : vector<8x96xf32> to vector<8x32xf32>
    %570 = arith.addf %568, %569 : vector<8x32xf32>
    %571 = arith.negf %570 : vector<8x32xf32>
    %572 = math.exp %571 : vector<8x32xf32>
    %cst_183 = arith.constant 1.000000e+00 : f32
    %573 = vector.broadcast %cst_183 : f32 to vector<8x32xf32>
    %574 = arith.addf %573, %572 : vector<8x32xf32>
    %575 = arith.divf %573, %574 : vector<8x32xf32>
    %576 = vector.extract_strided_slice %559 {offsets = [0, 64], sizes = [8, 32], strides = [1, 1]} : vector<8x96xf32> to vector<8x32xf32>
    %577 = vector.extract_strided_slice %558 {offsets = [0, 64], sizes = [8, 32], strides = [1, 1]} : vector<8x96xf32> to vector<8x32xf32>
    %578 = arith.mulf %567, %577 : vector<8x32xf32>
    %579 = arith.addf %576, %578 : vector<8x32xf32>
    %580 = math.tanh %579 : vector<8x32xf32>
    %cst_184 = arith.constant 1.000000e+00 : f32
    %581 = vector.broadcast %cst_184 : f32 to vector<8x32xf32>
    %582 = arith.subf %581, %575 : vector<8x32xf32>
    %583 = arith.mulf %582, %580 : vector<8x32xf32>
    %584 = arith.mulf %575, %527 : vector<8x32xf32>
    %585 = arith.addf %583, %584 : vector<8x32xf32>
    %cst_185 = arith.constant dense<0.000000e+00> : vector<8x96xf32>
    %586 = tpu.matmul %556, %507, %cst_185 {dimension_numbers = #tpu.dot_dimension_numbers<[1], [0], [0], [1], [0, 0, 1, 1], [], []>} : vector<8x32xf32>, vector<32x96xf32>, vector<8x96xf32> -> vector<8x96xf32>
    %587 = arith.addf %586, %523 : vector<8x96xf32>
    %c8_186 = arith.constant 8 : index
    %c0_187 = arith.constant 0 : index
    %588 = vector.load %arg21[%c8_186, %c0_187] : memref<64x96xf32, #tpu.memory_space<vmem>>, vector<8x96xf32>
    %589 = vector.extract_strided_slice %588 {offsets = [0, 0], sizes = [8, 32], strides = [1, 1]} : vector<8x96xf32> to vector<8x32xf32>
    %590 = vector.extract_strided_slice %587 {offsets = [0, 0], sizes = [8, 32], strides = [1, 1]} : vector<8x96xf32> to vector<8x32xf32>
    %591 = arith.addf %589, %590 : vector<8x32xf32>
    %592 = arith.negf %591 : vector<8x32xf32>
    %593 = math.exp %592 : vector<8x32xf32>
    %cst_188 = arith.constant 1.000000e+00 : f32
    %594 = vector.broadcast %cst_188 : f32 to vector<8x32xf32>
    %595 = arith.addf %594, %593 : vector<8x32xf32>
    %596 = arith.divf %594, %595 : vector<8x32xf32>
    %597 = vector.extract_strided_slice %588 {offsets = [0, 32], sizes = [8, 32], strides = [1, 1]} : vector<8x96xf32> to vector<8x32xf32>
    %598 = vector.extract_strided_slice %587 {offsets = [0, 32], sizes = [8, 32], strides = [1, 1]} : vector<8x96xf32> to vector<8x32xf32>
    %599 = arith.addf %597, %598 : vector<8x32xf32>
    %600 = arith.negf %599 : vector<8x32xf32>
    %601 = math.exp %600 : vector<8x32xf32>
    %cst_189 = arith.constant 1.000000e+00 : f32
    %602 = vector.broadcast %cst_189 : f32 to vector<8x32xf32>
    %603 = arith.addf %602, %601 : vector<8x32xf32>
    %604 = arith.divf %602, %603 : vector<8x32xf32>
    %605 = vector.extract_strided_slice %588 {offsets = [0, 64], sizes = [8, 32], strides = [1, 1]} : vector<8x96xf32> to vector<8x32xf32>
    %606 = vector.extract_strided_slice %587 {offsets = [0, 64], sizes = [8, 32], strides = [1, 1]} : vector<8x96xf32> to vector<8x32xf32>
    %607 = arith.mulf %596, %606 : vector<8x32xf32>
    %608 = arith.addf %605, %607 : vector<8x32xf32>
    %609 = math.tanh %608 : vector<8x32xf32>
    %cst_190 = arith.constant 1.000000e+00 : f32
    %610 = vector.broadcast %cst_190 : f32 to vector<8x32xf32>
    %611 = arith.subf %610, %604 : vector<8x32xf32>
    %612 = arith.mulf %611, %609 : vector<8x32xf32>
    %613 = arith.mulf %604, %556 : vector<8x32xf32>
    %614 = arith.addf %612, %613 : vector<8x32xf32>
    %cst_191 = arith.constant dense<0.000000e+00> : vector<8x96xf32>
    %615 = tpu.matmul %585, %511, %cst_191 {dimension_numbers = #tpu.dot_dimension_numbers<[1], [0], [0], [1], [0, 0, 1, 1], [], []>} : vector<8x32xf32>, vector<32x96xf32>, vector<8x96xf32> -> vector<8x96xf32>
    %616 = arith.addf %615, %525 : vector<8x96xf32>
    %c48_192 = arith.constant 48 : index
    %c0_193 = arith.constant 0 : index
    %617 = vector.load %arg22[%c48_192, %c0_193] : memref<64x96xf32, #tpu.memory_space<vmem>>, vector<8x96xf32>
    %618 = vector.extract_strided_slice %617 {offsets = [0, 0], sizes = [8, 32], strides = [1, 1]} : vector<8x96xf32> to vector<8x32xf32>
    %619 = vector.extract_strided_slice %616 {offsets = [0, 0], sizes = [8, 32], strides = [1, 1]} : vector<8x96xf32> to vector<8x32xf32>
    %620 = arith.addf %618, %619 : vector<8x32xf32>
    %621 = arith.negf %620 : vector<8x32xf32>
    %622 = math.exp %621 : vector<8x32xf32>
    %cst_194 = arith.constant 1.000000e+00 : f32
    %623 = vector.broadcast %cst_194 : f32 to vector<8x32xf32>
    %624 = arith.addf %623, %622 : vector<8x32xf32>
    %625 = arith.divf %623, %624 : vector<8x32xf32>
    %626 = vector.extract_strided_slice %617 {offsets = [0, 32], sizes = [8, 32], strides = [1, 1]} : vector<8x96xf32> to vector<8x32xf32>
    %627 = vector.extract_strided_slice %616 {offsets = [0, 32], sizes = [8, 32], strides = [1, 1]} : vector<8x96xf32> to vector<8x32xf32>
    %628 = arith.addf %626, %627 : vector<8x32xf32>
    %629 = arith.negf %628 : vector<8x32xf32>
    %630 = math.exp %629 : vector<8x32xf32>
    %cst_195 = arith.constant 1.000000e+00 : f32
    %631 = vector.broadcast %cst_195 : f32 to vector<8x32xf32>
    %632 = arith.addf %631, %630 : vector<8x32xf32>
    %633 = arith.divf %631, %632 : vector<8x32xf32>
    %634 = vector.extract_strided_slice %617 {offsets = [0, 64], sizes = [8, 32], strides = [1, 1]} : vector<8x96xf32> to vector<8x32xf32>
    %635 = vector.extract_strided_slice %616 {offsets = [0, 64], sizes = [8, 32], strides = [1, 1]} : vector<8x96xf32> to vector<8x32xf32>
    %636 = arith.mulf %625, %635 : vector<8x32xf32>
    %637 = arith.addf %634, %636 : vector<8x32xf32>
    %638 = math.tanh %637 : vector<8x32xf32>
    %cst_196 = arith.constant 1.000000e+00 : f32
    %639 = vector.broadcast %cst_196 : f32 to vector<8x32xf32>
    %640 = arith.subf %639, %633 : vector<8x32xf32>
    %641 = arith.mulf %640, %638 : vector<8x32xf32>
    %642 = arith.mulf %633, %585 : vector<8x32xf32>
    %643 = arith.addf %641, %642 : vector<8x32xf32>
    %cst_197 = arith.constant dense<0.000000e+00> : vector<8x96xf32>
    %644 = tpu.matmul %614, %507, %cst_197 {dimension_numbers = #tpu.dot_dimension_numbers<[1], [0], [0], [1], [0, 0, 1, 1], [], []>} : vector<8x32xf32>, vector<32x96xf32>, vector<8x96xf32> -> vector<8x96xf32>
    %645 = arith.addf %644, %523 : vector<8x96xf32>
    %c16_198 = arith.constant 16 : index
    %c0_199 = arith.constant 0 : index
    %646 = vector.load %arg21[%c16_198, %c0_199] : memref<64x96xf32, #tpu.memory_space<vmem>>, vector<8x96xf32>
    %647 = vector.extract_strided_slice %646 {offsets = [0, 0], sizes = [8, 32], strides = [1, 1]} : vector<8x96xf32> to vector<8x32xf32>
    %648 = vector.extract_strided_slice %645 {offsets = [0, 0], sizes = [8, 32], strides = [1, 1]} : vector<8x96xf32> to vector<8x32xf32>
    %649 = arith.addf %647, %648 : vector<8x32xf32>
    %650 = arith.negf %649 : vector<8x32xf32>
    %651 = math.exp %650 : vector<8x32xf32>
    %cst_200 = arith.constant 1.000000e+00 : f32
    %652 = vector.broadcast %cst_200 : f32 to vector<8x32xf32>
    %653 = arith.addf %652, %651 : vector<8x32xf32>
    %654 = arith.divf %652, %653 : vector<8x32xf32>
    %655 = vector.extract_strided_slice %646 {offsets = [0, 32], sizes = [8, 32], strides = [1, 1]} : vector<8x96xf32> to vector<8x32xf32>
    %656 = vector.extract_strided_slice %645 {offsets = [0, 32], sizes = [8, 32], strides = [1, 1]} : vector<8x96xf32> to vector<8x32xf32>
    %657 = arith.addf %655, %656 : vector<8x32xf32>
    %658 = arith.negf %657 : vector<8x32xf32>
    %659 = math.exp %658 : vector<8x32xf32>
    %cst_201 = arith.constant 1.000000e+00 : f32
    %660 = vector.broadcast %cst_201 : f32 to vector<8x32xf32>
    %661 = arith.addf %660, %659 : vector<8x32xf32>
    %662 = arith.divf %660, %661 : vector<8x32xf32>
    %663 = vector.extract_strided_slice %646 {offsets = [0, 64], sizes = [8, 32], strides = [1, 1]} : vector<8x96xf32> to vector<8x32xf32>
    %664 = vector.extract_strided_slice %645 {offsets = [0, 64], sizes = [8, 32], strides = [1, 1]} : vector<8x96xf32> to vector<8x32xf32>
    %665 = arith.mulf %654, %664 : vector<8x32xf32>
    %666 = arith.addf %663, %665 : vector<8x32xf32>
    %667 = math.tanh %666 : vector<8x32xf32>
    %cst_202 = arith.constant 1.000000e+00 : f32
    %668 = vector.broadcast %cst_202 : f32 to vector<8x32xf32>
    %669 = arith.subf %668, %662 : vector<8x32xf32>
    %670 = arith.mulf %669, %667 : vector<8x32xf32>
    %671 = arith.mulf %662, %614 : vector<8x32xf32>
    %672 = arith.addf %670, %671 : vector<8x32xf32>
    %cst_203 = arith.constant dense<0.000000e+00> : vector<8x96xf32>
    %673 = tpu.matmul %643, %511, %cst_203 {dimension_numbers = #tpu.dot_dimension_numbers<[1], [0], [0], [1], [0, 0, 1, 1], [], []>} : vector<8x32xf32>, vector<32x96xf32>, vector<8x96xf32> -> vector<8x96xf32>
    %674 = arith.addf %673, %525 : vector<8x96xf32>
    %c40_204 = arith.constant 40 : index
    %c0_205 = arith.constant 0 : index
    %675 = vector.load %arg22[%c40_204, %c0_205] : memref<64x96xf32, #tpu.memory_space<vmem>>, vector<8x96xf32>
    %676 = vector.extract_strided_slice %675 {offsets = [0, 0], sizes = [8, 32], strides = [1, 1]} : vector<8x96xf32> to vector<8x32xf32>
    %677 = vector.extract_strided_slice %674 {offsets = [0, 0], sizes = [8, 32], strides = [1, 1]} : vector<8x96xf32> to vector<8x32xf32>
    %678 = arith.addf %676, %677 : vector<8x32xf32>
    %679 = arith.negf %678 : vector<8x32xf32>
    %680 = math.exp %679 : vector<8x32xf32>
    %cst_206 = arith.constant 1.000000e+00 : f32
    %681 = vector.broadcast %cst_206 : f32 to vector<8x32xf32>
    %682 = arith.addf %681, %680 : vector<8x32xf32>
    %683 = arith.divf %681, %682 : vector<8x32xf32>
    %684 = vector.extract_strided_slice %675 {offsets = [0, 32], sizes = [8, 32], strides = [1, 1]} : vector<8x96xf32> to vector<8x32xf32>
    %685 = vector.extract_strided_slice %674 {offsets = [0, 32], sizes = [8, 32], strides = [1, 1]} : vector<8x96xf32> to vector<8x32xf32>
    %686 = arith.addf %684, %685 : vector<8x32xf32>
    %687 = arith.negf %686 : vector<8x32xf32>
    %688 = math.exp %687 : vector<8x32xf32>
    %cst_207 = arith.constant 1.000000e+00 : f32
    %689 = vector.broadcast %cst_207 : f32 to vector<8x32xf32>
    %690 = arith.addf %689, %688 : vector<8x32xf32>
    %691 = arith.divf %689, %690 : vector<8x32xf32>
    %692 = vector.extract_strided_slice %675 {offsets = [0, 64], sizes = [8, 32], strides = [1, 1]} : vector<8x96xf32> to vector<8x32xf32>
    %693 = vector.extract_strided_slice %674 {offsets = [0, 64], sizes = [8, 32], strides = [1, 1]} : vector<8x96xf32> to vector<8x32xf32>
    %694 = arith.mulf %683, %693 : vector<8x32xf32>
    %695 = arith.addf %692, %694 : vector<8x32xf32>
    %696 = math.tanh %695 : vector<8x32xf32>
    %cst_208 = arith.constant 1.000000e+00 : f32
    %697 = vector.broadcast %cst_208 : f32 to vector<8x32xf32>
    %698 = arith.subf %697, %691 : vector<8x32xf32>
    %699 = arith.mulf %698, %696 : vector<8x32xf32>
    %700 = arith.mulf %691, %643 : vector<8x32xf32>
    %701 = arith.addf %699, %700 : vector<8x32xf32>
    %cst_209 = arith.constant dense<0.000000e+00> : vector<8x96xf32>
    %702 = tpu.matmul %672, %507, %cst_209 {dimension_numbers = #tpu.dot_dimension_numbers<[1], [0], [0], [1], [0, 0, 1, 1], [], []>} : vector<8x32xf32>, vector<32x96xf32>, vector<8x96xf32> -> vector<8x96xf32>
    %703 = arith.addf %702, %523 : vector<8x96xf32>
    %c24_210 = arith.constant 24 : index
    %c0_211 = arith.constant 0 : index
    %704 = vector.load %arg21[%c24_210, %c0_211] : memref<64x96xf32, #tpu.memory_space<vmem>>, vector<8x96xf32>
    %705 = vector.extract_strided_slice %704 {offsets = [0, 0], sizes = [8, 32], strides = [1, 1]} : vector<8x96xf32> to vector<8x32xf32>
    %706 = vector.extract_strided_slice %703 {offsets = [0, 0], sizes = [8, 32], strides = [1, 1]} : vector<8x96xf32> to vector<8x32xf32>
    %707 = arith.addf %705, %706 : vector<8x32xf32>
    %708 = arith.negf %707 : vector<8x32xf32>
    %709 = math.exp %708 : vector<8x32xf32>
    %cst_212 = arith.constant 1.000000e+00 : f32
    %710 = vector.broadcast %cst_212 : f32 to vector<8x32xf32>
    %711 = arith.addf %710, %709 : vector<8x32xf32>
    %712 = arith.divf %710, %711 : vector<8x32xf32>
    %713 = vector.extract_strided_slice %704 {offsets = [0, 32], sizes = [8, 32], strides = [1, 1]} : vector<8x96xf32> to vector<8x32xf32>
    %714 = vector.extract_strided_slice %703 {offsets = [0, 32], sizes = [8, 32], strides = [1, 1]} : vector<8x96xf32> to vector<8x32xf32>
    %715 = arith.addf %713, %714 : vector<8x32xf32>
    %716 = arith.negf %715 : vector<8x32xf32>
    %717 = math.exp %716 : vector<8x32xf32>
    %cst_213 = arith.constant 1.000000e+00 : f32
    %718 = vector.broadcast %cst_213 : f32 to vector<8x32xf32>
    %719 = arith.addf %718, %717 : vector<8x32xf32>
    %720 = arith.divf %718, %719 : vector<8x32xf32>
    %721 = vector.extract_strided_slice %704 {offsets = [0, 64], sizes = [8, 32], strides = [1, 1]} : vector<8x96xf32> to vector<8x32xf32>
    %722 = vector.extract_strided_slice %703 {offsets = [0, 64], sizes = [8, 32], strides = [1, 1]} : vector<8x96xf32> to vector<8x32xf32>
    %723 = arith.mulf %712, %722 : vector<8x32xf32>
    %724 = arith.addf %721, %723 : vector<8x32xf32>
    %725 = math.tanh %724 : vector<8x32xf32>
    %cst_214 = arith.constant 1.000000e+00 : f32
    %726 = vector.broadcast %cst_214 : f32 to vector<8x32xf32>
    %727 = arith.subf %726, %720 : vector<8x32xf32>
    %728 = arith.mulf %727, %725 : vector<8x32xf32>
    %729 = arith.mulf %720, %672 : vector<8x32xf32>
    %730 = arith.addf %728, %729 : vector<8x32xf32>
    %cst_215 = arith.constant dense<0.000000e+00> : vector<8x96xf32>
    %731 = tpu.matmul %701, %511, %cst_215 {dimension_numbers = #tpu.dot_dimension_numbers<[1], [0], [0], [1], [0, 0, 1, 1], [], []>} : vector<8x32xf32>, vector<32x96xf32>, vector<8x96xf32> -> vector<8x96xf32>
    %732 = arith.addf %731, %525 : vector<8x96xf32>
    %c32_216 = arith.constant 32 : index
    %c0_217 = arith.constant 0 : index
    %733 = vector.load %arg22[%c32_216, %c0_217] : memref<64x96xf32, #tpu.memory_space<vmem>>, vector<8x96xf32>
    %734 = vector.extract_strided_slice %733 {offsets = [0, 0], sizes = [8, 32], strides = [1, 1]} : vector<8x96xf32> to vector<8x32xf32>
    %735 = vector.extract_strided_slice %732 {offsets = [0, 0], sizes = [8, 32], strides = [1, 1]} : vector<8x96xf32> to vector<8x32xf32>
    %736 = arith.addf %734, %735 : vector<8x32xf32>
    %737 = arith.negf %736 : vector<8x32xf32>
    %738 = math.exp %737 : vector<8x32xf32>
    %cst_218 = arith.constant 1.000000e+00 : f32
    %739 = vector.broadcast %cst_218 : f32 to vector<8x32xf32>
    %740 = arith.addf %739, %738 : vector<8x32xf32>
    %741 = arith.divf %739, %740 : vector<8x32xf32>
    %742 = vector.extract_strided_slice %733 {offsets = [0, 32], sizes = [8, 32], strides = [1, 1]} : vector<8x96xf32> to vector<8x32xf32>
    %743 = vector.extract_strided_slice %732 {offsets = [0, 32], sizes = [8, 32], strides = [1, 1]} : vector<8x96xf32> to vector<8x32xf32>
    %744 = arith.addf %742, %743 : vector<8x32xf32>
    %745 = arith.negf %744 : vector<8x32xf32>
    %746 = math.exp %745 : vector<8x32xf32>
    %cst_219 = arith.constant 1.000000e+00 : f32
    %747 = vector.broadcast %cst_219 : f32 to vector<8x32xf32>
    %748 = arith.addf %747, %746 : vector<8x32xf32>
    %749 = arith.divf %747, %748 : vector<8x32xf32>
    %750 = vector.extract_strided_slice %733 {offsets = [0, 64], sizes = [8, 32], strides = [1, 1]} : vector<8x96xf32> to vector<8x32xf32>
    %751 = vector.extract_strided_slice %732 {offsets = [0, 64], sizes = [8, 32], strides = [1, 1]} : vector<8x96xf32> to vector<8x32xf32>
    %752 = arith.mulf %741, %751 : vector<8x32xf32>
    %753 = arith.addf %750, %752 : vector<8x32xf32>
    %754 = math.tanh %753 : vector<8x32xf32>
    %cst_220 = arith.constant 1.000000e+00 : f32
    %755 = vector.broadcast %cst_220 : f32 to vector<8x32xf32>
    %756 = arith.subf %755, %749 : vector<8x32xf32>
    %757 = arith.mulf %756, %754 : vector<8x32xf32>
    %758 = arith.mulf %749, %701 : vector<8x32xf32>
    %759 = arith.addf %757, %758 : vector<8x32xf32>
    %cst_221 = arith.constant dense<0.000000e+00> : vector<8x96xf32>
    %760 = tpu.matmul %730, %507, %cst_221 {dimension_numbers = #tpu.dot_dimension_numbers<[1], [0], [0], [1], [0, 0, 1, 1], [], []>} : vector<8x32xf32>, vector<32x96xf32>, vector<8x96xf32> -> vector<8x96xf32>
    %761 = arith.addf %760, %523 : vector<8x96xf32>
    %c32_222 = arith.constant 32 : index
    %c0_223 = arith.constant 0 : index
    %762 = vector.load %arg21[%c32_222, %c0_223] : memref<64x96xf32, #tpu.memory_space<vmem>>, vector<8x96xf32>
    %763 = vector.extract_strided_slice %762 {offsets = [0, 0], sizes = [8, 32], strides = [1, 1]} : vector<8x96xf32> to vector<8x32xf32>
    %764 = vector.extract_strided_slice %761 {offsets = [0, 0], sizes = [8, 32], strides = [1, 1]} : vector<8x96xf32> to vector<8x32xf32>
    %765 = arith.addf %763, %764 : vector<8x32xf32>
    %766 = arith.negf %765 : vector<8x32xf32>
    %767 = math.exp %766 : vector<8x32xf32>
    %cst_224 = arith.constant 1.000000e+00 : f32
    %768 = vector.broadcast %cst_224 : f32 to vector<8x32xf32>
    %769 = arith.addf %768, %767 : vector<8x32xf32>
    %770 = arith.divf %768, %769 : vector<8x32xf32>
    %771 = vector.extract_strided_slice %762 {offsets = [0, 32], sizes = [8, 32], strides = [1, 1]} : vector<8x96xf32> to vector<8x32xf32>
    %772 = vector.extract_strided_slice %761 {offsets = [0, 32], sizes = [8, 32], strides = [1, 1]} : vector<8x96xf32> to vector<8x32xf32>
    %773 = arith.addf %771, %772 : vector<8x32xf32>
    %774 = arith.negf %773 : vector<8x32xf32>
    %775 = math.exp %774 : vector<8x32xf32>
    %cst_225 = arith.constant 1.000000e+00 : f32
    %776 = vector.broadcast %cst_225 : f32 to vector<8x32xf32>
    %777 = arith.addf %776, %775 : vector<8x32xf32>
    %778 = arith.divf %776, %777 : vector<8x32xf32>
    %779 = vector.extract_strided_slice %762 {offsets = [0, 64], sizes = [8, 32], strides = [1, 1]} : vector<8x96xf32> to vector<8x32xf32>
    %780 = vector.extract_strided_slice %761 {offsets = [0, 64], sizes = [8, 32], strides = [1, 1]} : vector<8x96xf32> to vector<8x32xf32>
    %781 = arith.mulf %770, %780 : vector<8x32xf32>
    %782 = arith.addf %779, %781 : vector<8x32xf32>
    %783 = math.tanh %782 : vector<8x32xf32>
    %cst_226 = arith.constant 1.000000e+00 : f32
    %784 = vector.broadcast %cst_226 : f32 to vector<8x32xf32>
    %785 = arith.subf %784, %778 : vector<8x32xf32>
    %786 = arith.mulf %785, %783 : vector<8x32xf32>
    %787 = arith.mulf %778, %730 : vector<8x32xf32>
    %788 = arith.addf %786, %787 : vector<8x32xf32>
    %cst_227 = arith.constant dense<0.000000e+00> : vector<8x96xf32>
    %789 = tpu.matmul %759, %511, %cst_227 {dimension_numbers = #tpu.dot_dimension_numbers<[1], [0], [0], [1], [0, 0, 1, 1], [], []>} : vector<8x32xf32>, vector<32x96xf32>, vector<8x96xf32> -> vector<8x96xf32>
    %790 = arith.addf %789, %525 : vector<8x96xf32>
    %c24_228 = arith.constant 24 : index
    %c0_229 = arith.constant 0 : index
    %791 = vector.load %arg22[%c24_228, %c0_229] : memref<64x96xf32, #tpu.memory_space<vmem>>, vector<8x96xf32>
    %792 = vector.extract_strided_slice %791 {offsets = [0, 0], sizes = [8, 32], strides = [1, 1]} : vector<8x96xf32> to vector<8x32xf32>
    %793 = vector.extract_strided_slice %790 {offsets = [0, 0], sizes = [8, 32], strides = [1, 1]} : vector<8x96xf32> to vector<8x32xf32>
    %794 = arith.addf %792, %793 : vector<8x32xf32>
    %795 = arith.negf %794 : vector<8x32xf32>
    %796 = math.exp %795 : vector<8x32xf32>
    %cst_230 = arith.constant 1.000000e+00 : f32
    %797 = vector.broadcast %cst_230 : f32 to vector<8x32xf32>
    %798 = arith.addf %797, %796 : vector<8x32xf32>
    %799 = arith.divf %797, %798 : vector<8x32xf32>
    %800 = vector.extract_strided_slice %791 {offsets = [0, 32], sizes = [8, 32], strides = [1, 1]} : vector<8x96xf32> to vector<8x32xf32>
    %801 = vector.extract_strided_slice %790 {offsets = [0, 32], sizes = [8, 32], strides = [1, 1]} : vector<8x96xf32> to vector<8x32xf32>
    %802 = arith.addf %800, %801 : vector<8x32xf32>
    %803 = arith.negf %802 : vector<8x32xf32>
    %804 = math.exp %803 : vector<8x32xf32>
    %cst_231 = arith.constant 1.000000e+00 : f32
    %805 = vector.broadcast %cst_231 : f32 to vector<8x32xf32>
    %806 = arith.addf %805, %804 : vector<8x32xf32>
    %807 = arith.divf %805, %806 : vector<8x32xf32>
    %808 = vector.extract_strided_slice %791 {offsets = [0, 64], sizes = [8, 32], strides = [1, 1]} : vector<8x96xf32> to vector<8x32xf32>
    %809 = vector.extract_strided_slice %790 {offsets = [0, 64], sizes = [8, 32], strides = [1, 1]} : vector<8x96xf32> to vector<8x32xf32>
    %810 = arith.mulf %799, %809 : vector<8x32xf32>
    %811 = arith.addf %808, %810 : vector<8x32xf32>
    %812 = math.tanh %811 : vector<8x32xf32>
    %cst_232 = arith.constant 1.000000e+00 : f32
    %813 = vector.broadcast %cst_232 : f32 to vector<8x32xf32>
    %814 = arith.subf %813, %807 : vector<8x32xf32>
    %815 = arith.mulf %814, %812 : vector<8x32xf32>
    %816 = arith.mulf %807, %759 : vector<8x32xf32>
    %817 = arith.addf %815, %816 : vector<8x32xf32>
    %cst_233 = arith.constant dense<0.000000e+00> : vector<8x96xf32>
    %818 = tpu.matmul %788, %507, %cst_233 {dimension_numbers = #tpu.dot_dimension_numbers<[1], [0], [0], [1], [0, 0, 1, 1], [], []>} : vector<8x32xf32>, vector<32x96xf32>, vector<8x96xf32> -> vector<8x96xf32>
    %819 = arith.addf %818, %523 : vector<8x96xf32>
    %c40_234 = arith.constant 40 : index
    %c0_235 = arith.constant 0 : index
    %820 = vector.load %arg21[%c40_234, %c0_235] : memref<64x96xf32, #tpu.memory_space<vmem>>, vector<8x96xf32>
    %821 = vector.extract_strided_slice %820 {offsets = [0, 0], sizes = [8, 32], strides = [1, 1]} : vector<8x96xf32> to vector<8x32xf32>
    %822 = vector.extract_strided_slice %819 {offsets = [0, 0], sizes = [8, 32], strides = [1, 1]} : vector<8x96xf32> to vector<8x32xf32>
    %823 = arith.addf %821, %822 : vector<8x32xf32>
    %824 = arith.negf %823 : vector<8x32xf32>
    %825 = math.exp %824 : vector<8x32xf32>
    %cst_236 = arith.constant 1.000000e+00 : f32
    %826 = vector.broadcast %cst_236 : f32 to vector<8x32xf32>
    %827 = arith.addf %826, %825 : vector<8x32xf32>
    %828 = arith.divf %826, %827 : vector<8x32xf32>
    %829 = vector.extract_strided_slice %820 {offsets = [0, 32], sizes = [8, 32], strides = [1, 1]} : vector<8x96xf32> to vector<8x32xf32>
    %830 = vector.extract_strided_slice %819 {offsets = [0, 32], sizes = [8, 32], strides = [1, 1]} : vector<8x96xf32> to vector<8x32xf32>
    %831 = arith.addf %829, %830 : vector<8x32xf32>
    %832 = arith.negf %831 : vector<8x32xf32>
    %833 = math.exp %832 : vector<8x32xf32>
    %cst_237 = arith.constant 1.000000e+00 : f32
    %834 = vector.broadcast %cst_237 : f32 to vector<8x32xf32>
    %835 = arith.addf %834, %833 : vector<8x32xf32>
    %836 = arith.divf %834, %835 : vector<8x32xf32>
    %837 = vector.extract_strided_slice %820 {offsets = [0, 64], sizes = [8, 32], strides = [1, 1]} : vector<8x96xf32> to vector<8x32xf32>
    %838 = vector.extract_strided_slice %819 {offsets = [0, 64], sizes = [8, 32], strides = [1, 1]} : vector<8x96xf32> to vector<8x32xf32>
    %839 = arith.mulf %828, %838 : vector<8x32xf32>
    %840 = arith.addf %837, %839 : vector<8x32xf32>
    %841 = math.tanh %840 : vector<8x32xf32>
    %cst_238 = arith.constant 1.000000e+00 : f32
    %842 = vector.broadcast %cst_238 : f32 to vector<8x32xf32>
    %843 = arith.subf %842, %836 : vector<8x32xf32>
    %844 = arith.mulf %843, %841 : vector<8x32xf32>
    %845 = arith.mulf %836, %788 : vector<8x32xf32>
    %846 = arith.addf %844, %845 : vector<8x32xf32>
    %cst_239 = arith.constant dense<0.000000e+00> : vector<8x96xf32>
    %847 = tpu.matmul %817, %511, %cst_239 {dimension_numbers = #tpu.dot_dimension_numbers<[1], [0], [0], [1], [0, 0, 1, 1], [], []>} : vector<8x32xf32>, vector<32x96xf32>, vector<8x96xf32> -> vector<8x96xf32>
    %848 = arith.addf %847, %525 : vector<8x96xf32>
    %c16_240 = arith.constant 16 : index
    %c0_241 = arith.constant 0 : index
    %849 = vector.load %arg22[%c16_240, %c0_241] : memref<64x96xf32, #tpu.memory_space<vmem>>, vector<8x96xf32>
    %850 = vector.extract_strided_slice %849 {offsets = [0, 0], sizes = [8, 32], strides = [1, 1]} : vector<8x96xf32> to vector<8x32xf32>
    %851 = vector.extract_strided_slice %848 {offsets = [0, 0], sizes = [8, 32], strides = [1, 1]} : vector<8x96xf32> to vector<8x32xf32>
    %852 = arith.addf %850, %851 : vector<8x32xf32>
    %853 = arith.negf %852 : vector<8x32xf32>
    %854 = math.exp %853 : vector<8x32xf32>
    %cst_242 = arith.constant 1.000000e+00 : f32
    %855 = vector.broadcast %cst_242 : f32 to vector<8x32xf32>
    %856 = arith.addf %855, %854 : vector<8x32xf32>
    %857 = arith.divf %855, %856 : vector<8x32xf32>
    %858 = vector.extract_strided_slice %849 {offsets = [0, 32], sizes = [8, 32], strides = [1, 1]} : vector<8x96xf32> to vector<8x32xf32>
    %859 = vector.extract_strided_slice %848 {offsets = [0, 32], sizes = [8, 32], strides = [1, 1]} : vector<8x96xf32> to vector<8x32xf32>
    %860 = arith.addf %858, %859 : vector<8x32xf32>
    %861 = arith.negf %860 : vector<8x32xf32>
    %862 = math.exp %861 : vector<8x32xf32>
    %cst_243 = arith.constant 1.000000e+00 : f32
    %863 = vector.broadcast %cst_243 : f32 to vector<8x32xf32>
    %864 = arith.addf %863, %862 : vector<8x32xf32>
    %865 = arith.divf %863, %864 : vector<8x32xf32>
    %866 = vector.extract_strided_slice %849 {offsets = [0, 64], sizes = [8, 32], strides = [1, 1]} : vector<8x96xf32> to vector<8x32xf32>
    %867 = vector.extract_strided_slice %848 {offsets = [0, 64], sizes = [8, 32], strides = [1, 1]} : vector<8x96xf32> to vector<8x32xf32>
    %868 = arith.mulf %857, %867 : vector<8x32xf32>
    %869 = arith.addf %866, %868 : vector<8x32xf32>
    %870 = math.tanh %869 : vector<8x32xf32>
    %cst_244 = arith.constant 1.000000e+00 : f32
    %871 = vector.broadcast %cst_244 : f32 to vector<8x32xf32>
    %872 = arith.subf %871, %865 : vector<8x32xf32>
    %873 = arith.mulf %872, %870 : vector<8x32xf32>
    %874 = arith.mulf %865, %817 : vector<8x32xf32>
    %875 = arith.addf %873, %874 : vector<8x32xf32>
    %cst_245 = arith.constant dense<0.000000e+00> : vector<8x96xf32>
    %876 = tpu.matmul %846, %507, %cst_245 {dimension_numbers = #tpu.dot_dimension_numbers<[1], [0], [0], [1], [0, 0, 1, 1], [], []>} : vector<8x32xf32>, vector<32x96xf32>, vector<8x96xf32> -> vector<8x96xf32>
    %877 = arith.addf %876, %523 : vector<8x96xf32>
    %c48_246 = arith.constant 48 : index
    %c0_247 = arith.constant 0 : index
    %878 = vector.load %arg21[%c48_246, %c0_247] : memref<64x96xf32, #tpu.memory_space<vmem>>, vector<8x96xf32>
    %879 = vector.extract_strided_slice %878 {offsets = [0, 0], sizes = [8, 32], strides = [1, 1]} : vector<8x96xf32> to vector<8x32xf32>
    %880 = vector.extract_strided_slice %877 {offsets = [0, 0], sizes = [8, 32], strides = [1, 1]} : vector<8x96xf32> to vector<8x32xf32>
    %881 = arith.addf %879, %880 : vector<8x32xf32>
    %882 = arith.negf %881 : vector<8x32xf32>
    %883 = math.exp %882 : vector<8x32xf32>
    %cst_248 = arith.constant 1.000000e+00 : f32
    %884 = vector.broadcast %cst_248 : f32 to vector<8x32xf32>
    %885 = arith.addf %884, %883 : vector<8x32xf32>
    %886 = arith.divf %884, %885 : vector<8x32xf32>
    %887 = vector.extract_strided_slice %878 {offsets = [0, 32], sizes = [8, 32], strides = [1, 1]} : vector<8x96xf32> to vector<8x32xf32>
    %888 = vector.extract_strided_slice %877 {offsets = [0, 32], sizes = [8, 32], strides = [1, 1]} : vector<8x96xf32> to vector<8x32xf32>
    %889 = arith.addf %887, %888 : vector<8x32xf32>
    %890 = arith.negf %889 : vector<8x32xf32>
    %891 = math.exp %890 : vector<8x32xf32>
    %cst_249 = arith.constant 1.000000e+00 : f32
    %892 = vector.broadcast %cst_249 : f32 to vector<8x32xf32>
    %893 = arith.addf %892, %891 : vector<8x32xf32>
    %894 = arith.divf %892, %893 : vector<8x32xf32>
    %895 = vector.extract_strided_slice %878 {offsets = [0, 64], sizes = [8, 32], strides = [1, 1]} : vector<8x96xf32> to vector<8x32xf32>
    %896 = vector.extract_strided_slice %877 {offsets = [0, 64], sizes = [8, 32], strides = [1, 1]} : vector<8x96xf32> to vector<8x32xf32>
    %897 = arith.mulf %886, %896 : vector<8x32xf32>
    %898 = arith.addf %895, %897 : vector<8x32xf32>
    %899 = math.tanh %898 : vector<8x32xf32>
    %cst_250 = arith.constant 1.000000e+00 : f32
    %900 = vector.broadcast %cst_250 : f32 to vector<8x32xf32>
    %901 = arith.subf %900, %894 : vector<8x32xf32>
    %902 = arith.mulf %901, %899 : vector<8x32xf32>
    %903 = arith.mulf %894, %846 : vector<8x32xf32>
    %904 = arith.addf %902, %903 : vector<8x32xf32>
    %cst_251 = arith.constant dense<0.000000e+00> : vector<8x96xf32>
    %905 = tpu.matmul %875, %511, %cst_251 {dimension_numbers = #tpu.dot_dimension_numbers<[1], [0], [0], [1], [0, 0, 1, 1], [], []>} : vector<8x32xf32>, vector<32x96xf32>, vector<8x96xf32> -> vector<8x96xf32>
    %906 = arith.addf %905, %525 : vector<8x96xf32>
    %c8_252 = arith.constant 8 : index
    %c0_253 = arith.constant 0 : index
    %907 = vector.load %arg22[%c8_252, %c0_253] : memref<64x96xf32, #tpu.memory_space<vmem>>, vector<8x96xf32>
    %908 = vector.extract_strided_slice %907 {offsets = [0, 0], sizes = [8, 32], strides = [1, 1]} : vector<8x96xf32> to vector<8x32xf32>
    %909 = vector.extract_strided_slice %906 {offsets = [0, 0], sizes = [8, 32], strides = [1, 1]} : vector<8x96xf32> to vector<8x32xf32>
    %910 = arith.addf %908, %909 : vector<8x32xf32>
    %911 = arith.negf %910 : vector<8x32xf32>
    %912 = math.exp %911 : vector<8x32xf32>
    %cst_254 = arith.constant 1.000000e+00 : f32
    %913 = vector.broadcast %cst_254 : f32 to vector<8x32xf32>
    %914 = arith.addf %913, %912 : vector<8x32xf32>
    %915 = arith.divf %913, %914 : vector<8x32xf32>
    %916 = vector.extract_strided_slice %907 {offsets = [0, 32], sizes = [8, 32], strides = [1, 1]} : vector<8x96xf32> to vector<8x32xf32>
    %917 = vector.extract_strided_slice %906 {offsets = [0, 32], sizes = [8, 32], strides = [1, 1]} : vector<8x96xf32> to vector<8x32xf32>
    %918 = arith.addf %916, %917 : vector<8x32xf32>
    %919 = arith.negf %918 : vector<8x32xf32>
    %920 = math.exp %919 : vector<8x32xf32>
    %cst_255 = arith.constant 1.000000e+00 : f32
    %921 = vector.broadcast %cst_255 : f32 to vector<8x32xf32>
    %922 = arith.addf %921, %920 : vector<8x32xf32>
    %923 = arith.divf %921, %922 : vector<8x32xf32>
    %924 = vector.extract_strided_slice %907 {offsets = [0, 64], sizes = [8, 32], strides = [1, 1]} : vector<8x96xf32> to vector<8x32xf32>
    %925 = vector.extract_strided_slice %906 {offsets = [0, 64], sizes = [8, 32], strides = [1, 1]} : vector<8x96xf32> to vector<8x32xf32>
    %926 = arith.mulf %915, %925 : vector<8x32xf32>
    %927 = arith.addf %924, %926 : vector<8x32xf32>
    %928 = math.tanh %927 : vector<8x32xf32>
    %cst_256 = arith.constant 1.000000e+00 : f32
    %929 = vector.broadcast %cst_256 : f32 to vector<8x32xf32>
    %930 = arith.subf %929, %923 : vector<8x32xf32>
    %931 = arith.mulf %930, %928 : vector<8x32xf32>
    %932 = arith.mulf %923, %875 : vector<8x32xf32>
    %933 = arith.addf %931, %932 : vector<8x32xf32>
    %cst_257 = arith.constant dense<0.000000e+00> : vector<8x96xf32>
    %934 = tpu.matmul %904, %507, %cst_257 {dimension_numbers = #tpu.dot_dimension_numbers<[1], [0], [0], [1], [0, 0, 1, 1], [], []>} : vector<8x32xf32>, vector<32x96xf32>, vector<8x96xf32> -> vector<8x96xf32>
    %935 = arith.addf %934, %523 : vector<8x96xf32>
    %c56_258 = arith.constant 56 : index
    %c0_259 = arith.constant 0 : index
    %936 = vector.load %arg21[%c56_258, %c0_259] : memref<64x96xf32, #tpu.memory_space<vmem>>, vector<8x96xf32>
    %937 = vector.extract_strided_slice %936 {offsets = [0, 0], sizes = [8, 32], strides = [1, 1]} : vector<8x96xf32> to vector<8x32xf32>
    %938 = vector.extract_strided_slice %935 {offsets = [0, 0], sizes = [8, 32], strides = [1, 1]} : vector<8x96xf32> to vector<8x32xf32>
    %939 = arith.addf %937, %938 : vector<8x32xf32>
    %940 = arith.negf %939 : vector<8x32xf32>
    %941 = math.exp %940 : vector<8x32xf32>
    %cst_260 = arith.constant 1.000000e+00 : f32
    %942 = vector.broadcast %cst_260 : f32 to vector<8x32xf32>
    %943 = arith.addf %942, %941 : vector<8x32xf32>
    %944 = arith.divf %942, %943 : vector<8x32xf32>
    %945 = vector.extract_strided_slice %936 {offsets = [0, 32], sizes = [8, 32], strides = [1, 1]} : vector<8x96xf32> to vector<8x32xf32>
    %946 = vector.extract_strided_slice %935 {offsets = [0, 32], sizes = [8, 32], strides = [1, 1]} : vector<8x96xf32> to vector<8x32xf32>
    %947 = arith.addf %945, %946 : vector<8x32xf32>
    %948 = arith.negf %947 : vector<8x32xf32>
    %949 = math.exp %948 : vector<8x32xf32>
    %cst_261 = arith.constant 1.000000e+00 : f32
    %950 = vector.broadcast %cst_261 : f32 to vector<8x32xf32>
    %951 = arith.addf %950, %949 : vector<8x32xf32>
    %952 = arith.divf %950, %951 : vector<8x32xf32>
    %953 = vector.extract_strided_slice %936 {offsets = [0, 64], sizes = [8, 32], strides = [1, 1]} : vector<8x96xf32> to vector<8x32xf32>
    %954 = vector.extract_strided_slice %935 {offsets = [0, 64], sizes = [8, 32], strides = [1, 1]} : vector<8x96xf32> to vector<8x32xf32>
    %955 = arith.mulf %944, %954 : vector<8x32xf32>
    %956 = arith.addf %953, %955 : vector<8x32xf32>
    %957 = math.tanh %956 : vector<8x32xf32>
    %cst_262 = arith.constant 1.000000e+00 : f32
    %958 = vector.broadcast %cst_262 : f32 to vector<8x32xf32>
    %959 = arith.subf %958, %952 : vector<8x32xf32>
    %960 = arith.mulf %959, %957 : vector<8x32xf32>
    %961 = arith.mulf %952, %904 : vector<8x32xf32>
    %962 = arith.addf %960, %961 : vector<8x32xf32>
    %cst_263 = arith.constant dense<0.000000e+00> : vector<8x96xf32>
    %963 = tpu.matmul %933, %511, %cst_263 {dimension_numbers = #tpu.dot_dimension_numbers<[1], [0], [0], [1], [0, 0, 1, 1], [], []>} : vector<8x32xf32>, vector<32x96xf32>, vector<8x96xf32> -> vector<8x96xf32>
    %964 = arith.addf %963, %525 : vector<8x96xf32>
    %c0_264 = arith.constant 0 : index
    %c0_265 = arith.constant 0 : index
    %965 = vector.load %arg22[%c0_264, %c0_265] : memref<64x96xf32, #tpu.memory_space<vmem>>, vector<8x96xf32>
    %966 = vector.extract_strided_slice %965 {offsets = [0, 0], sizes = [8, 32], strides = [1, 1]} : vector<8x96xf32> to vector<8x32xf32>
    %967 = vector.extract_strided_slice %964 {offsets = [0, 0], sizes = [8, 32], strides = [1, 1]} : vector<8x96xf32> to vector<8x32xf32>
    %968 = arith.addf %966, %967 : vector<8x32xf32>
    %969 = arith.negf %968 : vector<8x32xf32>
    %970 = math.exp %969 : vector<8x32xf32>
    %cst_266 = arith.constant 1.000000e+00 : f32
    %971 = vector.broadcast %cst_266 : f32 to vector<8x32xf32>
    %972 = arith.addf %971, %970 : vector<8x32xf32>
    %973 = arith.divf %971, %972 : vector<8x32xf32>
    %974 = vector.extract_strided_slice %965 {offsets = [0, 32], sizes = [8, 32], strides = [1, 1]} : vector<8x96xf32> to vector<8x32xf32>
    %975 = vector.extract_strided_slice %964 {offsets = [0, 32], sizes = [8, 32], strides = [1, 1]} : vector<8x96xf32> to vector<8x32xf32>
    %976 = arith.addf %974, %975 : vector<8x32xf32>
    %977 = arith.negf %976 : vector<8x32xf32>
    %978 = math.exp %977 : vector<8x32xf32>
    %cst_267 = arith.constant 1.000000e+00 : f32
    %979 = vector.broadcast %cst_267 : f32 to vector<8x32xf32>
    %980 = arith.addf %979, %978 : vector<8x32xf32>
    %981 = arith.divf %979, %980 : vector<8x32xf32>
    %982 = vector.extract_strided_slice %965 {offsets = [0, 64], sizes = [8, 32], strides = [1, 1]} : vector<8x96xf32> to vector<8x32xf32>
    %983 = vector.extract_strided_slice %964 {offsets = [0, 64], sizes = [8, 32], strides = [1, 1]} : vector<8x96xf32> to vector<8x32xf32>
    %984 = arith.mulf %973, %983 : vector<8x32xf32>
    %985 = arith.addf %982, %984 : vector<8x32xf32>
    %986 = math.tanh %985 : vector<8x32xf32>
    %cst_268 = arith.constant 1.000000e+00 : f32
    %987 = vector.broadcast %cst_268 : f32 to vector<8x32xf32>
    %988 = arith.subf %987, %981 : vector<8x32xf32>
    %989 = arith.mulf %988, %986 : vector<8x32xf32>
    %990 = arith.mulf %981, %933 : vector<8x32xf32>
    %991 = arith.addf %989, %990 : vector<8x32xf32>
    %992 = tpu.concatenate %962, %991 in 1 : vector<8x32xf32>, vector<8x32xf32> -> vector<8x64xf32>
    %c0_269 = arith.constant 0 : index
    %c0_270 = arith.constant 0 : index
    %993 = vector.load %arg18[%c0_269, %c0_270] : memref<64x4xf32, #tpu.memory_space<vmem>>, vector<64x4xf32>
    %cst_271 = arith.constant dense<0.000000e+00> : vector<8x4xf32>
    %994 = tpu.matmul %992, %993, %cst_271 {dimension_numbers = #tpu.dot_dimension_numbers<[1], [0], [0], [1], [0, 0, 1, 1], [], []>} : vector<8x64xf32>, vector<64x4xf32>, vector<8x4xf32> -> vector<8x4xf32>
    %c0_272 = arith.constant 0 : index
    %c0_273 = arith.constant 0 : index
    %995 = vector.load %arg19[%c0_272, %c0_273] : memref<1x4xf32, #tpu.memory_space<vmem>>, vector<1x4xf32>
    %996 = vector.broadcast %995 : vector<1x4xf32> to vector<8x4xf32>
    %997 = arith.addf %994, %996 : vector<8x4xf32>
    %998 = vector.extract_strided_slice %997 {offsets = [0, 0], sizes = [2, 4], strides = [1, 1]} : vector<8x4xf32> to vector<2x4xf32>
    %c0_274 = arith.constant 0 : index
    %c0_275 = arith.constant 0 : index
    %999 = vector.load %arg20[%c0_274, %c0_275] : memref<2x4xf32, #tpu.memory_space<vmem>>, vector<2x4xf32>
    tpu.vector_store %arg20[%c0_274, %c0_275], %998 {strides = array<i32>} : memref<2x4xf32, #tpu.memory_space<vmem>>, vector<2x4xf32>,
    return
  }
  func.func @transform_0(%arg0: i32) -> (i32, i32) {
    %c0_i32 = arith.constant 0 : i32
    %c0_i32_0 = arith.constant 0 : i32
    %c0_i32_1 = arith.constant 0 : i32
    return %c0_i32, %c0_i32_0 : i32, i32
  }
  func.func @transform_1(%arg0: i32) -> (i32, i32) {
    %c0_i32 = arith.constant 0 : i32
    %c0_i32_0 = arith.constant 0 : i32
    %c0_i32_1 = arith.constant 0 : i32
    return %c0_i32, %c0_i32_0 : i32, i32
  }
  func.func @transform_2(%arg0: i32) -> (i32, i32) {
    %c0_i32 = arith.constant 0 : i32
    %c0_i32_0 = arith.constant 0 : i32
    %c0_i32_1 = arith.constant 0 : i32
    return %c0_i32, %c0_i32_0 : i32, i32
  }
  func.func @transform_3(%arg0: i32) -> (i32, i32) {
    %c0_i32 = arith.constant 0 : i32
    %c0_i32_0 = arith.constant 0 : i32
    %c0_i32_1 = arith.constant 0 : i32
    return %c0_i32, %c0_i32_0 : i32, i32
  }
  func.func @transform_4(%arg0: i32) -> (i32, i32) {
    %c0_i32 = arith.constant 0 : i32
    %c0_i32_0 = arith.constant 0 : i32
    %c0_i32_1 = arith.constant 0 : i32
    return %c0_i32, %c0_i32_0 : i32, i32
  }
  func.func @transform_5(%arg0: i32) -> (i32, i32) {
    %c0_i32 = arith.constant 0 : i32
    %c0_i32_0 = arith.constant 0 : i32
    %c0_i32_1 = arith.constant 0 : i32
    return %c0_i32, %c0_i32_0 : i32, i32
  }
  func.func @transform_6(%arg0: i32) -> (i32, i32) {
    %c0_i32 = arith.constant 0 : i32
    %c0_i32_0 = arith.constant 0 : i32
    %c0_i32_1 = arith.constant 0 : i32
    return %c0_i32, %c0_i32_0 : i32, i32
  }
  func.func @transform_7(%arg0: i32) -> (i32, i32) {
    %c0_i32 = arith.constant 0 : i32
    %c0_i32_0 = arith.constant 0 : i32
    %c0_i32_1 = arith.constant 0 : i32
    return %c0_i32, %c0_i32_0 : i32, i32
  }
  func.func @transform_8(%arg0: i32) -> (i32, i32) {
    %c0_i32 = arith.constant 0 : i32
    %c0_i32_0 = arith.constant 0 : i32
    %c0_i32_1 = arith.constant 0 : i32
    return %c0_i32, %c0_i32_0 : i32, i32
  }
  func.func @transform_9(%arg0: i32) -> (i32, i32) {
    %c0_i32 = arith.constant 0 : i32
    %c0_i32_0 = arith.constant 0 : i32
    %c0_i32_1 = arith.constant 0 : i32
    return %c0_i32, %c0_i32_0 : i32, i32
  }
  func.func @transform_10(%arg0: i32) -> (i32, i32) {
    %c0_i32 = arith.constant 0 : i32
    %c0_i32_0 = arith.constant 0 : i32
    %c0_i32_1 = arith.constant 0 : i32
    return %c0_i32, %c0_i32_0 : i32, i32
  }
  func.func @transform_11(%arg0: i32) -> (i32, i32) {
    %c0_i32 = arith.constant 0 : i32
    %c0_i32_0 = arith.constant 0 : i32
    %c0_i32_1 = arith.constant 0 : i32
    return %c0_i32, %c0_i32_0 : i32, i32
  }
  func.func @transform_12(%arg0: i32) -> (i32, i32) {
    %c0_i32 = arith.constant 0 : i32
    %c0_i32_0 = arith.constant 0 : i32
    %c0_i32_1 = arith.constant 0 : i32
    return %c0_i32, %c0_i32_0 : i32, i32
  }
  func.func @transform_13(%arg0: i32) -> (i32, i32) {
    %c0_i32 = arith.constant 0 : i32
    %c0_i32_0 = arith.constant 0 : i32
    %c0_i32_1 = arith.constant 0 : i32
    return %c0_i32, %c0_i32_0 : i32, i32
  }
  func.func @transform_14(%arg0: i32) -> (i32, i32) {
    %c0_i32 = arith.constant 0 : i32
    %c0_i32_0 = arith.constant 0 : i32
    %c0_i32_1 = arith.constant 0 : i32
    return %c0_i32, %c0_i32_0 : i32, i32
  }
  func.func @transform_15(%arg0: i32) -> (i32, i32) {
    %c0_i32 = arith.constant 0 : i32
    %c0_i32_0 = arith.constant 0 : i32
    %c0_i32_1 = arith.constant 0 : i32
    return %c0_i32, %c0_i32_0 : i32, i32
  }
  func.func @transform_16(%arg0: i32) -> (i32, i32) {
    %c0_i32 = arith.constant 0 : i32
    %c0_i32_0 = arith.constant 0 : i32
    %c0_i32_1 = arith.constant 0 : i32
    return %c0_i32, %c0_i32_0 : i32, i32
  }
  func.func @transform_17(%arg0: i32) -> (i32, i32) {
    %c0_i32 = arith.constant 0 : i32
    %c0_i32_0 = arith.constant 0 : i32
    %c0_i32_1 = arith.constant 0 : i32
    return %c0_i32, %c0_i32_0 : i32, i32
  }
  func.func @transform_18(%arg0: i32) -> (i32, i32) {
    %c0_i32 = arith.constant 0 : i32
    %c0_i32_0 = arith.constant 0 : i32
    %c0_i32_1 = arith.constant 0 : i32
    return %c0_i32, %c0_i32_0 : i32, i32
  }
  func.func @transform_19(%arg0: i32) -> (i32, i32) {
    %c0_i32 = arith.constant 0 : i32
    %c0_i32_0 = arith.constant 0 : i32
    %c0_i32_1 = arith.constant 0 : i32
    return %c0_i32, %c0_i32_0 : i32, i32
  }
}

</mosaic_0001>

<bundles_post_ra>
// kernel: tpu_custom_call.1
= control target key start
LH: loop header
LB: loop body
LE: loop exit
PB: predicated region body
PF: predicated region fallthrough
CT: control target
= control target key end

     0   :  { %s6566_s0 = inlined_call_operand.vmem [shape: f32[64,3], index: 0, kind: input, shape index: {}]   ;;  %s6567_s1 = inlined_call_operand.hbm [shape: f32[3,96], index: 1, kind: input, shape index: {}]   ;;  %s6568_s2 = inlined_call_operand.hbm [shape: f32[32,96], index: 2, kind: input, shape index: {}]   ;;  %s6569_s3 = inlined_call_operand.vmem [shape: f32[1,96], index: 3, kind: input, shape index: {}]   ;;  %s6570_s4 = inlined_call_operand.vmem [shape: f32[1,96], index: 4, kind: input, shape index: {}]   ;;  %s6571_s5 = inlined_call_operand.hbm [shape: f32[3,96], index: 5, kind: input, shape index: {}]   ;;  %s6572_s6 = inlined_call_operand.hbm [shape: f32[32,96], index: 6, kind: input, shape index: {}]   ;;  %s6573_s7 = inlined_call_operand.hbm [shape: f32[1,96], index: 7, kind: input, shape index: {}]   ;;  %s6574_s8 = inlined_call_operand.hbm [shape: f32[1,96], index: 8, kind: input, shape index: {}]   ;;  %s6575_s9 = inlined_call_operand.vmem [shape: f32[64,96], index: 9, kind: input, shape index: {}]   ;;  %s6576_s10 = inlined_call_operand.vmem [shape: f32[32,96], index: 10, kind: input, shape index: {}]   ;;  %s6577_s11 = inlined_call_operand.vmem [shape: f32[1,96], index: 11, kind: input, shape index: {}]   ;;  %s6578_s12 = inlined_call_operand.vmem [shape: f32[1,96], index: 12, kind: input, shape index: {}]   ;;  %s6579_s13 = inlined_call_operand.vmem [shape: f32[64,96], index: 13, kind: input, shape index: {}]   ;;  %s6580_s14 = inlined_call_operand.hbm [shape: f32[32,96], index: 14, kind: input, shape index: {}]   ;;  %s6581_s15 = inlined_call_operand.vmem [shape: f32[1,96], index: 15, kind: input, shape index: {}]   ;;  %s6582_s16 = inlined_call_operand.vmem [shape: f32[1,96], index: 16, kind: input, shape index: {}]   ;;  %s6583_s17 = inlined_call_operand.vmem [shape: f32[64,4], index: 17, kind: input, shape index: {}]   ;;  %s6584_s18 = inlined_call_operand.vmem [shape: f32[1,4], index: 18, kind: input, shape index: {}]   ;;  %s6585_s19 = inlined_call_operand.hbm [shape: f32[2,4], index: 19, kind: output, shape index: {}]  }
   0x1   :  { %6590 = sst [smem:[#allocation24_spill]] %s6566_s0 }
   0x2   :  { %6591 = sst [smem:[#allocation25_spill]] %s6567_s1 }
   0x3   :  { %6592 = sst [smem:[#allocation26_spill]] %s6568_s2 }
   0x4   :  { %6593 = sst [smem:[#allocation27_spill]] %s6569_s3 }
   0x5   :  { %6594 = sst [smem:[#allocation28_spill]] %s6584_s18 }
   0x6   :  { %6595 = sst [smem:[#allocation29_spill]] %s6585_s19 }
   0x7   :  { %24 = vsyncpa [#allocation7], 0 }
   0x8   :  { %25 = vsyncpa [#allocation10], 0 }
   0x9   :  { %26 = vsyncpa [#allocation13], 0 }
   0xa   :  { %27 = vsyncpa [#allocation16], 0 }
   0xb   :  { %28 = vsyncpa [#allocation8], 0  ;;  %s5623_s0 = smov [#allocation9]   ;;  %s6596_s1 = sld [smem:[#allocation26_spill]] }
   0xc   :  { %s46_s30 = sshll.u32 %s5623_s0, 4  ;;  %s47_s30 = int_to_ptr.vmem [resolvable:$true] %s46_s30 }
  0x11   :  { %s5437_s22 = scalar_lea.hbm %s6596_s1, 512 }
  0x12   :  { %p5438_p0 = scmp.ne.s32.totalorder %s6596_s1, %s5437_s22  ;;  %p5441_p1 = scmp.lt.u32.totalorder %s5437_s22, %s6596_s1 }
  0x14   :  { %p5443_p2 = pnand %p5441_p1, %p5438_p0 }
  0x16   :  { %5446 = shalt.err (!%p5443_p2)
}
  0x17   :  { %s5447_s3 = scalar_lea.vmem %s47_s30, 512  ;;  %p5452_p4 = scmp.lt.s32.totalorder %s47_s30, %s47_s30 }
  0x18   :  { %p5448_p3 = scmp.ne.s32.totalorder %s47_s30, %s5447_s3  ;;  %p5453_p5 = scmp.lt.s32.totalorder %s5447_s3, %s5447_s3 }
  0x1a   :  { %p5454_p6 = por %p5453_p5, %p5452_p4 }
  0x1c   :  { %p5455_p7 = pnand %p5454_p6, %p5448_p3 }
  0x1e   :  { %5458 = shalt.err (!%p5455_p7)
}
  0x1f   :  { %s5624_s26 = smov 128   ;;  %s5625_s27 = smov 8  }
  0x20   :  { %52 = dma.hbm_to_vmem [thread:$0]  %s6596_s1, 512, %s47_s30, [#allocation10], %s5624_s26, %s5624_s26, %s5625_s27  }
  0x21   :  { %s5626_s0 = smov [#allocation12]   ;;  %s5627_s21 = smov [#allocation15]  }
  0x22   :  { %s72_s20 = sshll.u32 %s5626_s0, 4  ;;  %s95_s22 = sshll.u32 %s5627_s21, 4  ;;  %s73_s20 = int_to_ptr.vmem [resolvable:$true] %s72_s20  ;;  %s96_s22 = int_to_ptr.vmem [resolvable:$true] %s95_s22 }
  0x23   :  { %s5459_s24 = scalar_lea.hbm %s6572_s6, 512 }
  0x24   :  { %p5460_p8 = scmp.ne.s32.totalorder %s6572_s6, %s5459_s24  ;;  %p5463_p9 = scmp.lt.u32.totalorder %s5459_s24, %s6572_s6 }
  0x26   :  { %p5465_p10 = pnand %p5463_p9, %p5460_p8 }
  0x28   :  { %5468 = shalt.err (!%p5465_p10)
}
  0x29   :  { %s5469_s30 = scalar_lea.vmem %s73_s20, 512  ;;  %p5474_p12 = scmp.lt.s32.totalorder %s73_s20, %s73_s20 }
  0x2a   :  { %p5470_p11 = scmp.ne.s32.totalorder %s73_s20, %s5469_s30  ;;  %p5475_p13 = scmp.lt.s32.totalorder %s5469_s30, %s5469_s30 }
  0x2c   :  { %p5476_p0 = por %p5475_p13, %p5474_p12 }
  0x2e   :  { %p5477_p1 = pnand %p5476_p0, %p5470_p11 }
  0x30   :  { %5480 = shalt.err (!%p5477_p1)
}
  0x31   :  { %78 = dma.hbm_to_vmem [thread:$0]  %s6572_s6, 512, %s73_s20, [#allocation13], %s5624_s26, %s5624_s26, %s5625_s27  }
  0x32   :  { %s5481_s19 = scalar_lea.hbm %s6574_s8, 16 }
  0x33   :  { %p5482_p2 = scmp.ne.s32.totalorder %s6574_s8, %s5481_s19  ;;  %p5485_p3 = scmp.lt.u32.totalorder %s5481_s19, %s6574_s8 }
  0x35   :  { %p5487_p4 = pnand %p5485_p3, %p5482_p2 }
  0x37   :  { %5490 = shalt.err (!%p5487_p4)
}
  0x38   :  { %s5491_s24 = scalar_lea.vmem %s96_s22, 16  ;;  %s5495_s25 = scalar_lea.vmem %s96_s22, 32 }
  0x39   :  { %p5492_p5 = scmp.ne.s32.totalorder %s96_s22, %s5491_s24  ;;  %p5496_p6 = scmp.lt.s32.totalorder %s96_s22, %s96_s22 }
  0x3a   :  { %p5497_p7 = scmp.lt.s32.totalorder %s5495_s25, %s5491_s24 }
  0x3c   :  { %p5498_p8 = por %p5497_p7, %p5496_p6 }
  0x3e   :  { %p5499_p9 = pnand %p5498_p8, %p5492_p5 }
  0x40   :  { %5502 = shalt.err (!%p5499_p9)
}
  0x41   :  { %98 = dma.hbm_to_vmem [thread:$0]  %s6574_s8, 16, %s96_s22, [#allocation16]  }
  0x42   :  { %s5628_s3 = smov [#allocation6]   ;;  %s5629_s1 = smov [#allocation11]  }
  0x43   :  { %s37_s30 = sshll.u32 %s5628_s3, 4  ;;  %s63_s28 = sshll.u32 %s5629_s1, 4  ;;  %s38_s30 = int_to_ptr.vmem [resolvable:$true] %s37_s30  ;;  %s64_s28 = int_to_ptr.vmem [resolvable:$true] %s63_s28 }
  0x44   :  { %s6597_s19 = sld [smem:[#allocation25_spill]] }
  0x4a   :  { %s5503_s0 = scalar_lea.hbm %s6597_s19, 64 }
  0x4b   :  { %p5504_p10 = scmp.ne.s32.totalorder %s6597_s19, %s5503_s0  ;;  %p5507_p11 = scmp.lt.u32.totalorder %s5503_s0, %s6597_s19 }
  0x4d   :  { %p5509_p12 = pnand %p5507_p11, %p5504_p10 }
  0x4f   :  { %5512 = shalt.err (!%p5509_p12)
}
  0x50   :  { %s5513_s8 = scalar_lea.vmem %s38_s30, 64  ;;  %p5518_p0 = scmp.lt.s32.totalorder %s38_s30, %s38_s30 }
  0x51   :  { %p5514_p13 = scmp.ne.s32.totalorder %s38_s30, %s5513_s8  ;;  %p5519_p1 = scmp.lt.s32.totalorder %s5513_s8, %s5513_s8 }
  0x53   :  { %p5520_p2 = por %p5519_p1, %p5518_p0 }
  0x55   :  { %p5521_p3 = pnand %p5520_p2, %p5514_p13 }
  0x57   :  { %5524 = shalt.err (!%p5521_p3)
}
  0x58   :  { %40 = dma.hbm_to_vmem [thread:$0]  %s6597_s19, 64, %s38_s30, [#allocation7]  }
  0x59   :  { %s5525_s3 = scalar_lea.hbm %s6571_s5, 64 }
  0x5a   :  { %p5526_p4 = scmp.ne.s32.totalorder %s6571_s5, %s5525_s3  ;;  %p5529_p5 = scmp.lt.u32.totalorder %s5525_s3, %s6571_s5 }
  0x5c   :  { %p5531_p6 = pnand %p5529_p5, %p5526_p4 }
  0x5e   :  { %5534 = shalt.err (!%p5531_p6)
}
  0x5f   :  { %s5535_s21 = scalar_lea.vmem %s64_s28, 64  ;;  %p5540_p8 = scmp.lt.s32.totalorder %s64_s28, %s64_s28 }
  0x60   :  { %p5536_p7 = scmp.ne.s32.totalorder %s64_s28, %s5535_s21  ;;  %p5541_p9 = scmp.lt.s32.totalorder %s5535_s21, %s5535_s21 }
  0x62   :  { %p5542_p10 = por %p5541_p9, %p5540_p8 }
  0x64   :  { %p5543_p11 = pnand %p5542_p10, %p5536_p7 }
  0x66   :  { %5546 = shalt.err (!%p5543_p11)
}
  0x67   :  { %66 = dma.hbm_to_vmem [thread:$0]  %s6571_s5, 64, %s64_s28, [#allocation10]  }
  0x68   :  { %s5630_s2 = smov [#allocation14]   ;;  %s5631_s24 = smov [#allocation17]  }
  0x69   :  { %s85_s23 = sshll.u32 %s5630_s2, 4  ;;  %s114_s8 = sshll.u32 %s5631_s24, 4  ;;  %s86_s23 = int_to_ptr.vmem [resolvable:$true] %s85_s23  ;;  %s115_s8 = int_to_ptr.vmem [resolvable:$true] %s114_s8 }
  0x6a   :  { %s5547_s6 = scalar_lea.hbm %s6573_s7, 16 }
  0x6b   :  { %p5548_p12 = scmp.ne.s32.totalorder %s6573_s7, %s5547_s6  ;;  %p5551_p13 = scmp.lt.u32.totalorder %s5547_s6, %s6573_s7 }
  0x6d   :  { %p5553_p0 = pnand %p5551_p13, %p5548_p12 }
  0x6f   :  { %5556 = shalt.err (!%p5553_p0)
}
  0x70   :  { %s5557_s5 = scalar_lea.vmem %s86_s23, 16  ;;  %s5561_s28 = scalar_lea.vmem %s86_s23, 32 }
  0x71   :  { %p5558_p1 = scmp.ne.s32.totalorder %s86_s23, %s5557_s5  ;;  %p5562_p2 = scmp.lt.s32.totalorder %s86_s23, %s86_s23 }
  0x72   :  { %p5563_p3 = scmp.lt.s32.totalorder %s5561_s28, %s5557_s5 }
  0x74   :  { %p5564_p4 = por %p5563_p3, %p5562_p2 }
  0x76   :  { %p5565_p5 = pnand %p5564_p4, %p5558_p1 }
  0x78   :  { %5568 = shalt.err (!%p5565_p5)
}
  0x79   :  { %88 = dma.hbm_to_vmem [thread:$0]  %s6573_s7, 16, %s86_s23, [#allocation13]  }
  0x7a   :  { %s5569_s19 = scalar_lea.hbm %s6580_s14, 512 }
  0x7b   :  { %p5570_p6 = scmp.ne.s32.totalorder %s6580_s14, %s5569_s19  ;;  %p5573_p7 = scmp.lt.u32.totalorder %s5569_s19, %s6580_s14 }
  0x7d   :  { %p5575_p8 = pnand %p5573_p7, %p5570_p6 }
  0x7f   :  { %5578 = shalt.err (!%p5575_p8)
}
  0x80   :  { %s5579_s6 = scalar_lea.vmem %s115_s8, 512  ;;  %p5584_p10 = scmp.lt.s32.totalorder %s115_s8, %s115_s8 }
  0x81   :  { %p5580_p9 = scmp.ne.s32.totalorder %s115_s8, %s5579_s6  ;;  %p5585_p11 = scmp.lt.s32.totalorder %s5579_s6, %s5579_s6 }
  0x83   :  { %p5586_p12 = por %p5585_p11, %p5584_p10 }
  0x85   :  { %p5587_p13 = pnand %p5586_p12, %p5580_p9 }
  0x87   :  { %5590 = shalt.err (!%p5587_p13)
}
  0x88   :  { %120 = dma.hbm_to_vmem [thread:$0]  %s6580_s14, 512, %s115_s8, [#allocation16], %s5624_s26, %s5624_s26, %s5625_s27  }
  0x89   :  { %5613 = dma.done.wait [#allocation7], 64  }
  0x8a   :  { %5614 = vsyncadd [#allocation7], 4294967232 }
  0x8b   :  { %5615 = dma.done.wait [#allocation10], 576  }
  0x8c   :  { %5616 = vsyncadd [#allocation10], 4294966720 }
  0x8d   :  { %5617 = dma.done.wait [#allocation13], 528  }
  0x8e   :  { %5618 = vsyncadd [#allocation13], 4294966768 }
  0x8f   :  { %5619 = dma.done.wait [#allocation16], 528  }
  0x90   :  { %5620 = vsyncadd [#allocation16], 4294966768  ;;  %vm203_vm0 = vcmask 1042432   ;;  %v158_v0 = vld [vmem:[#allocation6] sm:$0x7]  ;;  %s6598_s1 = sld [smem:[#allocation24_spill]] }
  0x91   :  { %vm178_vm1 = vcmask 23552   ;;  %4536 = vmatprep.subr.msk.mxu0 %vm203_vm0, %v158_v0  ;;  %5227 = vmatprep.subr.msk.mxu1 %vm203_vm0, %v158_v0  ;;  %v165_v5 = vld [vmem:[#allocation11] sm:$0x7]  ;;  %v160_v7 = vld [vmem:[#allocation9 + $0x8] sm:$0xff]  ;;  %v161_v11 = vld [vmem:[#allocation9 + $0x10] sm:$0xff]  ;;  %v5632_v13 = vmov 0.0|0.0  }
  0x92   :  { %4537 = vmatpush3.msk.msra.mxu0 %vm203_vm0, %v158_v0  ;;  %5228 = vmatpush3.msk.msra.mxu1 %vm203_vm0, %v158_v0  ;;  %v159_v6 = vld [vmem:[#allocation9] sm:$0xff]  ;;  %v162_v12 = vld [vmem:[#allocation9 + $0x18] sm:$0xff]  ;;  %v167_v18 = vld [vmem:[#allocation12 + $0x8] sm:$0xff]  ;;  %vm5633_vm2 = vmmov 0   ;;  %v5634_v20 = vmov 0.0   ;;  %s6599_s6 = sld [smem:[#allocation27_spill]] }
  0x93   :  { %v5850_v8 = vpack.c.bf16 %v160_v7, %v159_v6  ;;  %4550 = vmatprep.subr.msk.mxu1 %vm203_vm0, %v165_v5  ;;  %4991 = vmatprep.subr.bf16.mxu0 %v5632_v13  ;;  %v5870_v16 = vpack.c.bf16 %v162_v12, %v161_v11  ;;  %v166_v17 = vld [vmem:[#allocation12] sm:$0xff]  ;;  %v168_v21 = vld [vmem:[#allocation12 + $0x10] sm:$0xff]  ;;  %v169_v22 = vld [vmem:[#allocation12 + $0x18] sm:$0xff]  ;;  %vm312_vm3 = vcmask 785408   ;;  %s5635_s20 = smov 64   ;;  %vm455_vm4 = vcmask 261120  }
  0x94   :  { %v5878_v19 = vpack.c.bf16 %v167_v18, %v166_v17  ;;  %v5888_v23 = vpack.c.bf16 %v169_v22, %v168_v21  ;;  %v4223_v41 = vld [vmem:[#allocation14] ss:$0 sm:$0xff]  ;;  %v5926_v42 = vld [vmem:[%s6570_s4] ss:$0 sm:$0xff]  ;;  %v5938_v62 = vld [vmem:[#allocation15] ss:$0 sm:$0xff] }
  0x95   :  { %s5636_s4 = smov 96   ;;  %s5637_s3 = smov 32   ;;  %vm2209_vm5 = vcmask 523264   ;;  %vm4193_vm6 = vcmask 25600  }
  0x96   :  { %v150_v1 = vld [vmem:[%s6598_s1] sm:$0xff]  ;;  %v151_v3 = vld [vmem:[%s6598_s1 + $0x8] sm:$0xff]  ;;  %v152_v9 = vld [vmem:[%s6598_s1 + $0x10] sm:$0xff]  ;;  %s6600_s24 = sld [smem:[#allocation28_spill]]  ;;  %s5638_s22 = smov [#allocation18]  }
  0x97   :  { %v154_v2 = vld [vmem:[%s6598_s1 + $0x20] sm:$0xff]  ;;  %v155_v4 = vld [vmem:[%s6598_s1 + $0x28] sm:$0xff]  ;;  %4538 = vmatprep.mubr.msk.f32.mxu0 %vm178_vm1, %v150_v1  ;;  %v156_v10 = vld [vmem:[%s6598_s1 + $0x30] sm:$0xff] }
  0x98   :  { %4544 = vmatprep.mubr.msk.f32.mxu1 %vm178_vm1, %v154_v2  ;;  %4539 = vmatmul.mubr.msk.f32.vlgmr.msra.gmra.mrb[0].mxu0 %vm178_vm1, %v151_v3  ;;  %v153_v14 = vld [vmem:[%s6598_s1 + $0x18] sm:$0xff]  ;;  %v4213_v24 = vld [vmem:[%s6599_s6] ss:$0 sm:$0xff] }
  0x99   :  { %4545 = vmatmul.mubr.msk.f32.vlgmr.msra.gmra.mrb[0].mxu1 %vm178_vm1, %v155_v4  ;;  %v157_v15 = vld [vmem:[%s6598_s1 + $0x38] sm:$0xff]  ;;  %4993 = vmatpush3.bf16.msra.mxu0 %v5850_v8 }
  0x9a   :  { %4551 = vmatpush3.msk.msra.mxu1 %vm203_vm0, %v165_v5  ;;  %4541 = vmatprep.mubr.msk.f32.mxu0 %vm178_vm1, %v152_v9 }
  0x9b   :  { %4547 = vmatprep.mubr.msk.f32.mxu1 %vm178_vm1, %v156_v10  ;;  %4994 = vmatprep.subr.bf16.mxu0 %v5632_v13 }
  0x9c   :  { %4542 = vmatmul.mubr.msk.f32.gmra.mrb[2].mxu0 %vm178_vm1, %v153_v14  ;;  %4997 = vmatprep.subr.bf16.mxu1 %v5632_v13 }
  0x9d   :  { %4548 = vmatmul.mubr.msk.f32.gmra.mrb[2].mxu1 %vm178_vm1, %v157_v15  ;;  %4996 = vmatpush3.bf16.msra.mxu0 %v5870_v16 }
  0x9e   :  { %4552 = vmatprep.mubr.msk.f32.mxu1 %vm178_vm1, %v150_v1  ;;  %4572 = vmatprep.mubr.msk.f32.mxu0 %vm5633_vm2, %v5634_v20 }
  0x9f   :  { %5003 = vmatprep.subr.bf16.mxu0 %v5632_v13 }
  0xa0   :  { %4573 = vmatmul.mubr.f32.vlgmr.msra.gmra.mrb[4].mxu0 %v5634_v20 }
  0xa1   :  { %4553 = vmatmul.mubr.msk.f32.vlgmr.msra.gmra.mrb[4].mxu1 %vm178_vm1, %v151_v3  ;;  %5005 = vmatpush3.bf16.msra.mxu0 %v5850_v8 }
  0xa2   :  { %4999 = vmatpush3.bf16.msra.mxu1 %v5878_v19  ;;  %4555 = vmatprep.mubr.msk.f32.mxu1 %vm178_vm1, %v152_v9 }
  0xa3   :  { %5000 = vmatprep.subr.bf16.mxu1 %v5632_v13  ;;  %4594 = vmatprep.mubr.msk.f32.mxu0 %vm5633_vm2, %v5634_v20 }
  0xa4   :  { %5006 = vmatprep.subr.bf16.mxu0 %v5632_v13 }
  0xa5   :  { %4556 = vmatmul.mubr.msk.f32.gmra.mrb[6].mxu1 %vm178_vm1, %v153_v14  ;;  %5008 = vmatpush3.bf16.msra.mxu0 %v5870_v16 }
  0xa6   :  { %4558 = vmatprep.mubr.msk.f32.mxu1 %vm178_vm1, %v154_v2  ;;  %5002 = vmatpush3.bf16.msra.mxu1 %v5888_v23 }
  0xa7   :  { %5009 = vmatprep.subr.bf16.mxu1 %v5632_v13  ;;  %5015 = vmatprep.subr.bf16.mxu0 %v5632_v13 }
  0xa9   :  { %4559 = vmatmul.mubr.msk.f32.gmra.mrb[8].mxu1 %vm178_vm1, %v155_v4 }
  0xaa   :  { %4561 = vmatprep.mubr.msk.f32.mxu1 %vm178_vm1, %v156_v10 }
  0xad   :  { %4562 = vmatmul.mubr.msk.f32.gmra.mrb[10].mxu1 %vm178_vm1, %v157_v15 }
  0xae   :  { %4583 = vmatprep.mubr.msk.f32.mxu1 %vm5633_vm2, %v5634_v20 }
  0xb1   :  { %4584 = vmatmul.mubr.f32.vlgmr.msra.gmra.mrb[12].mxu1 %v5634_v20 }
  0xb2   :  { %5011 = vmatpush3.bf16.msra.mxu1 %v5878_v19  ;;  %4605 = vmatprep.mubr.msk.f32.mxu1 %vm5633_vm2, %v5634_v20 }
  0xb3   :  { %5012 = vmatprep.subr.bf16.mxu1 %v5632_v13 }
  0xb6   :  { %5014 = vmatpush3.bf16.msra.mxu1 %v5888_v23 }
  0xb7   :  { %5021 = vmatprep.subr.bf16.mxu1 %v5632_v13 }
 0x16b   :  { %v4540_v26 = vpop.f32.mrb[0].mxu0 }
 0x16c   :  { %v4546_v25 = vpop.f32.mrb[0].mxu1  ;;  %v279_v29 = vadd.f32 %v4540_v26, %v4213_v24  ;;  %v273_v30 = vpop.f32.mrb[1].mxu0 }
 0x16d   :  { %v299_v27 = vadd.f32 %v4546_v25, %v4213_v24  ;;  %v293_v28 = vpop.f32.mrb[1].mxu1  ;;  %v274_v32 = vadd.f32 %v4213_v24, %v273_v30 }
 0x16e   :  { %v294_v31 = vadd.f32 %v4213_v24, %v293_v28  ;;  %314 = vst.msk [vmem:[#allocation2 + $0x8] sm:$0xff] %vm312_vm3, %v279_v29 }
 0x16f   :  { %318 = vst.msk [vmem:[#allocation2 + $0x28] sm:$0xff] %vm312_vm3, %v299_v27  ;;  %313 = vst.msk [vmem:[#allocation2] sm:$0xff] %vm312_vm3, %v274_v32  ;;  %v4543_v34 = vpop.f32.mrb[2].mxu0 }
 0x170   :  { %317 = vst.msk [vmem:[#allocation2 + $0x20] sm:$0xff] %vm312_vm3, %v294_v31  ;;  %v4549_v33 = vpop.f32.mrb[2].mxu1  ;;  %v289_v37 = vadd.f32 %v4543_v34, %v4213_v24  ;;  %v283_v38 = vpop.f32.mrb[3].mxu0 }
 0x171   :  { %v309_v35 = vadd.f32 %v4549_v33, %v4213_v24  ;;  %v303_v36 = vpop.f32.mrb[3].mxu1  ;;  %v284_v40 = vadd.f32 %v4213_v24, %v283_v38 }
 0x172   :  { %v304_v39 = vadd.f32 %v4213_v24, %v303_v36  ;;  %316 = vst.msk [vmem:[#allocation2 + $0x18] sm:$0xff] %vm312_vm3, %v289_v37 }
 0x173   :  { %320 = vst.msk [vmem:[#allocation2 + $0x38] sm:$0xff] %vm312_vm3, %v309_v35  ;;  %315 = vst.msk [vmem:[#allocation2 + $0x10] sm:$0xff] %vm312_vm3, %v284_v40  ;;  %v525_v45 = vpop.f32.mrb[4].mxu0 }
 0x174   :  { %319 = vst.msk [vmem:[#allocation2 + $0x30] sm:$0xff] %vm312_vm3, %v304_v39  ;;  %v4554_v43 = vpop.f32.mrb[4].mxu1  ;;  %v526_v47 = vadd.f32 %v5926_v42, %v525_v45  ;;  %v4574_v49 = vpop.f32.mrb[5].mxu0 }
 0x175   :  { %v402_v44 = vadd.f32 %v4554_v43, %v4223_v41  ;;  %v396_v46 = vpop.f32.mrb[5].mxu1 }
 0x176   :  { %v397_v48 = vadd.f32 %v4223_v41, %v396_v46  ;;  %538 = vrot.lane.b32.xlu1 %v526_v47, %s5635_s20  ;;  %v529_v2 = vld [vmem:[#allocation2] sm:$0xff] }
 0x177   :  { %436 = vst.msk [vmem:[#allocation3 + $0x8] sm:$0xff] %vm312_vm3, %v402_v44  ;;  %v530_v3 = vadd.f32 %v529_v2, %v526_v47 }
 0x178   :  { %435 = vst.msk [vmem:[#allocation3] sm:$0xff] %vm312_vm3, %v397_v48  ;;  %v4557_v50 = vpop.f32.mrb[6].mxu1 }
 0x179   :  { %v412_v51 = vadd.f32 %v4557_v50, %v4223_v41  ;;  %v406_v52 = vpop.f32.mrb[7].mxu1  ;;  %v4235_v4 = vmul.f32 -1.442695, %v530_v3 }
 0x17a   :  { %v407_v53 = vadd.f32 %v4223_v41, %v406_v52 }
 0x17b   :  { %438 = vst.msk [vmem:[#allocation3 + $0x18] sm:$0xff] %vm312_vm3, %v412_v51  ;;  %5245 = vpow2.f32 %v4235_v4  ;;  %v735_v51 = vld [vmem:[#allocation2 + $0x8] sm:$0xff] }
 0x17c   :  { %437 = vst.msk [vmem:[#allocation3 + $0x10] sm:$0xff] %vm312_vm3, %v407_v53  ;;  %v4560_v54 = vpop.f32.mrb[8].mxu1 }
 0x17d   :  { %v422_v55 = vadd.f32 %v4560_v54, %v4223_v41  ;;  %v416_v56 = vpop.f32.mrb[9].mxu1 }
 0x17e   :  { %v417_v57 = vadd.f32 %v4223_v41, %v416_v56 }
 0x17f   :  { %440 = vst.msk [vmem:[#allocation3 + $0x28] sm:$0xff] %vm312_vm3, %v422_v55 }
 0x180   :  { %439 = vst.msk [vmem:[#allocation3 + $0x20] sm:$0xff] %vm312_vm3, %v417_v57  ;;  %v4563_v58 = vpop.f32.mrb[10].mxu1 }
 0x181   :  { %v432_v59 = vadd.f32 %v4563_v58, %v4223_v41  ;;  %v426_v60 = vpop.f32.mrb[11].mxu1 }
 0x182   :  { %v427_v61 = vadd.f32 %v4223_v41, %v426_v60 }
 0x183   :  { %442 = vst.msk [vmem:[#allocation3 + $0x38] sm:$0xff] %vm312_vm3, %v432_v59 }
 0x184   :  { %441 = vst.msk [vmem:[#allocation3 + $0x30] sm:$0xff] %vm312_vm3, %v427_v61  ;;  %v622_v63 = vpop.f32.mrb[12].mxu1 }
 0x185   :  { %v623_v0 = vadd.f32 %v5938_v62, %v622_v63  ;;  %v4585_v1 = vpop.f32.mrb[13].mxu1  ;;  %v5246_v6 = vpop.eup %5245 }
 0x186   :  { %v534_v9 = vadd.f32 1.0, %v5246_v6 }
 0x187   :  { %635 = vrot.lane.b32.xlu0 %v623_v0, %s5635_s20 }
 0x188   :  { %5247 = vrcp.f32 %v534_v9 }
 0x18a   :  { %v626_v5 = vld [vmem:[#allocation3 + $0x38] sm:$0xff] }
 0x18b   :  { %v627_v7 = vadd.f32 %v626_v5, %v623_v0  ;;  %v834_v49 = vld [vmem:[#allocation3 + $0x30] sm:$0xff] }
 0x18d   :  { %v4236_v10 = vmul.f32 -1.442695, %v627_v7 }
 0x18f   :  { %5249 = vpow2.f32 %v4236_v10 }
 0x192   :  { %v5248_v11 = vpop.eup %5247 }
 0x193   :  { %v548_v35 = vsub.f32 1.0, %v5248_v11  ;;  %v554_v37 = vmul.f32 0.0, %v5248_v11 }
 0x199   :  { %v5250_v12 = vpop.eup %5249 }
 0x19a   :  { %v631_v15 = vadd.f32 1.0, %v5250_v12 }
 0x19c   :  { %5251 = vrcp.f32 %v631_v15 }
 0x1a6   :  { %v5252_v18 = vpop.eup %5251 }
 0x1a7   :  { %v645_v30 = vsub.f32 1.0, %v5252_v18  ;;  %v651_v32 = vmul.f32 0.0, %v5252_v18 }
 0x1e8   :  { %v539_v14 = vpop.permute.xlu1 %538 }
 0x1e9   :  { %v541_v17 = vmul.f32 %v5248_v11, %v539_v14 }
 0x1eb   :  { %543 = vrot.lane.b32.xlu1 %v541_v17, %s5635_s20 }
 0x1f9   :  { %v636_v21 = vpop.permute.xlu0 %635 }
 0x1fa   :  { %v638_v22 = vmul.f32 %v5252_v18, %v636_v21 }
 0x1fc   :  { %640 = vrot.lane.b32.xlu0 %v638_v22, %s5635_s20 }
 0x25d   :  { %v544_v24 = vpop.permute.xlu1 %543 }
 0x25e   :  { %v546_v27 = vadd.f32 %v544_v24, %v529_v2 }
 0x26e   :  { %v641_v25 = vpop.permute.xlu0 %640 }
 0x26f   :  { %v643_v26 = vadd.f32 %v641_v25, %v626_v5 }
 0x271   :  { %5253 = vtanh.f32 %v643_v26 }
 0x272   :  { %5255 = vtanh.f32 %v546_v27 }
 0x27b   :  { %v5254_v28 = vpop.eup %5253 }
 0x27c   :  { %647 = vrot.lane.b32.xlu0 %v5254_v28, %s5636_s4  ;;  %v5256_v29 = vpop.eup %5255 }
 0x280   :  { %550 = vrot.lane.b32.xlu0 %v5256_v29, %s5636_s4 }
 0x2ee   :  { %v648_v31 = vpop.permute.xlu0 %647 }
 0x2ef   :  { %v650_v33 = vmul.f32 %v648_v31, %v645_v30 }
 0x2f1   :  { %v5948_v34 = vadd.f32 %v651_v32, %v650_v33  ;;  %v1042_v32 = vld [vmem:[#allocation3 + $0x28] sm:$0xff] }
 0x2f2   :  { %v551_v36 = vpop.permute.xlu0 %550 }
 0x2f3   :  { %v553_v38 = vmul.f32 %v551_v36, %v548_v35  ;;  %659 = vrot.lane.b32.xlu1 %v5948_v34, %s5636_s4 }
 0x2f5   :  { %v5952_v39 = vadd.f32 %v554_v37, %v553_v38 }
 0x2f7   :  { %654 = vrot.lane.b32.xlu1 %v5952_v39, %s5636_s4 }
 0x365   :  { %v660_v40 = vpop.permute.xlu1 %659 }
 0x366   :  { %662 = vst.msk [vmem:[#allocation5 + $0x38] sm:$0xff] %vm455_vm4, %v660_v40  ;;  %4606 = vmatmul.mubr.msk.f32.vlgmr.msra.gmra.mrb[14].mxu1 %vm455_vm4, %v660_v40 }
 0x367   :  { %5023 = vmatpush3.bf16.msra.mxu1 %v5878_v19  ;;  %4627 = vmatprep.mubr.msk.f32.mxu1 %vm5633_vm2, %v5634_v20 }
 0x368   :  { %5024 = vmatprep.subr.bf16.mxu1 %v5632_v13 }
 0x369   :  { %v655_v41 = vpop.permute.xlu1 %654 }
 0x36a   :  { %657 = vst.msk [vmem:[#allocation4] sm:$0xff] %vm455_vm4, %v655_v41  ;;  %4595 = vmatmul.mubr.msk.f32.vlgmr.msra.gmra.mrb[6].mxu0 %vm455_vm4, %v655_v41 }
 0x36b   :  { %5017 = vmatpush3.bf16.msra.mxu0 %v5850_v8  ;;  %5026 = vmatpush3.bf16.msra.mxu1 %v5888_v23 }
 0x36c   :  { %5018 = vmatprep.subr.bf16.mxu0 %v5632_v13  ;;  %4616 = vmatprep.mubr.msk.f32.mxu0 %vm5633_vm2, %v5634_v20 }
 0x36d   :  { %5033 = vmatprep.subr.bf16.mxu1 %v5632_v13 }
 0x36f   :  { %5020 = vmatpush3.bf16.msra.mxu0 %v5870_v16 }
 0x370   :  { %5027 = vmatprep.subr.bf16.mxu0 %v5632_v13 }
 0x439   :  { %v830_v43 = vpop.f32.mrb[14].mxu1 }
 0x43a   :  { %v831_v44 = vadd.f32 %v5938_v62, %v830_v43  ;;  %v4607_v45 = vpop.f32.mrb[15].mxu1 }
 0x43c   :  { %843 = vrot.lane.b32.xlu0 %v831_v44, %s5635_s20  ;;  %v835_v50 = vadd.f32 %v834_v49, %v831_v44 }
 0x43d   :  { %v731_v46 = vpop.f32.mrb[6].mxu0 }
 0x43e   :  { %v732_v47 = vadd.f32 %v5926_v42, %v731_v46  ;;  %v4596_v48 = vpop.f32.mrb[7].mxu0  ;;  %v4240_v52 = vmul.f32 -1.442695, %v835_v50 }
 0x440   :  { %744 = vrot.lane.b32.xlu0 %v732_v47, %s5635_s20  ;;  %v736_v53 = vadd.f32 %v735_v51, %v732_v47  ;;  %5257 = vpow2.f32 %v4240_v52 }
 0x442   :  { %v4238_v54 = vmul.f32 -1.442695, %v736_v53 }
 0x444   :  { %5259 = vpow2.f32 %v4238_v54 }
 0x44a   :  { %v5258_v55 = vpop.eup %5257 }
 0x44b   :  { %v839_v56 = vadd.f32 1.0, %v5258_v55 }
 0x44d   :  { %5261 = vrcp.f32 %v839_v56 }
 0x44e   :  { %v5260_v57 = vpop.eup %5259 }
 0x44f   :  { %v740_v58 = vadd.f32 1.0, %v5260_v57 }
 0x451   :  { %5263 = vrcp.f32 %v740_v58 }
 0x457   :  { %v5262_v59 = vpop.eup %5261 }
 0x458   :  { %v853_v9 = vsub.f32 1.0, %v5262_v59  ;;  %v859_v11 = vmul.f32 %v5262_v59, %v5948_v34  ;;  %v943_v34 = vld [vmem:[#allocation2 + $0x10] sm:$0xff] }
 0x45b   :  { %v5264_v63 = vpop.eup %5263 }
 0x45c   :  { %v754_v15 = vsub.f32 1.0, %v5264_v63  ;;  %v760_v18 = vmul.f32 %v5264_v63, %v5952_v39 }
 0x4ae   :  { %v844_v60 = vpop.permute.xlu0 %843 }
 0x4af   :  { %v846_v61 = vmul.f32 %v5262_v59, %v844_v60 }
 0x4b1   :  { %848 = vrot.lane.b32.xlu1 %v846_v61, %s5635_s20 }
 0x4b2   :  { %v745_v0 = vpop.permute.xlu0 %744 }
 0x4b3   :  { %v747_v1 = vmul.f32 %v5264_v63, %v745_v0 }
 0x4b5   :  { %749 = vrot.lane.b32.xlu1 %v747_v1, %s5635_s20 }
 0x523   :  { %v849_v2 = vpop.permute.xlu1 %848 }
 0x524   :  { %v851_v3 = vadd.f32 %v849_v2, %v834_v49 }
 0x526   :  { %5265 = vtanh.f32 %v851_v3 }
 0x527   :  { %v750_v4 = vpop.permute.xlu1 %749 }
 0x528   :  { %v752_v5 = vadd.f32 %v750_v4, %v735_v51 }
 0x52a   :  { %5267 = vtanh.f32 %v752_v5 }
 0x530   :  { %v5266_v6 = vpop.eup %5265 }
 0x531   :  { %855 = vrot.lane.b32.xlu0 %v5266_v6, %s5636_s4 }
 0x534   :  { %v5268_v7 = vpop.eup %5267 }
 0x535   :  { %756 = vrot.lane.b32.xlu0 %v5268_v7, %s5636_s4 }
 0x5a3   :  { %v856_v10 = vpop.permute.xlu0 %855 }
 0x5a4   :  { %v858_v12 = vmul.f32 %v856_v10, %v853_v9 }
 0x5a6   :  { %v5981_v14 = vadd.f32 %v859_v11, %v858_v12  ;;  %v1250_v11 = vld [vmem:[#allocation3 + $0x20] sm:$0xff] }
 0x5a7   :  { %v757_v17 = vpop.permute.xlu0 %756 }
 0x5a8   :  { %v759_v21 = vmul.f32 %v757_v17, %v754_v15  ;;  %867 = vrot.lane.b32.xlu1 %v5981_v14, %s5636_s4 }
 0x5aa   :  { %v5986_v22 = vadd.f32 %v760_v18, %v759_v21 }
 0x5ac   :  { %862 = vrot.lane.b32.xlu1 %v5986_v22, %s5636_s4 }
 0x61a   :  { %v868_v24 = vpop.permute.xlu1 %867 }
 0x61b   :  { %870 = vst.msk [vmem:[#allocation5 + $0x30] sm:$0xff] %vm455_vm4, %v868_v24  ;;  %4628 = vmatmul.mubr.msk.f32.vlgmr.msra.gmra.mrb[16].mxu1 %vm455_vm4, %v868_v24 }
 0x61c   :  { %5035 = vmatpush3.bf16.msra.mxu1 %v5878_v19  ;;  %4649 = vmatprep.mubr.msk.f32.mxu1 %vm5633_vm2, %v5634_v20 }
 0x61d   :  { %5036 = vmatprep.subr.bf16.mxu1 %v5632_v13 }
 0x61e   :  { %v863_v25 = vpop.permute.xlu1 %862 }
 0x61f   :  { %865 = vst.msk [vmem:[#allocation4 + $0x8] sm:$0xff] %vm455_vm4, %v863_v25  ;;  %4617 = vmatmul.mubr.msk.f32.vlgmr.msra.gmra.mrb[8].mxu0 %vm455_vm4, %v863_v25 }
 0x620   :  { %5029 = vmatpush3.bf16.msra.mxu0 %v5850_v8  ;;  %5038 = vmatpush3.bf16.msra.mxu1 %v5888_v23 }
 0x621   :  { %5030 = vmatprep.subr.bf16.mxu0 %v5632_v13  ;;  %4638 = vmatprep.mubr.msk.f32.mxu0 %vm5633_vm2, %v5634_v20 }
 0x622   :  { %5045 = vmatprep.subr.bf16.mxu1 %v5632_v13 }
 0x624   :  { %5032 = vmatpush3.bf16.msra.mxu0 %v5870_v16 }
 0x625   :  { %5039 = vmatprep.subr.bf16.mxu0 %v5632_v13 }
 0x6ee   :  { %v1038_v26 = vpop.f32.mrb[16].mxu1 }
 0x6ef   :  { %v1039_v27 = vadd.f32 %v5938_v62, %v1038_v26  ;;  %v4629_v28 = vpop.f32.mrb[17].mxu1 }
 0x6f1   :  { %1051 = vrot.lane.b32.xlu0 %v1039_v27, %s5635_s20  ;;  %v1043_v33 = vadd.f32 %v1042_v32, %v1039_v27 }
 0x6f2   :  { %v939_v29 = vpop.f32.mrb[8].mxu0 }
 0x6f3   :  { %v940_v30 = vadd.f32 %v5926_v42, %v939_v29  ;;  %v4618_v31 = vpop.f32.mrb[9].mxu0  ;;  %v4244_v35 = vmul.f32 -1.442695, %v1043_v33 }
 0x6f5   :  { %952 = vrot.lane.b32.xlu0 %v940_v30, %s5635_s20  ;;  %v944_v36 = vadd.f32 %v943_v34, %v940_v30  ;;  %5269 = vpow2.f32 %v4244_v35 }
 0x6f7   :  { %v4242_v37 = vmul.f32 -1.442695, %v944_v36 }
 0x6f9   :  { %5271 = vpow2.f32 %v4242_v37 }
 0x6ff   :  { %v5270_v38 = vpop.eup %5269 }
 0x700   :  { %v1047_v39 = vadd.f32 1.0, %v5270_v38 }
 0x702   :  { %5273 = vrcp.f32 %v1047_v39 }
 0x703   :  { %v5272_v40 = vpop.eup %5271 }
 0x704   :  { %v948_v41 = vadd.f32 1.0, %v5272_v40 }
 0x706   :  { %5275 = vrcp.f32 %v948_v41 }
 0x70c   :  { %v5274_v43 = vpop.eup %5273 }
 0x70d   :  { %v1061_v55 = vsub.f32 1.0, %v5274_v43  ;;  %v1067_v57 = vmul.f32 %v5274_v43, %v5981_v14  ;;  %v1151_v14 = vld [vmem:[#allocation2 + $0x18] sm:$0xff] }
 0x710   :  { %v5276_v46 = vpop.eup %5275 }
 0x711   :  { %v962_v60 = vsub.f32 1.0, %v5276_v46  ;;  %v968_v63 = vmul.f32 %v5276_v46, %v5986_v22 }
 0x763   :  { %v1052_v44 = vpop.permute.xlu0 %1051 }
 0x764   :  { %v1054_v45 = vmul.f32 %v5274_v43, %v1052_v44 }
 0x766   :  { %1056 = vrot.lane.b32.xlu1 %v1054_v45, %s5635_s20 }
 0x767   :  { %v953_v47 = vpop.permute.xlu0 %952 }
 0x768   :  { %v955_v48 = vmul.f32 %v5276_v46, %v953_v47 }
 0x76a   :  { %957 = vrot.lane.b32.xlu1 %v955_v48, %s5635_s20 }
 0x7d8   :  { %v1057_v49 = vpop.permute.xlu1 %1056 }
 0x7d9   :  { %v1059_v50 = vadd.f32 %v1057_v49, %v1042_v32 }
 0x7db   :  { %5277 = vtanh.f32 %v1059_v50 }
 0x7dc   :  { %v958_v51 = vpop.permute.xlu1 %957 }
 0x7dd   :  { %v960_v52 = vadd.f32 %v958_v51, %v943_v34 }
 0x7df   :  { %5279 = vtanh.f32 %v960_v52 }
 0x7e5   :  { %v5278_v53 = vpop.eup %5277 }
 0x7e6   :  { %1063 = vrot.lane.b32.xlu0 %v5278_v53, %s5636_s4 }
 0x7e9   :  { %v5280_v54 = vpop.eup %5279 }
 0x7ea   :  { %964 = vrot.lane.b32.xlu0 %v5280_v54, %s5636_s4 }
 0x858   :  { %v1064_v56 = vpop.permute.xlu0 %1063 }
 0x859   :  { %v1066_v58 = vmul.f32 %v1064_v56, %v1061_v55 }
 0x85b   :  { %v6015_v59 = vadd.f32 %v1067_v57, %v1066_v58  ;;  %v1458_v57 = vld [vmem:[#allocation3 + $0x18] sm:$0xff] }
 0x85c   :  { %v965_v61 = vpop.permute.xlu0 %964 }
 0x85d   :  { %v967_v0 = vmul.f32 %v965_v61, %v962_v60  ;;  %1075 = vrot.lane.b32.xlu1 %v6015_v59, %s5636_s4 }
 0x85f   :  { %v6020_v1 = vadd.f32 %v968_v63, %v967_v0 }
 0x861   :  { %1070 = vrot.lane.b32.xlu1 %v6020_v1, %s5636_s4 }
 0x8cf   :  { %v1076_v2 = vpop.permute.xlu1 %1075 }
 0x8d0   :  { %1078 = vst.msk [vmem:[#allocation5 + $0x28] sm:$0xff] %vm455_vm4, %v1076_v2  ;;  %4650 = vmatmul.mubr.msk.f32.vlgmr.msra.gmra.mrb[18].mxu1 %vm455_vm4, %v1076_v2 }
 0x8d1   :  { %5047 = vmatpush3.bf16.msra.mxu1 %v5878_v19  ;;  %4671 = vmatprep.mubr.msk.f32.mxu1 %vm5633_vm2, %v5634_v20 }
 0x8d2   :  { %5048 = vmatprep.subr.bf16.mxu1 %v5632_v13 }
 0x8d3   :  { %v1071_v3 = vpop.permute.xlu1 %1070 }
 0x8d4   :  { %1073 = vst.msk [vmem:[#allocation4 + $0x10] sm:$0xff] %vm455_vm4, %v1071_v3  ;;  %4639 = vmatmul.mubr.msk.f32.vlgmr.msra.gmra.mrb[10].mxu0 %vm455_vm4, %v1071_v3 }
 0x8d5   :  { %5041 = vmatpush3.bf16.msra.mxu0 %v5850_v8  ;;  %5050 = vmatpush3.bf16.msra.mxu1 %v5888_v23 }
 0x8d6   :  { %5042 = vmatprep.subr.bf16.mxu0 %v5632_v13  ;;  %4660 = vmatprep.mubr.msk.f32.mxu0 %vm5633_vm2, %v5634_v20 }
 0x8d7   :  { %5057 = vmatprep.subr.bf16.mxu1 %v5632_v13 }
 0x8d9   :  { %5044 = vmatpush3.bf16.msra.mxu0 %v5870_v16 }
 0x8da   :  { %5051 = vmatprep.subr.bf16.mxu0 %v5632_v13 }
 0x9a3   :  { %v1246_v4 = vpop.f32.mrb[18].mxu1 }
 0x9a4   :  { %v1247_v5 = vadd.f32 %v5938_v62, %v1246_v4  ;;  %v4651_v6 = vpop.f32.mrb[19].mxu1 }
 0x9a6   :  { %1259 = vrot.lane.b32.xlu0 %v1247_v5, %s5635_s20  ;;  %v1251_v12 = vadd.f32 %v1250_v11, %v1247_v5 }
 0x9a7   :  { %v1147_v7 = vpop.f32.mrb[10].mxu0 }
 0x9a8   :  { %v1148_v9 = vadd.f32 %v5926_v42, %v1147_v7  ;;  %v4640_v10 = vpop.f32.mrb[11].mxu0  ;;  %v4248_v15 = vmul.f32 -1.442695, %v1251_v12 }
 0x9aa   :  { %1160 = vrot.lane.b32.xlu0 %v1148_v9, %s5635_s20  ;;  %v1152_v17 = vadd.f32 %v1151_v14, %v1148_v9  ;;  %5281 = vpow2.f32 %v4248_v15 }
 0x9ac   :  { %v4246_v18 = vmul.f32 -1.442695, %v1152_v17 }
 0x9ae   :  { %5283 = vpow2.f32 %v4246_v18 }
 0x9b4   :  { %v5282_v21 = vpop.eup %5281 }
 0x9b5   :  { %v1255_v22 = vadd.f32 1.0, %v5282_v21 }
 0x9b7   :  { %5285 = vrcp.f32 %v1255_v22 }
 0x9b8   :  { %v5284_v24 = vpop.eup %5283 }
 0x9b9   :  { %v1156_v25 = vadd.f32 1.0, %v5284_v24 }
 0x9bb   :  { %5287 = vrcp.f32 %v1156_v25 }
 0x9c1   :  { %v5286_v26 = vpop.eup %5285 }
 0x9c2   :  { %v1269_v38 = vsub.f32 1.0, %v5286_v26  ;;  %v1275_v40 = vmul.f32 %v5286_v26, %v6015_v59  ;;  %v1359_v59 = vld [vmem:[#allocation2 + $0x20] sm:$0xff] }
 0x9c5   :  { %v5288_v29 = vpop.eup %5287 }
 0x9c6   :  { %v1170_v44 = vsub.f32 1.0, %v5288_v29  ;;  %v1176_v46 = vmul.f32 %v5288_v29, %v6020_v1 }
 0xa18   :  { %v1260_v27 = vpop.permute.xlu0 %1259 }
 0xa19   :  { %v1262_v28 = vmul.f32 %v5286_v26, %v1260_v27 }
 0xa1b   :  { %1264 = vrot.lane.b32.xlu1 %v1262_v28, %s5635_s20 }
 0xa1c   :  { %v1161_v30 = vpop.permute.xlu0 %1160 }
 0xa1d   :  { %v1163_v31 = vmul.f32 %v5288_v29, %v1161_v30 }
 0xa1f   :  { %1165 = vrot.lane.b32.xlu1 %v1163_v31, %s5635_s20 }
 0xa8d   :  { %v1265_v32 = vpop.permute.xlu1 %1264 }
 0xa8e   :  { %v1267_v33 = vadd.f32 %v1265_v32, %v1250_v11 }
 0xa90   :  { %5289 = vtanh.f32 %v1267_v33 }
 0xa91   :  { %v1166_v34 = vpop.permute.xlu1 %1165 }
 0xa92   :  { %v1168_v35 = vadd.f32 %v1166_v34, %v1151_v14 }
 0xa94   :  { %5291 = vtanh.f32 %v1168_v35 }
 0xa9a   :  { %v5290_v36 = vpop.eup %5289 }
 0xa9b   :  { %1271 = vrot.lane.b32.xlu0 %v5290_v36, %s5636_s4 }
 0xa9e   :  { %v5292_v37 = vpop.eup %5291 }
 0xa9f   :  { %1172 = vrot.lane.b32.xlu0 %v5292_v37, %s5636_s4 }
 0xb0d   :  { %v1272_v39 = vpop.permute.xlu0 %1271 }
 0xb0e   :  { %v1274_v41 = vmul.f32 %v1272_v39, %v1269_v38 }
 0xb10   :  { %v6049_v43 = vadd.f32 %v1275_v40, %v1274_v41  ;;  %v1666_v40 = vld [vmem:[#allocation3 + $0x10] sm:$0xff] }
 0xb11   :  { %v1173_v45 = vpop.permute.xlu0 %1172 }
 0xb12   :  { %v1175_v47 = vmul.f32 %v1173_v45, %v1170_v44  ;;  %1283 = vrot.lane.b32.xlu1 %v6049_v43, %s5636_s4 }
 0xb14   :  { %v6054_v48 = vadd.f32 %v1176_v46, %v1175_v47 }
 0xb16   :  { %1278 = vrot.lane.b32.xlu1 %v6054_v48, %s5636_s4 }
 0xb84   :  { %v1284_v49 = vpop.permute.xlu1 %1283 }
 0xb85   :  { %1286 = vst.msk [vmem:[#allocation5 + $0x20] sm:$0xff] %vm455_vm4, %v1284_v49  ;;  %4672 = vmatmul.mubr.msk.f32.vlgmr.msra.gmra.mrb[20].mxu1 %vm455_vm4, %v1284_v49 }
 0xb86   :  { %5059 = vmatpush3.bf16.msra.mxu1 %v5878_v19  ;;  %4693 = vmatprep.mubr.msk.f32.mxu1 %vm5633_vm2, %v5634_v20 }
 0xb87   :  { %5060 = vmatprep.subr.bf16.mxu1 %v5632_v13 }
 0xb88   :  { %v1279_v50 = vpop.permute.xlu1 %1278 }
 0xb89   :  { %1281 = vst.msk [vmem:[#allocation4 + $0x18] sm:$0xff] %vm455_vm4, %v1279_v50  ;;  %4661 = vmatmul.mubr.msk.f32.vlgmr.msra.gmra.mrb[12].mxu0 %vm455_vm4, %v1279_v50 }
 0xb8a   :  { %5053 = vmatpush3.bf16.msra.mxu0 %v5850_v8  ;;  %5062 = vmatpush3.bf16.msra.mxu1 %v5888_v23 }
 0xb8b   :  { %5054 = vmatprep.subr.bf16.mxu0 %v5632_v13  ;;  %4682 = vmatprep.mubr.msk.f32.mxu0 %vm5633_vm2, %v5634_v20 }
 0xb8c   :  { %5069 = vmatprep.subr.bf16.mxu1 %v5632_v13 }
 0xb8e   :  { %5056 = vmatpush3.bf16.msra.mxu0 %v5870_v16 }
 0xb8f   :  { %5063 = vmatprep.subr.bf16.mxu0 %v5632_v13 }
 0xc58   :  { %v1454_v51 = vpop.f32.mrb[20].mxu1 }
 0xc59   :  { %v1455_v52 = vadd.f32 %v5938_v62, %v1454_v51  ;;  %v4673_v53 = vpop.f32.mrb[21].mxu1 }
 0xc5b   :  { %1467 = vrot.lane.b32.xlu0 %v1455_v52, %s5635_s20  ;;  %v1459_v58 = vadd.f32 %v1458_v57, %v1455_v52 }
 0xc5c   :  { %v1355_v54 = vpop.f32.mrb[12].mxu0 }
 0xc5d   :  { %v1356_v55 = vadd.f32 %v5926_v42, %v1355_v54  ;;  %v4662_v56 = vpop.f32.mrb[13].mxu0  ;;  %v4252_v60 = vmul.f32 -1.442695, %v1459_v58 }
 0xc5f   :  { %1368 = vrot.lane.b32.xlu0 %v1356_v55, %s5635_s20  ;;  %v1360_v61 = vadd.f32 %v1359_v59, %v1356_v55  ;;  %5293 = vpow2.f32 %v4252_v60 }
 0xc61   :  { %v4250_v63 = vmul.f32 -1.442695, %v1360_v61 }
 0xc63   :  { %5295 = vpow2.f32 %v4250_v63 }
 0xc69   :  { %v5294_v0 = vpop.eup %5293 }
 0xc6a   :  { %v1463_v1 = vadd.f32 1.0, %v5294_v0 }
 0xc6c   :  { %5297 = vrcp.f32 %v1463_v1 }
 0xc6d   :  { %v5296_v2 = vpop.eup %5295 }
 0xc6e   :  { %v1364_v3 = vadd.f32 1.0, %v5296_v2 }
 0xc70   :  { %5299 = vrcp.f32 %v1364_v3 }
 0xc76   :  { %v5298_v4 = vpop.eup %5297 }
 0xc77   :  { %v1477_v21 = vsub.f32 1.0, %v5298_v4  ;;  %v1483_v24 = vmul.f32 %v5298_v4, %v6049_v43  ;;  %v1567_v43 = vld [vmem:[#allocation2 + $0x28] sm:$0xff] }
 0xc7a   :  { %v5300_v7 = vpop.eup %5299 }
 0xc7b   :  { %v1378_v27 = vsub.f32 1.0, %v5300_v7  ;;  %v1384_v29 = vmul.f32 %v5300_v7, %v6054_v48 }
 0xccd   :  { %v1468_v5 = vpop.permute.xlu0 %1467 }
 0xcce   :  { %v1470_v6 = vmul.f32 %v5298_v4, %v1468_v5 }
 0xcd0   :  { %1472 = vrot.lane.b32.xlu1 %v1470_v6, %s5635_s20 }
 0xcd1   :  { %v1369_v9 = vpop.permute.xlu0 %1368 }
 0xcd2   :  { %v1371_v10 = vmul.f32 %v5300_v7, %v1369_v9 }
 0xcd4   :  { %1373 = vrot.lane.b32.xlu1 %v1371_v10, %s5635_s20 }
 0xd42   :  { %v1473_v11 = vpop.permute.xlu1 %1472 }
 0xd43   :  { %v1475_v12 = vadd.f32 %v1473_v11, %v1458_v57 }
 0xd45   :  { %5301 = vtanh.f32 %v1475_v12 }
 0xd46   :  { %v1374_v14 = vpop.permute.xlu1 %1373 }
 0xd47   :  { %v1376_v15 = vadd.f32 %v1374_v14, %v1359_v59 }
 0xd49   :  { %5303 = vtanh.f32 %v1376_v15 }
 0xd4f   :  { %v5302_v17 = vpop.eup %5301 }
 0xd50   :  { %1479 = vrot.lane.b32.xlu0 %v5302_v17, %s5636_s4 }
 0xd53   :  { %v5304_v18 = vpop.eup %5303 }
 0xd54   :  { %1380 = vrot.lane.b32.xlu0 %v5304_v18, %s5636_s4 }
 0xdc2   :  { %v1480_v22 = vpop.permute.xlu0 %1479 }
 0xdc3   :  { %v1482_v25 = vmul.f32 %v1480_v22, %v1477_v21  ;;  %v1775_v22 = vld [vmem:[#allocation2 + $0x30] sm:$0xff] }
 0xdc5   :  { %v6083_v26 = vadd.f32 %v1483_v24, %v1482_v25 }
 0xdc6   :  { %v1381_v28 = vpop.permute.xlu0 %1380 }
 0xdc7   :  { %v1383_v30 = vmul.f32 %v1381_v28, %v1378_v27  ;;  %1491 = vrot.lane.b32.xlu1 %v6083_v26, %s5636_s4 }
 0xdc9   :  { %v6088_v31 = vadd.f32 %v1384_v29, %v1383_v30 }
 0xdcb   :  { %1486 = vrot.lane.b32.xlu1 %v6088_v31, %s5636_s4 }
 0xe39   :  { %v1492_v32 = vpop.permute.xlu1 %1491 }
 0xe3a   :  { %1494 = vst.msk [vmem:[#allocation5 + $0x18] sm:$0xff] %vm455_vm4, %v1492_v32  ;;  %4694 = vmatmul.mubr.msk.f32.vlgmr.msra.gmra.mrb[22].mxu1 %vm455_vm4, %v1492_v32 }
 0xe3b   :  { %5071 = vmatpush3.bf16.msra.mxu1 %v5878_v19  ;;  %4715 = vmatprep.mubr.msk.f32.mxu1 %vm5633_vm2, %v5634_v20 }
 0xe3c   :  { %5072 = vmatprep.subr.bf16.mxu1 %v5632_v13 }
 0xe3d   :  { %v1487_v33 = vpop.permute.xlu1 %1486 }
 0xe3e   :  { %1489 = vst.msk [vmem:[#allocation4 + $0x20] sm:$0xff] %vm455_vm4, %v1487_v33  ;;  %4683 = vmatmul.mubr.msk.f32.vlgmr.msra.gmra.mrb[14].mxu0 %vm455_vm4, %v1487_v33 }
 0xe3f   :  { %5065 = vmatpush3.bf16.msra.mxu0 %v5850_v8  ;;  %5074 = vmatpush3.bf16.msra.mxu1 %v5888_v23 }
 0xe40   :  { %5066 = vmatprep.subr.bf16.mxu0 %v5632_v13  ;;  %4704 = vmatprep.mubr.msk.f32.mxu0 %vm5633_vm2, %v5634_v20 }
 0xe41   :  { %5081 = vmatprep.subr.bf16.mxu1 %v5632_v13 }
 0xe43   :  { %5068 = vmatpush3.bf16.msra.mxu0 %v5870_v16 }
 0xe44   :  { %5075 = vmatprep.subr.bf16.mxu0 %v5632_v13 }
 0xf0d   :  { %v1662_v34 = vpop.f32.mrb[22].mxu1 }
 0xf0e   :  { %v1663_v35 = vadd.f32 %v5938_v62, %v1662_v34  ;;  %v4695_v36 = vpop.f32.mrb[23].mxu1 }
 0xf10   :  { %1675 = vrot.lane.b32.xlu0 %v1663_v35, %s5635_s20  ;;  %v1667_v41 = vadd.f32 %v1666_v40, %v1663_v35 }
 0xf11   :  { %v1563_v37 = vpop.f32.mrb[14].mxu0 }
 0xf12   :  { %v1564_v38 = vadd.f32 %v5926_v42, %v1563_v37  ;;  %v4684_v39 = vpop.f32.mrb[15].mxu0  ;;  %v4256_v44 = vmul.f32 -1.442695, %v1667_v41 }
 0xf14   :  { %1576 = vrot.lane.b32.xlu0 %v1564_v38, %s5635_s20  ;;  %v1568_v45 = vadd.f32 %v1567_v43, %v1564_v38  ;;  %5305 = vpow2.f32 %v4256_v44 }
 0xf16   :  { %v4254_v46 = vmul.f32 -1.442695, %v1568_v45 }
 0xf18   :  { %5307 = vpow2.f32 %v4254_v46 }
 0xf1e   :  { %v5306_v47 = vpop.eup %5305 }
 0xf1f   :  { %v1671_v48 = vadd.f32 1.0, %v5306_v47 }
 0xf21   :  { %5309 = vrcp.f32 %v1671_v48 }
 0xf22   :  { %v5308_v49 = vpop.eup %5307 }
 0xf23   :  { %v1572_v50 = vadd.f32 1.0, %v5308_v49 }
 0xf25   :  { %5311 = vrcp.f32 %v1572_v50 }
 0xf2b   :  { %v5310_v51 = vpop.eup %5309 }
 0xf2c   :  { %v1685_v0 = vsub.f32 1.0, %v5310_v51  ;;  %v1691_v2 = vmul.f32 %v5310_v51, %v6083_v26 }
 0xf2f   :  { %v5312_v54 = vpop.eup %5311 }
 0xf30   :  { %v1586_v5 = vsub.f32 1.0, %v5312_v54  ;;  %v1592_v7 = vmul.f32 %v5312_v54, %v6088_v31 }
 0xf82   :  { %v1676_v52 = vpop.permute.xlu0 %1675 }
 0xf83   :  { %v1678_v53 = vmul.f32 %v5310_v51, %v1676_v52 }
 0xf85   :  { %1680 = vrot.lane.b32.xlu1 %v1678_v53, %s5635_s20 }
 0xf86   :  { %v1577_v55 = vpop.permute.xlu0 %1576 }
 0xf87   :  { %v1579_v56 = vmul.f32 %v5312_v54, %v1577_v55 }
 0xf89   :  { %1581 = vrot.lane.b32.xlu1 %v1579_v56, %s5635_s20 }
 0xff7   :  { %v1681_v57 = vpop.permute.xlu1 %1680 }
 0xff8   :  { %v1683_v58 = vadd.f32 %v1681_v57, %v1666_v40 }
 0xffa   :  { %5313 = vtanh.f32 %v1683_v58 }
 0xffb   :  { %v1582_v59 = vpop.permute.xlu1 %1581 }
 0xffc   :  { %v1584_v60 = vadd.f32 %v1582_v59, %v1567_v43 }
 0xffe   :  { %5315 = vtanh.f32 %v1584_v60 }
0x1004   :  { %v5314_v61 = vpop.eup %5313 }
0x1005   :  { %1687 = vrot.lane.b32.xlu0 %v5314_v61, %s5636_s4  ;;  %v2082_v61 = vld [vmem:[#allocation3] sm:$0xff] }
0x1008   :  { %v5316_v63 = vpop.eup %5315 }
0x1009   :  { %1588 = vrot.lane.b32.xlu0 %v5316_v63, %s5636_s4 }
0x1077   :  { %v1688_v1 = vpop.permute.xlu0 %1687 }
0x1078   :  { %v1690_v3 = vmul.f32 %v1688_v1, %v1685_v0  ;;  %v1983_v0 = vld [vmem:[#allocation2 + $0x38] sm:$0xff] }
0x107a   :  { %v6117_v4 = vadd.f32 %v1691_v2, %v1690_v3 }
0x107b   :  { %v1589_v6 = vpop.permute.xlu0 %1588 }
0x107c   :  { %v1591_v9 = vmul.f32 %v1589_v6, %v1586_v5  ;;  %1699 = vrot.lane.b32.xlu1 %v6117_v4, %s5636_s4 }
0x107e   :  { %v6122_v10 = vadd.f32 %v1592_v7, %v1591_v9 }
0x1080   :  { %1694 = vrot.lane.b32.xlu1 %v6122_v10, %s5636_s4 }
0x10ee   :  { %v1700_v11 = vpop.permute.xlu1 %1699 }
0x10ef   :  { %1702 = vst.msk [vmem:[#allocation5 + $0x10] sm:$0xff] %vm455_vm4, %v1700_v11  ;;  %4716 = vmatmul.mubr.msk.f32.vlgmr.msra.gmra.mrb[24].mxu1 %vm455_vm4, %v1700_v11 }
0x10f0   :  { %5083 = vmatpush3.bf16.msra.mxu1 %v5878_v19  ;;  %4737 = vmatprep.mubr.msk.f32.mxu1 %vm5633_vm2, %v5634_v20 }
0x10f1   :  { %5084 = vmatprep.subr.bf16.mxu1 %v5632_v13 }
0x10f2   :  { %v1695_v12 = vpop.permute.xlu1 %1694 }
0x10f3   :  { %1697 = vst.msk [vmem:[#allocation4 + $0x28] sm:$0xff] %vm455_vm4, %v1695_v12  ;;  %4705 = vmatmul.mubr.msk.f32.vlgmr.msra.gmra.mrb[16].mxu0 %vm455_vm4, %v1695_v12 }
0x10f4   :  { %5077 = vmatpush3.bf16.msra.mxu0 %v5850_v8  ;;  %5086 = vmatpush3.bf16.msra.mxu1 %v5888_v23  ;;  %v1874_v8 = vld [vmem:[#allocation3 + $0x8] sm:$0xff] }
0x10f5   :  { %5078 = vmatprep.subr.bf16.mxu0 %v5632_v13  ;;  %4726 = vmatprep.mubr.msk.f32.mxu0 %vm5633_vm2, %v5634_v20 }
0x10f8   :  { %5080 = vmatpush3.bf16.msra.mxu0 %v5870_v16 }
0x11c2   :  { %v1870_v19 = vpop.f32.mrb[24].mxu1 }
0x11c3   :  { %v1871_v14 = vadd.f32 %v5938_v62, %v1870_v19  ;;  %v4717_v15 = vpop.f32.mrb[25].mxu1 }
0x11c5   :  { %1883 = vrot.lane.b32.xlu0 %v1871_v14, %s5635_s20  ;;  %v1875_v23 = vadd.f32 %v1874_v8, %v1871_v14 }
0x11c6   :  { %v1771_v17 = vpop.f32.mrb[16].mxu0 }
0x11c7   :  { %v1772_v18 = vadd.f32 %v5926_v42, %v1771_v17  ;;  %v4706_v21 = vpop.f32.mrb[17].mxu0  ;;  %v4260_v24 = vmul.f32 -1.442695, %v1875_v23 }
0x11c9   :  { %1784 = vrot.lane.b32.xlu0 %v1772_v18, %s5635_s20  ;;  %v1776_v25 = vadd.f32 %v1775_v22, %v1772_v18  ;;  %5317 = vpow2.f32 %v4260_v24 }
0x11cb   :  { %v4258_v26 = vmul.f32 -1.442695, %v1776_v25 }
0x11cd   :  { %5319 = vpow2.f32 %v4258_v26 }
0x11d3   :  { %v5318_v16 = vpop.eup %5317 }
0x11d4   :  { %v1879_v27 = vadd.f32 1.0, %v5318_v16 }
0x11d6   :  { %5321 = vrcp.f32 %v1879_v27 }
0x11d7   :  { %v5320_v28 = vpop.eup %5319 }
0x11d8   :  { %v1780_v29 = vadd.f32 1.0, %v5320_v28 }
0x11da   :  { %5323 = vrcp.f32 %v1780_v29 }
0x11e0   :  { %v5322_v30 = vpop.eup %5321 }
0x11e1   :  { %v1893_v43 = vsub.f32 1.0, %v5322_v30  ;;  %v1899_v45 = vmul.f32 %v5322_v30, %v6117_v4 }
0x11e4   :  { %v5324_v33 = vpop.eup %5323 }
0x11e5   :  { %v1794_v48 = vsub.f32 1.0, %v5324_v33  ;;  %v1800_v50 = vmul.f32 %v5324_v33, %v6122_v10 }
0x1237   :  { %v1884_v31 = vpop.permute.xlu0 %1883 }
0x1238   :  { %v1886_v32 = vmul.f32 %v5322_v30, %v1884_v31  ;;  %v2131_v31 = vld [vmem:[#allocation5 + $0x20] sm:$0xff] }
0x123a   :  { %1888 = vrot.lane.b32.xlu1 %v1886_v32, %s5635_s20  ;;  %v2133_v32 = vld [vmem:[#allocation5 + $0x30] sm:$0xff] }
0x123b   :  { %v1785_v34 = vpop.permute.xlu0 %1784 }
0x123c   :  { %v1787_v35 = vmul.f32 %v5324_v33, %v1785_v34  ;;  %v2175_v33 = vld [vmem:[%s6575_s9] sm:$0xff]  ;;  %v2176_v34 = vld [vmem:[%s6575_s9 + $0x8] sm:$0xff] }
0x123e   :  { %1789 = vrot.lane.b32.xlu1 %v1787_v35, %s5635_s20  ;;  %v2189_v35 = vld [vmem:[%s6579_s13] sm:$0xff] }
0x12ac   :  { %v1889_v36 = vpop.permute.xlu1 %1888 }
0x12ad   :  { %v1891_v37 = vadd.f32 %v1889_v36, %v1874_v8  ;;  %v5087_v36 = vpack.c.bf16 %v2176_v34, %v2175_v33 }
0x12af   :  { %5325 = vtanh.f32 %v1891_v37  ;;  %v2190_v37 = vld [vmem:[%s6579_s13 + $0x8] sm:$0xff]  ;;  %5088 = vmatprep.subr.bf16.mxu0 %v5087_v36 }
0x12b0   :  { %v1790_v38 = vpop.permute.xlu1 %1789 }
0x12b1   :  { %v1792_v39 = vadd.f32 %v1790_v38, %v1775_v22  ;;  %v2177_v38 = vld [vmem:[%s6575_s9 + $0x10] sm:$0xff] }
0x12b3   :  { %5327 = vtanh.f32 %v1792_v39  ;;  %v2178_v39 = vld [vmem:[%s6575_s9 + $0x18] sm:$0xff] }
0x12b9   :  { %v5326_v40 = vpop.eup %5325 }
0x12ba   :  { %1895 = vrot.lane.b32.xlu0 %v5326_v40, %s5636_s4  ;;  %v5103_v40 = vpack.c.bf16 %v2190_v37, %v2189_v35 }
0x12bc   :  { %5104 = vmatprep.subr.bf16.mxu1 %v5103_v40 }
0x12bd   :  { %v5328_v41 = vpop.eup %5327 }
0x12be   :  { %1796 = vrot.lane.b32.xlu0 %v5328_v41, %s5636_s4  ;;  %v5091_v41 = vpack.c.bf16 %v2178_v39, %v2177_v38  ;;  %v4265_v38 = vld [vmem:[%s6577_s11] ss:$0 sm:$0xff] }
0x12bf   :  { %v4274_v39 = vld [vmem:[%s6581_s15] ss:$0 sm:$0xff] }
0x132c   :  { %v1896_v44 = vpop.permute.xlu0 %1895 }
0x132d   :  { %v1898_v46 = vmul.f32 %v1896_v44, %v1893_v43  ;;  %v2191_v43 = vld [vmem:[%s6579_s13 + $0x10] sm:$0xff]  ;;  %v2192_v44 = vld [vmem:[%s6579_s13 + $0x18] sm:$0xff] }
0x132f   :  { %v1900_v47 = vadd.f32 %v1899_v45, %v1898_v46  ;;  %v2179_v45 = vld [vmem:[%s6575_s9 + $0x20] sm:$0xff]  ;;  %v5107_v46 = vpack.c.bf16 %v2192_v44, %v2191_v43 }
0x1330   :  { %v1797_v49 = vpop.permute.xlu0 %1796 }
0x1331   :  { %v1799_v51 = vmul.f32 %v1797_v49, %v1794_v48  ;;  %1907 = vrot.lane.b32.xlu1 %v1900_v47, %s5636_s4  ;;  %v2193_v48 = vld [vmem:[%s6579_s13 + $0x20] sm:$0xff]  ;;  %v2194_v49 = vld [vmem:[%s6579_s13 + $0x28] sm:$0xff] }
0x1333   :  { %v1801_v52 = vadd.f32 %v1800_v50, %v1799_v51  ;;  %v5111_v51 = vpack.c.bf16 %v2194_v49, %v2193_v48 }
0x1335   :  { %1902 = vrot.lane.b32.xlu1 %v1801_v52, %s5636_s4 }
0x13a3   :  { %v1908_v53 = vpop.permute.xlu1 %1907 }
0x13a4   :  { %1910 = vst.msk [vmem:[#allocation5 + $0x8] sm:$0xff] %vm455_vm4, %v1908_v53  ;;  %4738 = vmatmul.mubr.msk.f32.vlgmr.msra.gmra.mrb[26].mxu1 %vm455_vm4, %v1908_v53  ;;  %v2182_v53 = vld [vmem:[%s6575_s9 + $0x38] sm:$0xff] }
0x13a5   :  { %5106 = vmatpush3.bf16.msra.mxu1 %v5103_v40 }
0x13a6   :  { %5108 = vmatprep.subr.bf16.mxu1 %v5107_v46 }
0x13a7   :  { %v1903_v54 = vpop.permute.xlu1 %1902 }
0x13a8   :  { %1905 = vst.msk [vmem:[#allocation4 + $0x30] sm:$0xff] %vm455_vm4, %v1903_v54  ;;  %4727 = vmatmul.mubr.msk.f32.vlgmr.msra.gmra.mrb[18].mxu0 %vm455_vm4, %v1903_v54  ;;  %v2195_v54 = vld [vmem:[%s6579_s13 + $0x30] sm:$0xff] }
0x13a9   :  { %5090 = vmatpush3.bf16.msra.mxu0 %v5087_v36  ;;  %5110 = vmatpush3.bf16.msra.mxu1 %v5107_v46 }
0x13aa   :  { %5092 = vmatprep.subr.bf16.mxu0 %v5091_v41  ;;  %5112 = vmatprep.subr.bf16.mxu1 %v5111_v51 }
0x13ab   :  { %v2128_v8 = vld [vmem:[#allocation5 + $0x8] sm:$0xff] }
0x13ad   :  { %5094 = vmatpush3.bf16.msra.mxu0 %v5091_v41  ;;  %5114 = vmatpush3.bf16.msra.mxu1 %v5111_v51 }
0x1477   :  { %v2078_v55 = vpop.f32.mrb[26].mxu1 }
0x1478   :  { %v2079_v56 = vadd.f32 %v5938_v62, %v2078_v55  ;;  %v4739_v57 = vpop.f32.mrb[27].mxu1  ;;  %v2196_v55 = vld [vmem:[%s6579_s13 + $0x38] sm:$0xff] }
0x1479   :  { %v5115_v57 = vpack.c.bf16 %v2196_v55, %v2195_v54 }
0x147a   :  { %2091 = vrot.lane.b32.xlu0 %v2079_v56, %s5635_s20  ;;  %v2083_v63 = vadd.f32 %v2082_v61, %v2079_v56 }
0x147b   :  { %v1979_v58 = vpop.f32.mrb[18].mxu0  ;;  %5116 = vmatprep.subr.bf16.mxu1 %v5115_v57 }
0x147c   :  { %v1980_v59 = vadd.f32 %v5926_v42, %v1979_v58  ;;  %v4728_v60 = vpop.f32.mrb[19].mxu0  ;;  %v4264_v1 = vmul.f32 -1.442695, %v2083_v63  ;;  %5118 = vmatpush3.bf16.msra.mxu1 %v5115_v57  ;;  %v2129_v63 = vld [vmem:[#allocation5 + $0x10] sm:$0xff] }
0x147d   :  { %5125 = vmatprep.subr.bf16.mxu1 %v5632_v13 }
0x147e   :  { %1992 = vrot.lane.b32.xlu0 %v1980_v59, %s5635_s20  ;;  %v1984_v2 = vadd.f32 %v1983_v0, %v1980_v59  ;;  %5329 = vpow2.f32 %v4264_v1  ;;  %v2132_v1 = vld [vmem:[#allocation5 + $0x28] sm:$0xff] }
0x1480   :  { %v4262_v3 = vmul.f32 -1.442695, %v1984_v2  ;;  %v2134_v2 = vld [vmem:[#allocation5 + $0x38] sm:$0xff] }
0x1482   :  { %5331 = vpow2.f32 %v4262_v3  ;;  %v2183_v3 = vld [vmem:[%s6576_s10] sm:$0xff] }
0x1488   :  { %v5330_v4 = vpop.eup %5329 }
0x1489   :  { %v2087_v5 = vadd.f32 1.0, %v5330_v4  ;;  %v2184_v4 = vld [vmem:[%s6576_s10 + $0x8] sm:$0xff] }
0x148b   :  { %5333 = vrcp.f32 %v2087_v5  ;;  %v2197_v5 = vld [vmem:[#allocation17] sm:$0xff] }
0x148c   :  { %v5332_v62 = vpop.eup %5331 }
0x148d   :  { %v1988_v6 = vadd.f32 1.0, %v5332_v62  ;;  %v2198_v62 = vld [vmem:[#allocation17 + $0x8] sm:$0xff] }
0x148f   :  { %5335 = vrcp.f32 %v1988_v6  ;;  %v2120_v6 = vld [vmem:[#allocation4 + $0x8] sm:$0xff] }
0x1495   :  { %v5334_v7 = vpop.eup %5333 }
0x1496   :  { %v2101_v23 = vsub.f32 1.0, %v5334_v7  ;;  %v2107_v24 = vmul.f32 %v5334_v7, %v1900_v47  ;;  %v2180_v47 = vld [vmem:[%s6575_s9 + $0x28] sm:$0xff] }
0x1497   :  { %v5095_v50 = vpack.c.bf16 %v2180_v47, %v2179_v45 }
0x1499   :  { %v5336_v10 = vpop.eup %5335  ;;  %5096 = vmatprep.subr.bf16.mxu0 %v5095_v50 }
0x149a   :  { %v2002_v16 = vsub.f32 1.0, %v5336_v10  ;;  %v2008_v28 = vmul.f32 %v5336_v10, %v1801_v52  ;;  %v2181_v52 = vld [vmem:[%s6575_s9 + $0x30] sm:$0xff]  ;;  %5098 = vmatpush3.bf16.msra.mxu0 %v5095_v50 }
0x149b   :  { %v5099_v56 = vpack.c.bf16 %v2182_v53, %v2181_v52 }
0x149d   :  { %5100 = vmatprep.subr.bf16.mxu0 %v5099_v56 }
0x149e   :  { %5102 = vmatpush3.bf16.msra.mxu0 %v5099_v56 }
0x149f   :  { %5119 = vmatprep.subr.bf16.mxu0 %v5632_v13 }
0x14ec   :  { %v2092_v9 = vpop.permute.xlu0 %2091 }
0x14ed   :  { %v2094_v42 = vmul.f32 %v5334_v7, %v2092_v9  ;;  %v2119_v7 = vld [vmem:[#allocation4] sm:$0xff] }
0x14ef   :  { %2096 = vrot.lane.b32.xlu1 %v2094_v42, %s5635_s20  ;;  %v6232_v42 = vpack.c.bf16 %v2184_v4, %v2183_v3 }
0x14f0   :  { %v1993_v11 = vpop.permute.xlu0 %1992 }
0x14f1   :  { %v1995_v12 = vmul.f32 %v5336_v10, %v1993_v11  ;;  %v2185_v10 = vld [vmem:[%s6576_s10 + $0x10] sm:$0xff]  ;;  %v6237_v11 = vpack.c.bf16 %v2198_v62, %v2197_v5 }
0x14f3   :  { %1997 = vrot.lane.b32.xlu1 %v1995_v12, %s5635_s20 }
0x1561   :  { %v2097_v19 = vpop.permute.xlu1 %2096 }
0x1562   :  { %v2099_v14 = vadd.f32 %v2097_v19, %v2082_v61  ;;  %v2186_v19 = vld [vmem:[%s6576_s10 + $0x18] sm:$0xff] }
0x1564   :  { %5337 = vtanh.f32 %v2099_v14  ;;  %v2199_v14 = vld [vmem:[#allocation17 + $0x10] sm:$0xff] }
0x1565   :  { %v1998_v15 = vpop.permute.xlu1 %1997 }
0x1566   :  { %v2000_v17 = vadd.f32 %v1998_v15, %v1983_v0  ;;  %v2130_v0 = vld [vmem:[#allocation5 + $0x18] sm:$0xff]  ;;  %v2200_v15 = vld [vmem:[#allocation17 + $0x18] sm:$0xff] }
0x1568   :  { %5339 = vtanh.f32 %v2000_v17 }
0x156e   :  { %v5338_v18 = vpop.eup %5337 }
0x156f   :  { %2103 = vrot.lane.b32.xlu0 %v5338_v18, %s5636_s4  ;;  %v2121_v18 = vld [vmem:[#allocation4 + $0x10] sm:$0xff] }
0x1572   :  { %v5340_v21 = vpop.eup %5339 }
0x1573   :  { %2004 = vrot.lane.b32.xlu0 %v5340_v21, %s5636_s4 }
0x1577   :  { %2145 = vrot.lane.b32.xlu0 %v2128_v8, %s5637_s3  ;;  %v6249_v8 = vpack.c.bf16 %v2186_v19, %v2185_v10  ;;  %v6317_v10 = vld [vmem:[%s6578_s12] ss:$0 sm:$0xff] }
0x15e1   :  { %v2104_v22 = vpop.permute.xlu0 %2103 }
0x15e2   :  { %v2106_v25 = vmul.f32 %v2104_v22, %v2101_v23  ;;  %v6252_v23 = vpack.c.bf16 %v2200_v15, %v2199_v14 }
0x15e4   :  { %v2108_v26 = vadd.f32 %v2107_v24, %v2106_v25  ;;  %v2122_v25 = vld [vmem:[#allocation4 + $0x18] sm:$0xff] }
0x15e5   :  { %v2005_v27 = vpop.permute.xlu0 %2004 }
0x15e6   :  { %v2007_v29 = vmul.f32 %v2005_v27, %v2002_v16  ;;  %2115 = vrot.lane.b32.xlu1 %v2108_v26, %s5636_s4  ;;  %v2123_v16 = vld [vmem:[#allocation4 + $0x20] sm:$0xff] }
0x15e8   :  { %v2009_v30 = vadd.f32 %v2008_v28, %v2007_v29 }
0x15e9   :  { %v2146_v58 = vpop.permute.xlu0 %2145 }
0x15ea   :  { %2110 = vrot.lane.b32.xlu0 %v2009_v30, %s5636_s4  ;;  %v2168_v17 = vsel %vm455_vm4, %v2120_v6, %v2146_v58  ;;  %v2124_v30 = vld [vmem:[#allocation4 + $0x28] sm:$0xff] }
0x15ee   :  { %2151 = vrot.lane.b32.xlu0 %v2131_v31, %s5637_s3 }
0x15f2   :  { %2155 = vrot.lane.b32.xlu0 %v2133_v32, %s5637_s3  ;;  %v2125_v32 = vld [vmem:[#allocation4 + $0x30] sm:$0xff] }
0x1658   :  { %v2116_v59 = vpop.permute.xlu1 %2115 }
0x1659   :  { %2118 = vst.msk [vmem:[#allocation5] sm:$0xff] %vm455_vm4, %v2116_v59 }
0x165c   :  { %v2111_v60 = vpop.permute.xlu0 %2110 }
0x165d   :  { %2113 = vst.msk [vmem:[#allocation4 + $0x38] sm:$0xff] %vm455_vm4, %v2111_v60 }
0x1660   :  { %v2127_v61 = vld [vmem:[#allocation5] sm:$0xff]  ;;  %v2152_v22 = vpop.permute.xlu0 %2151 }
0x1661   :  { %2143 = vrot.lane.b32.xlu1 %v2127_v61, %s5637_s3  ;;  %v2171_v28 = vsel %vm455_vm4, %v2123_v16, %v2152_v22 }
0x1664   :  { %v2156_v29 = vpop.permute.xlu0 %2155  ;;  %v2126_v35 = vld [vmem:[#allocation4 + $0x38] sm:$0xff] }
0x1665   :  { %2147 = vrot.lane.b32.xlu1 %v2129_v63, %s5637_s3  ;;  %v2173_v34 = vsel %vm455_vm4, %v2125_v32, %v2156_v29 }
0x1669   :  { %2149 = vrot.lane.b32.xlu1 %v2130_v0, %s5637_s3 }
0x166d   :  { %2153 = vrot.lane.b32.xlu1 %v2132_v1, %s5637_s3 }
0x1671   :  { %2157 = vrot.lane.b32.xlu1 %v2134_v2, %s5637_s3  ;;  %s4201_s3 = sshll.u32 %s5638_s22, 4  ;;  %s4202_s3 = int_to_ptr.vmem [resolvable:$true] %s4201_s3 }
0x1672   :  { %p5596_p1 = scmp.lt.s32.totalorder %s4202_s3, %s4202_s3 }
0x16d3   :  { %v2144_v9 = vpop.permute.xlu1 %2143 }
0x16d4   :  { %v2167_v12 = vsel %vm455_vm4, %v2119_v7, %v2144_v9 }
0x16d5   :  { %4756 = vmatprep.mubr.msk.f32.mxu0 %vm2209_vm5, %v2167_v12  ;;  %4784 = vmatprep.mubr.msk.f32.mxu1 %vm2209_vm5, %v2167_v12  ;;  %v6322_v12 = vld [vmem:[%s6582_s16] ss:$0 sm:$0xff] }
0x16d6   :  { %4757 = vmatmul.mubr.msk.f32.vlgmr.msra.gmra.mrb[20].mxu0 %vm2209_vm5, %v2168_v17  ;;  %4785 = vmatmul.mubr.msk.f32.vlgmr.msra.gmra.mrb[28].mxu1 %vm2209_vm5, %v2168_v17 }
0x16d7   :  { %v2148_v21 = vpop.permute.xlu1 %2147  ;;  %5121 = vmatpush3.bf16.msra.mxu0 %v6232_v42  ;;  %5127 = vmatpush3.bf16.msra.mxu1 %v6237_v11 }
0x16d8   :  { %v2169_v24 = vsel %vm455_vm4, %v2121_v18, %v2148_v21  ;;  %5122 = vmatprep.subr.bf16.mxu0 %v5632_v13  ;;  %5128 = vmatprep.subr.bf16.mxu1 %v5632_v13 }
0x16d9   :  { %4759 = vmatprep.mubr.msk.f32.mxu0 %vm2209_vm5, %v2169_v24  ;;  %4787 = vmatprep.mubr.msk.f32.mxu1 %vm2209_vm5, %v2169_v24 }
0x16db   :  { %v2150_v26 = vpop.permute.xlu1 %2149  ;;  %5124 = vmatpush3.bf16.msra.mxu0 %v6249_v8  ;;  %5130 = vmatpush3.bf16.msra.mxu1 %v6252_v23 }
0x16dc   :  { %v2170_v27 = vsel %vm455_vm4, %v2122_v25, %v2150_v26  ;;  %5131 = vmatprep.subr.bf16.mxu0 %v5632_v13  ;;  %5137 = vmatprep.subr.bf16.mxu1 %v5632_v13 }
0x16dd   :  { %4760 = vmatmul.mubr.msk.f32.gmra.mrb[22].mxu0 %vm2209_vm5, %v2170_v27  ;;  %4788 = vmatmul.mubr.msk.f32.gmra.mrb[30].mxu1 %vm2209_vm5, %v2170_v27 }
0x16de   :  { %4762 = vmatprep.mubr.msk.f32.mxu0 %vm2209_vm5, %v2171_v28  ;;  %4790 = vmatprep.mubr.msk.f32.mxu1 %vm2209_vm5, %v2171_v28 }
0x16df   :  { %v2154_v31 = vpop.permute.xlu1 %2153 }
0x16e0   :  { %v2172_v33 = vsel %vm455_vm4, %v2124_v30, %v2154_v31 }
0x16e1   :  { %4763 = vmatmul.mubr.msk.f32.gmra.mrb[24].mxu0 %vm2209_vm5, %v2172_v33  ;;  %4791 = vmatmul.mubr.msk.f32.gmra.mrb[32].mxu1 %vm2209_vm5, %v2172_v33 }
0x16e2   :  { %4765 = vmatprep.mubr.msk.f32.mxu0 %vm2209_vm5, %v2173_v34  ;;  %4793 = vmatprep.mubr.msk.f32.mxu1 %vm2209_vm5, %v2173_v34 }
0x16e3   :  { %v2158_v36 = vpop.permute.xlu1 %2157 }
0x16e4   :  { %v2174_v37 = vsel %vm455_vm4, %v2126_v35, %v2158_v36 }
0x16e5   :  { %4766 = vmatmul.mubr.msk.f32.gmra.mrb[26].mxu0 %vm2209_vm5, %v2174_v37  ;;  %4794 = vmatmul.mubr.msk.f32.gmra.mrb[34].mxu1 %vm2209_vm5, %v2174_v37 }
0x16e6   :  { %4804 = vmatprep.mubr.msk.f32.mxu0 %vm5633_vm2, %v5634_v20  ;;  %4815 = vmatprep.mubr.msk.f32.mxu1 %vm5633_vm2, %v5634_v20 }
0x16e9   :  { %4805 = vmatmul.mubr.f32.vlgmr.msra.gmra.mrb[28].mxu0 %v5634_v20  ;;  %4816 = vmatmul.mubr.f32.vlgmr.msra.gmra.mrb[36].mxu1 %v5634_v20 }
0x16ea   :  { %5133 = vmatpush3.bf16.msra.mxu0 %v6232_v42  ;;  %5139 = vmatpush3.bf16.msra.mxu1 %v6237_v11 }
0x16eb   :  { %5134 = vmatprep.subr.bf16.mxu0 %v5632_v13  ;;  %5140 = vmatprep.subr.bf16.mxu1 %v5632_v13 }
0x16ec   :  { %4837 = vmatprep.mubr.msk.f32.mxu1 %vm5633_vm2, %v5634_v20  ;;  %4826 = vmatprep.mubr.msk.f32.mxu0 %vm5633_vm2, %v5634_v20 }
0x16ee   :  { %5136 = vmatpush3.bf16.msra.mxu0 %v6249_v8  ;;  %5142 = vmatpush3.bf16.msra.mxu1 %v6252_v23 }
0x16ef   :  { %5143 = vmatprep.subr.bf16.mxu0 %v5632_v13  ;;  %5149 = vmatprep.subr.bf16.mxu1 %v5632_v13 }
0x17a9   :  { %v4758_v40 = vpop.f32.mrb[20].mxu0  ;;  %v4786_v41 = vpop.f32.mrb[28].mxu1 }
0x17aa   :  { %v2306_v43 = vadd.f32 %v4758_v40, %v4265_v38  ;;  %v2425_v44 = vadd.f32 %v4786_v41, %v4274_v39  ;;  %v2300_v45 = vpop.f32.mrb[21].mxu0  ;;  %v2419_v46 = vpop.f32.mrb[29].mxu1 }
0x17ab   :  { %v2301_v47 = vadd.f32 %v4265_v38, %v2300_v45  ;;  %v2420_v48 = vadd.f32 %v4274_v39, %v2419_v46 }
0x17ac   :  { %2340 = vst.msk [vmem:[#allocation2 + $0x8] sm:$0xff] %vm312_vm3, %v2306_v43  ;;  %2459 = vst.msk [vmem:[#allocation3 + $0x8] sm:$0xff] %vm312_vm3, %v2425_v44 }
0x17ad   :  { %2339 = vst.msk [vmem:[#allocation2] sm:$0xff] %vm312_vm3, %v2301_v47  ;;  %2458 = vst.msk [vmem:[#allocation3] sm:$0xff] %vm312_vm3, %v2420_v48 }
0x17b0   :  { %v4761_v49 = vpop.f32.mrb[22].mxu0  ;;  %v4789_v50 = vpop.f32.mrb[30].mxu1 }
0x17b1   :  { %v2316_v51 = vadd.f32 %v4761_v49, %v4265_v38  ;;  %v2435_v52 = vadd.f32 %v4789_v50, %v4274_v39  ;;  %v2310_v53 = vpop.f32.mrb[23].mxu0  ;;  %v2429_v54 = vpop.f32.mrb[31].mxu1 }
0x17b2   :  { %v2311_v55 = vadd.f32 %v4265_v38, %v2310_v53  ;;  %v2430_v56 = vadd.f32 %v4274_v39, %v2429_v54 }
0x17b3   :  { %2342 = vst.msk [vmem:[#allocation2 + $0x18] sm:$0xff] %vm312_vm3, %v2316_v51  ;;  %2461 = vst.msk [vmem:[#allocation3 + $0x18] sm:$0xff] %vm312_vm3, %v2435_v52 }
0x17b4   :  { %2341 = vst.msk [vmem:[#allocation2 + $0x10] sm:$0xff] %vm312_vm3, %v2311_v55  ;;  %2460 = vst.msk [vmem:[#allocation3 + $0x10] sm:$0xff] %vm312_vm3, %v2430_v56  ;;  %v4764_v57 = vpop.f32.mrb[24].mxu0  ;;  %v4792_v58 = vpop.f32.mrb[32].mxu1  ;;  %v2548_v24 = vld [vmem:[#allocation2] sm:$0xff] }
0x17b5   :  { %v2326_v59 = vadd.f32 %v4764_v57, %v4265_v38  ;;  %v2445_v60 = vadd.f32 %v4792_v58, %v4274_v39  ;;  %v2320_v61 = vpop.f32.mrb[25].mxu0  ;;  %v2439_v63 = vpop.f32.mrb[33].mxu1 }
0x17b6   :  { %v2321_v0 = vadd.f32 %v4265_v38, %v2320_v61  ;;  %v2440_v1 = vadd.f32 %v4274_v39, %v2439_v63 }
0x17b7   :  { %2344 = vst.msk [vmem:[#allocation2 + $0x28] sm:$0xff] %vm312_vm3, %v2326_v59  ;;  %2463 = vst.msk [vmem:[#allocation3 + $0x28] sm:$0xff] %vm312_vm3, %v2445_v60 }
0x17b8   :  { %2343 = vst.msk [vmem:[#allocation2 + $0x20] sm:$0xff] %vm312_vm3, %v2321_v0  ;;  %2462 = vst.msk [vmem:[#allocation3 + $0x20] sm:$0xff] %vm312_vm3, %v2440_v1  ;;  %v4767_v2 = vpop.f32.mrb[26].mxu0  ;;  %v4795_v3 = vpop.f32.mrb[34].mxu1  ;;  %v2747_v1 = vld [vmem:[#allocation2 + $0x8] sm:$0xff] }
0x17b9   :  { %v2336_v4 = vadd.f32 %v4767_v2, %v4265_v38  ;;  %v2455_v5 = vadd.f32 %v4795_v3, %v4274_v39  ;;  %v2330_v62 = vpop.f32.mrb[27].mxu0  ;;  %v2449_v6 = vpop.f32.mrb[35].mxu1 }
0x17ba   :  { %v2331_v7 = vadd.f32 %v4265_v38, %v2330_v62  ;;  %v2450_v9 = vadd.f32 %v4274_v39, %v2449_v6 }
0x17bb   :  { %2346 = vst.msk [vmem:[#allocation2 + $0x38] sm:$0xff] %vm312_vm3, %v2336_v4  ;;  %2465 = vst.msk [vmem:[#allocation3 + $0x38] sm:$0xff] %vm312_vm3, %v2455_v5 }
0x17bc   :  { %2345 = vst.msk [vmem:[#allocation2 + $0x30] sm:$0xff] %vm312_vm3, %v2331_v7  ;;  %2464 = vst.msk [vmem:[#allocation3 + $0x30] sm:$0xff] %vm312_vm3, %v2450_v9  ;;  %v2544_v19 = vpop.f32.mrb[28].mxu0  ;;  %v2641_v14 = vpop.f32.mrb[36].mxu1 }
0x17bd   :  { %v2545_v15 = vadd.f32 %v6317_v10, %v2544_v19  ;;  %v2642_v17 = vadd.f32 %v6322_v12, %v2641_v14  ;;  %v4806_v18 = vpop.f32.mrb[29].mxu0  ;;  %v4817_v21 = vpop.f32.mrb[37].mxu1 }
0x17bf   :  { %2654 = vrot.lane.b32.xlu1 %v2642_v17, %s5635_s20  ;;  %2557 = vrot.lane.b32.xlu0 %v2545_v15, %s5635_s20  ;;  %v2549_v25 = vadd.f32 %v2548_v24, %v2545_v15 }
0x17c1   :  { %v4285_v16 = vmul.f32 -1.442695, %v2549_v25 }
0x17c2   :  { %v2645_v22 = vld [vmem:[#allocation3 + $0x38] sm:$0xff] }
0x17c3   :  { %v2646_v26 = vadd.f32 %v2645_v22, %v2642_v17  ;;  %5341 = vpow2.f32 %v4285_v16  ;;  %v2849_v0 = vld [vmem:[#allocation3 + $0x30] sm:$0xff] }
0x17c5   :  { %v4286_v27 = vmul.f32 -1.442695, %v2646_v26 }
0x17c7   :  { %5343 = vpow2.f32 %v4286_v27 }
0x17cd   :  { %v5342_v28 = vpop.eup %5341 }
0x17ce   :  { %v2553_v30 = vadd.f32 1.0, %v5342_v28 }
0x17d0   :  { %5345 = vrcp.f32 %v2553_v30 }
0x17d1   :  { %v5344_v29 = vpop.eup %5343 }
0x17d2   :  { %v2650_v31 = vadd.f32 1.0, %v5344_v29 }
0x17d4   :  { %5347 = vrcp.f32 %v2650_v31 }
0x17da   :  { %v5346_v32 = vpop.eup %5345 }
0x17db   :  { %v2567_v47 = vsub.f32 1.0, %v5346_v32  ;;  %v2573_v51 = vmul.f32 0.0, %v5346_v32 }
0x17de   :  { %v5348_v33 = vpop.eup %5347 }
0x17df   :  { %v2664_v45 = vsub.f32 1.0, %v5348_v33  ;;  %v2670_v48 = vmul.f32 0.0, %v5348_v33 }
0x1831   :  { %v2655_v34 = vpop.permute.xlu1 %2654  ;;  %v2558_v35 = vpop.permute.xlu0 %2557 }
0x1832   :  { %v2657_v36 = vmul.f32 %v5348_v33, %v2655_v34  ;;  %v2560_v37 = vmul.f32 %v5346_v32, %v2558_v35 }
0x1834   :  { %2659 = vrot.lane.b32.xlu1 %v2657_v36, %s5635_s20  ;;  %2562 = vrot.lane.b32.xlu0 %v2560_v37, %s5635_s20 }
0x18a6   :  { %v2660_v38 = vpop.permute.xlu1 %2659  ;;  %v2563_v39 = vpop.permute.xlu0 %2562 }
0x18a7   :  { %v2662_v40 = vadd.f32 %v2660_v38, %v2645_v22  ;;  %v2565_v41 = vadd.f32 %v2563_v39, %v2548_v24 }
0x18a9   :  { %5349 = vtanh.f32 %v2662_v40 }
0x18aa   :  { %5351 = vtanh.f32 %v2565_v41 }
0x18b3   :  { %v5350_v43 = vpop.eup %5349 }
0x18b4   :  { %v5352_v44 = vpop.eup %5351  ;;  %2666 = vrot.lane.b32.xlu1 %v5350_v43, %s5636_s4 }
0x18b5   :  { %2569 = vrot.lane.b32.xlu0 %v5352_v44, %s5636_s4 }
0x1926   :  { %v2667_v46 = vpop.permute.xlu1 %2666 }
0x1927   :  { %v2669_v49 = vmul.f32 %v2667_v46, %v2664_v45  ;;  %v2570_v50 = vpop.permute.xlu0 %2569 }
0x1928   :  { %v2572_v52 = vmul.f32 %v2570_v50, %v2567_v47  ;;  %v3053_v47 = vld [vmem:[#allocation3 + $0x28] sm:$0xff] }
0x1929   :  { %v2671_v53 = vadd.f32 %v2670_v48, %v2669_v49  ;;  %v2951_v48 = vld [vmem:[#allocation2 + $0x10] sm:$0xff] }
0x192a   :  { %v6336_v54 = vadd.f32 %v2573_v51, %v2572_v52 }
0x192b   :  { %2775 = vrot.lane.b32.xlu1 %v2671_v53, %s5636_s4 }
0x192c   :  { %2673 = vrot.lane.b32.xlu0 %v6336_v54, %s5636_s4 }
0x199d   :  { %v2776_v55 = vpop.permute.xlu1 %2775 }
0x199e   :  { %v2674_v56 = vpop.permute.xlu0 %2673  ;;  %4838 = vmatmul.mubr.msk.f32.vlgmr.msra.gmra.mrb[38].mxu1 %vm455_vm4, %v2776_v55 }
0x199f   :  { %4827 = vmatmul.mubr.msk.f32.vlgmr.msra.gmra.mrb[30].mxu0 %vm455_vm4, %v2674_v56  ;;  %5151 = vmatpush3.bf16.msra.mxu1 %v6237_v11 }
0x19a0   :  { %5145 = vmatpush3.bf16.msra.mxu0 %v6232_v42  ;;  %5152 = vmatprep.subr.bf16.mxu1 %v5632_v13 }
0x19a1   :  { %5146 = vmatprep.subr.bf16.mxu0 %v5632_v13  ;;  %4859 = vmatprep.mubr.msk.f32.mxu1 %vm5633_vm2, %v5634_v20 }
0x19a2   :  { %4848 = vmatprep.mubr.msk.f32.mxu0 %vm5633_vm2, %v5634_v20 }
0x19a3   :  { %5154 = vmatpush3.bf16.msra.mxu1 %v6252_v23 }
0x19a4   :  { %5148 = vmatpush3.bf16.msra.mxu0 %v6249_v8  ;;  %5161 = vmatprep.subr.bf16.mxu1 %v5632_v13 }
0x19a5   :  { %5155 = vmatprep.subr.bf16.mxu0 %v5632_v13 }
0x1a71   :  { %v2845_v57 = vpop.f32.mrb[38].mxu1 }
0x1a72   :  { %v2743_v58 = vpop.f32.mrb[30].mxu0  ;;  %v2846_v59 = vadd.f32 %v6322_v12, %v2845_v57  ;;  %v4839_v60 = vpop.f32.mrb[39].mxu1 }
0x1a73   :  { %v2744_v61 = vadd.f32 %v6317_v10, %v2743_v58  ;;  %v4828_v63 = vpop.f32.mrb[31].mxu0 }
0x1a74   :  { %2858 = vrot.lane.b32.xlu1 %v2846_v59, %s5635_s20  ;;  %v2850_v2 = vadd.f32 %v2849_v0, %v2846_v59 }
0x1a75   :  { %2756 = vrot.lane.b32.xlu0 %v2744_v61, %s5635_s20  ;;  %v2748_v3 = vadd.f32 %v2747_v1, %v2744_v61 }
0x1a76   :  { %v4290_v4 = vmul.f32 -1.442695, %v2850_v2 }
0x1a77   :  { %v4288_v5 = vmul.f32 -1.442695, %v2748_v3 }
0x1a78   :  { %5353 = vpow2.f32 %v4290_v4 }
0x1a79   :  { %5355 = vpow2.f32 %v4288_v5 }
0x1a82   :  { %v5354_v62 = vpop.eup %5353 }
0x1a83   :  { %v5356_v6 = vpop.eup %5355  ;;  %v2854_v7 = vadd.f32 1.0, %v5354_v62 }
0x1a84   :  { %v2752_v9 = vadd.f32 1.0, %v5356_v6 }
0x1a85   :  { %5357 = vrcp.f32 %v2854_v7 }
0x1a86   :  { %5359 = vrcp.f32 %v2752_v9 }
0x1a8f   :  { %v5358_v19 = vpop.eup %5357 }
0x1a90   :  { %v5360_v15 = vpop.eup %5359  ;;  %v2868_v28 = vsub.f32 1.0, %v5358_v19  ;;  %v2874_v31 = vmul.f32 %v5358_v19, %v2671_v53 }
0x1a91   :  { %v2766_v30 = vsub.f32 1.0, %v5360_v15  ;;  %v2772_v34 = vmul.f32 %v5360_v15, %v6336_v54 }
0x1ae6   :  { %v2859_v14 = vpop.permute.xlu1 %2858 }
0x1ae7   :  { %v2861_v17 = vmul.f32 %v5358_v19, %v2859_v14  ;;  %v2757_v18 = vpop.permute.xlu0 %2756 }
0x1ae8   :  { %v2759_v21 = vmul.f32 %v5360_v15, %v2757_v18 }
0x1ae9   :  { %2863 = vrot.lane.b32.xlu1 %v2861_v17, %s5635_s20 }
0x1aea   :  { %2761 = vrot.lane.b32.xlu0 %v2759_v21, %s5635_s20 }
0x1b5b   :  { %v2864_v22 = vpop.permute.xlu1 %2863 }
0x1b5c   :  { %v2866_v24 = vadd.f32 %v2864_v22, %v2849_v0  ;;  %v2762_v25 = vpop.permute.xlu0 %2761 }
0x1b5d   :  { %v2764_v26 = vadd.f32 %v2762_v25, %v2747_v1 }
0x1b5e   :  { %5361 = vtanh.f32 %v2866_v24 }
0x1b5f   :  { %5363 = vtanh.f32 %v2764_v26 }
0x1b68   :  { %v5362_v16 = vpop.eup %5361 }
0x1b69   :  { %v5364_v27 = vpop.eup %5363  ;;  %2870 = vrot.lane.b32.xlu1 %v5362_v16, %s5636_s4 }
0x1b6a   :  { %2768 = vrot.lane.b32.xlu0 %v5364_v27, %s5636_s4 }
0x1bdb   :  { %v2871_v29 = vpop.permute.xlu1 %2870 }
0x1bdc   :  { %v2873_v32 = vmul.f32 %v2871_v29, %v2868_v28  ;;  %v2769_v33 = vpop.permute.xlu0 %2768 }
0x1bdd   :  { %v2771_v35 = vmul.f32 %v2769_v33, %v2766_v30  ;;  %v3257_v30 = vld [vmem:[#allocation3 + $0x20] sm:$0xff] }
0x1bde   :  { %v2875_v36 = vadd.f32 %v2874_v31, %v2873_v32  ;;  %v3155_v31 = vld [vmem:[#allocation2 + $0x18] sm:$0xff] }
0x1bdf   :  { %v6364_v37 = vadd.f32 %v2772_v34, %v2771_v35 }
0x1be0   :  { %2979 = vrot.lane.b32.xlu1 %v2875_v36, %s5636_s4 }
0x1be1   :  { %2877 = vrot.lane.b32.xlu0 %v6364_v37, %s5636_s4 }
0x1c52   :  { %v2980_v38 = vpop.permute.xlu1 %2979 }
0x1c53   :  { %v2878_v39 = vpop.permute.xlu0 %2877  ;;  %4860 = vmatmul.mubr.msk.f32.vlgmr.msra.gmra.mrb[40].mxu1 %vm455_vm4, %v2980_v38 }
0x1c54   :  { %4849 = vmatmul.mubr.msk.f32.vlgmr.msra.gmra.mrb[32].mxu0 %vm455_vm4, %v2878_v39  ;;  %5163 = vmatpush3.bf16.msra.mxu1 %v6237_v11 }
0x1c55   :  { %5157 = vmatpush3.bf16.msra.mxu0 %v6232_v42  ;;  %5164 = vmatprep.subr.bf16.mxu1 %v5632_v13 }
0x1c56   :  { %5158 = vmatprep.subr.bf16.mxu0 %v5632_v13  ;;  %4881 = vmatprep.mubr.msk.f32.mxu1 %vm5633_vm2, %v5634_v20 }
0x1c57   :  { %4870 = vmatprep.mubr.msk.f32.mxu0 %vm5633_vm2, %v5634_v20 }
0x1c58   :  { %5166 = vmatpush3.bf16.msra.mxu1 %v6252_v23 }
0x1c59   :  { %5160 = vmatpush3.bf16.msra.mxu0 %v6249_v8  ;;  %5173 = vmatprep.subr.bf16.mxu1 %v5632_v13 }
0x1c5a   :  { %5167 = vmatprep.subr.bf16.mxu0 %v5632_v13 }
0x1d26   :  { %v3049_v40 = vpop.f32.mrb[40].mxu1 }
0x1d27   :  { %v2947_v41 = vpop.f32.mrb[32].mxu0  ;;  %v3050_v43 = vadd.f32 %v6322_v12, %v3049_v40  ;;  %v4861_v44 = vpop.f32.mrb[41].mxu1 }
0x1d28   :  { %v2948_v45 = vadd.f32 %v6317_v10, %v2947_v41  ;;  %v4850_v46 = vpop.f32.mrb[33].mxu0 }
0x1d29   :  { %3062 = vrot.lane.b32.xlu1 %v3050_v43, %s5635_s20  ;;  %v3054_v49 = vadd.f32 %v3053_v47, %v3050_v43 }
0x1d2a   :  { %2960 = vrot.lane.b32.xlu0 %v2948_v45, %s5635_s20  ;;  %v2952_v50 = vadd.f32 %v2951_v48, %v2948_v45 }
0x1d2b   :  { %v4294_v51 = vmul.f32 -1.442695, %v3054_v49 }
0x1d2c   :  { %v4292_v52 = vmul.f32 -1.442695, %v2952_v50 }
0x1d2d   :  { %5365 = vpow2.f32 %v4294_v51 }
0x1d2e   :  { %5367 = vpow2.f32 %v4292_v52 }
0x1d37   :  { %v5366_v53 = vpop.eup %5365 }
0x1d38   :  { %v5368_v54 = vpop.eup %5367  ;;  %v3058_v55 = vadd.f32 1.0, %v5366_v53 }
0x1d39   :  { %v2956_v56 = vadd.f32 1.0, %v5368_v54 }
0x1d3a   :  { %5369 = vrcp.f32 %v3058_v55 }
0x1d3b   :  { %5371 = vrcp.f32 %v2956_v56 }
0x1d44   :  { %v5370_v57 = vpop.eup %5369 }
0x1d45   :  { %v5372_v59 = vpop.eup %5371  ;;  %v3072_v62 = vsub.f32 1.0, %v5370_v57  ;;  %v3078_v9 = vmul.f32 %v5370_v57, %v2875_v36 }
0x1d46   :  { %v2970_v7 = vsub.f32 1.0, %v5372_v59  ;;  %v2976_v15 = vmul.f32 %v5372_v59, %v6364_v37 }
0x1d9b   :  { %v3063_v58 = vpop.permute.xlu1 %3062 }
0x1d9c   :  { %v3065_v60 = vmul.f32 %v5370_v57, %v3063_v58  ;;  %v2961_v61 = vpop.permute.xlu0 %2960 }
0x1d9d   :  { %v2963_v63 = vmul.f32 %v5372_v59, %v2961_v61 }
0x1d9e   :  { %3067 = vrot.lane.b32.xlu1 %v3065_v60, %s5635_s20 }
0x1d9f   :  { %2965 = vrot.lane.b32.xlu0 %v2963_v63, %s5635_s20 }
0x1e10   :  { %v3068_v0 = vpop.permute.xlu1 %3067 }
0x1e11   :  { %v3070_v1 = vadd.f32 %v3068_v0, %v3053_v47  ;;  %v2966_v2 = vpop.permute.xlu0 %2965 }
0x1e12   :  { %v2968_v3 = vadd.f32 %v2966_v2, %v2951_v48 }
0x1e13   :  { %5373 = vtanh.f32 %v3070_v1 }
0x1e14   :  { %5375 = vtanh.f32 %v2968_v3 }
0x1e1d   :  { %v5374_v4 = vpop.eup %5373 }
0x1e1e   :  { %v5376_v5 = vpop.eup %5375  ;;  %3074 = vrot.lane.b32.xlu1 %v5374_v4, %s5636_s4 }
0x1e1f   :  { %2972 = vrot.lane.b32.xlu0 %v5376_v5, %s5636_s4 }
0x1e90   :  { %v3075_v6 = vpop.permute.xlu1 %3074 }
0x1e91   :  { %v3077_v19 = vmul.f32 %v3075_v6, %v3072_v62  ;;  %v2973_v14 = vpop.permute.xlu0 %2972 }
0x1e92   :  { %v2975_v17 = vmul.f32 %v2973_v14, %v2970_v7  ;;  %v3461_v7 = vld [vmem:[#allocation3 + $0x18] sm:$0xff] }
0x1e93   :  { %v3079_v18 = vadd.f32 %v3078_v9, %v3077_v19  ;;  %v3359_v9 = vld [vmem:[#allocation2 + $0x20] sm:$0xff] }
0x1e94   :  { %v6392_v21 = vadd.f32 %v2976_v15, %v2975_v17 }
0x1e95   :  { %3183 = vrot.lane.b32.xlu1 %v3079_v18, %s5636_s4 }
0x1e96   :  { %3081 = vrot.lane.b32.xlu0 %v6392_v21, %s5636_s4 }
0x1f07   :  { %v3184_v22 = vpop.permute.xlu1 %3183 }
0x1f08   :  { %v3082_v24 = vpop.permute.xlu0 %3081  ;;  %4882 = vmatmul.mubr.msk.f32.vlgmr.msra.gmra.mrb[42].mxu1 %vm455_vm4, %v3184_v22 }
0x1f09   :  { %4871 = vmatmul.mubr.msk.f32.vlgmr.msra.gmra.mrb[34].mxu0 %vm455_vm4, %v3082_v24  ;;  %5175 = vmatpush3.bf16.msra.mxu1 %v6237_v11 }
0x1f0a   :  { %5169 = vmatpush3.bf16.msra.mxu0 %v6232_v42  ;;  %5176 = vmatprep.subr.bf16.mxu1 %v5632_v13 }
0x1f0b   :  { %5170 = vmatprep.subr.bf16.mxu0 %v5632_v13  ;;  %4903 = vmatprep.mubr.msk.f32.mxu1 %vm5633_vm2, %v5634_v20 }
0x1f0c   :  { %4892 = vmatprep.mubr.msk.f32.mxu0 %vm5633_vm2, %v5634_v20 }
0x1f0d   :  { %5178 = vmatpush3.bf16.msra.mxu1 %v6252_v23 }
0x1f0e   :  { %5172 = vmatpush3.bf16.msra.mxu0 %v6249_v8  ;;  %5185 = vmatprep.subr.bf16.mxu1 %v5632_v13 }
0x1f0f   :  { %5179 = vmatprep.subr.bf16.mxu0 %v5632_v13 }
0x1fdb   :  { %v3253_v25 = vpop.f32.mrb[42].mxu1 }
0x1fdc   :  { %v3151_v26 = vpop.f32.mrb[34].mxu0  ;;  %v3254_v16 = vadd.f32 %v6322_v12, %v3253_v25  ;;  %v4883_v27 = vpop.f32.mrb[43].mxu1 }
0x1fdd   :  { %v3152_v28 = vadd.f32 %v6317_v10, %v3151_v26  ;;  %v4872_v29 = vpop.f32.mrb[35].mxu0 }
0x1fde   :  { %3266 = vrot.lane.b32.xlu1 %v3254_v16, %s5635_s20  ;;  %v3258_v32 = vadd.f32 %v3257_v30, %v3254_v16 }
0x1fdf   :  { %3164 = vrot.lane.b32.xlu0 %v3152_v28, %s5635_s20  ;;  %v3156_v33 = vadd.f32 %v3155_v31, %v3152_v28 }
0x1fe0   :  { %v4298_v34 = vmul.f32 -1.442695, %v3258_v32 }
0x1fe1   :  { %v4296_v35 = vmul.f32 -1.442695, %v3156_v33 }
0x1fe2   :  { %5377 = vpow2.f32 %v4298_v34 }
0x1fe3   :  { %5379 = vpow2.f32 %v4296_v35 }
0x1fec   :  { %v5378_v36 = vpop.eup %5377 }
0x1fed   :  { %v5380_v37 = vpop.eup %5379  ;;  %v3262_v38 = vadd.f32 1.0, %v5378_v36 }
0x1fee   :  { %v3160_v39 = vadd.f32 1.0, %v5380_v37 }
0x1fef   :  { %5381 = vrcp.f32 %v3262_v38 }
0x1ff0   :  { %5383 = vrcp.f32 %v3160_v39 }
0x1ff9   :  { %v5382_v40 = vpop.eup %5381 }
0x1ffa   :  { %v5384_v43 = vpop.eup %5383  ;;  %v3276_v53 = vsub.f32 1.0, %v5382_v40  ;;  %v3282_v56 = vmul.f32 %v5382_v40, %v3079_v18 }
0x1ffb   :  { %v3174_v55 = vsub.f32 1.0, %v5384_v43  ;;  %v3180_v59 = vmul.f32 %v5384_v43, %v6392_v21 }
0x2050   :  { %v3267_v41 = vpop.permute.xlu1 %3266 }
0x2051   :  { %v3269_v44 = vmul.f32 %v5382_v40, %v3267_v41  ;;  %v3165_v45 = vpop.permute.xlu0 %3164 }
0x2052   :  { %v3167_v46 = vmul.f32 %v5384_v43, %v3165_v45 }
0x2053   :  { %3271 = vrot.lane.b32.xlu1 %v3269_v44, %s5635_s20 }
0x2054   :  { %3169 = vrot.lane.b32.xlu0 %v3167_v46, %s5635_s20 }
0x20c5   :  { %v3272_v47 = vpop.permute.xlu1 %3271 }
0x20c6   :  { %v3274_v48 = vadd.f32 %v3272_v47, %v3257_v30  ;;  %v3170_v49 = vpop.permute.xlu0 %3169 }
0x20c7   :  { %v3172_v50 = vadd.f32 %v3170_v49, %v3155_v31 }
0x20c8   :  { %5385 = vtanh.f32 %v3274_v48 }
0x20c9   :  { %5387 = vtanh.f32 %v3172_v50 }
0x20d2   :  { %v5386_v51 = vpop.eup %5385 }
0x20d3   :  { %v5388_v52 = vpop.eup %5387  ;;  %3278 = vrot.lane.b32.xlu1 %v5386_v51, %s5636_s4 }
0x20d4   :  { %3176 = vrot.lane.b32.xlu0 %v5388_v52, %s5636_s4 }
0x2145   :  { %v3279_v54 = vpop.permute.xlu1 %3278 }
0x2146   :  { %v3281_v57 = vmul.f32 %v3279_v54, %v3276_v53  ;;  %v3177_v58 = vpop.permute.xlu0 %3176 }
0x2147   :  { %v3179_v60 = vmul.f32 %v3177_v58, %v3174_v55  ;;  %v3665_v55 = vld [vmem:[#allocation3 + $0x10] sm:$0xff] }
0x2148   :  { %v3283_v61 = vadd.f32 %v3282_v56, %v3281_v57  ;;  %v3563_v56 = vld [vmem:[#allocation2 + $0x28] sm:$0xff] }
0x2149   :  { %v6420_v63 = vadd.f32 %v3180_v59, %v3179_v60 }
0x214a   :  { %3387 = vrot.lane.b32.xlu1 %v3283_v61, %s5636_s4 }
0x214b   :  { %3285 = vrot.lane.b32.xlu0 %v6420_v63, %s5636_s4 }
0x21bc   :  { %v3388_v0 = vpop.permute.xlu1 %3387 }
0x21bd   :  { %v3286_v1 = vpop.permute.xlu0 %3285  ;;  %4904 = vmatmul.mubr.msk.f32.vlgmr.msra.gmra.mrb[44].mxu1 %vm455_vm4, %v3388_v0 }
0x21be   :  { %4893 = vmatmul.mubr.msk.f32.vlgmr.msra.gmra.mrb[36].mxu0 %vm455_vm4, %v3286_v1  ;;  %5187 = vmatpush3.bf16.msra.mxu1 %v6237_v11 }
0x21bf   :  { %5181 = vmatpush3.bf16.msra.mxu0 %v6232_v42  ;;  %5188 = vmatprep.subr.bf16.mxu1 %v5632_v13 }
0x21c0   :  { %5182 = vmatprep.subr.bf16.mxu0 %v5632_v13  ;;  %4925 = vmatprep.mubr.msk.f32.mxu1 %vm5633_vm2, %v5634_v20 }
0x21c1   :  { %4914 = vmatprep.mubr.msk.f32.mxu0 %vm5633_vm2, %v5634_v20 }
0x21c2   :  { %5190 = vmatpush3.bf16.msra.mxu1 %v6252_v23 }
0x21c3   :  { %5184 = vmatpush3.bf16.msra.mxu0 %v6249_v8  ;;  %5197 = vmatprep.subr.bf16.mxu1 %v5632_v13 }
0x21c4   :  { %5191 = vmatprep.subr.bf16.mxu0 %v5632_v13 }
0x2290   :  { %v3457_v2 = vpop.f32.mrb[44].mxu1 }
0x2291   :  { %v3355_v3 = vpop.f32.mrb[36].mxu0  ;;  %v3458_v4 = vadd.f32 %v6322_v12, %v3457_v2  ;;  %v4905_v5 = vpop.f32.mrb[45].mxu1 }
0x2292   :  { %v3356_v62 = vadd.f32 %v6317_v10, %v3355_v3  ;;  %v4894_v6 = vpop.f32.mrb[37].mxu0 }
0x2293   :  { %3470 = vrot.lane.b32.xlu1 %v3458_v4, %s5635_s20  ;;  %v3462_v19 = vadd.f32 %v3461_v7, %v3458_v4 }
0x2294   :  { %3368 = vrot.lane.b32.xlu0 %v3356_v62, %s5635_s20  ;;  %v3360_v14 = vadd.f32 %v3359_v9, %v3356_v62 }
0x2295   :  { %v4302_v15 = vmul.f32 -1.442695, %v3462_v19 }
0x2296   :  { %v4300_v17 = vmul.f32 -1.442695, %v3360_v14 }
0x2297   :  { %5389 = vpow2.f32 %v4302_v15 }
0x2298   :  { %5391 = vpow2.f32 %v4300_v17 }
0x22a1   :  { %v5390_v18 = vpop.eup %5389 }
0x22a2   :  { %v5392_v21 = vpop.eup %5391  ;;  %v3466_v22 = vadd.f32 1.0, %v5390_v18 }
0x22a3   :  { %v3364_v24 = vadd.f32 1.0, %v5392_v21 }
0x22a4   :  { %5393 = vrcp.f32 %v3466_v22 }
0x22a5   :  { %5395 = vrcp.f32 %v3364_v24 }
0x22ae   :  { %v5394_v25 = vpop.eup %5393 }
0x22af   :  { %v5396_v16 = vpop.eup %5395  ;;  %v3480_v36 = vsub.f32 1.0, %v5394_v25  ;;  %v3486_v39 = vmul.f32 %v5394_v25, %v3283_v61 }
0x22b0   :  { %v3378_v38 = vsub.f32 1.0, %v5396_v16  ;;  %v3384_v43 = vmul.f32 %v5396_v16, %v6420_v63 }
0x2305   :  { %v3471_v26 = vpop.permute.xlu1 %3470 }
0x2306   :  { %v3473_v27 = vmul.f32 %v5394_v25, %v3471_v26  ;;  %v3369_v28 = vpop.permute.xlu0 %3368 }
0x2307   :  { %v3371_v29 = vmul.f32 %v5396_v16, %v3369_v28 }
0x2308   :  { %3475 = vrot.lane.b32.xlu1 %v3473_v27, %s5635_s20 }
0x2309   :  { %3373 = vrot.lane.b32.xlu0 %v3371_v29, %s5635_s20 }
0x237a   :  { %v3476_v30 = vpop.permute.xlu1 %3475 }
0x237b   :  { %v3478_v31 = vadd.f32 %v3476_v30, %v3461_v7  ;;  %v3374_v32 = vpop.permute.xlu0 %3373 }
0x237c   :  { %v3376_v33 = vadd.f32 %v3374_v32, %v3359_v9 }
0x237d   :  { %5397 = vtanh.f32 %v3478_v31 }
0x237e   :  { %5399 = vtanh.f32 %v3376_v33 }
0x2387   :  { %v5398_v34 = vpop.eup %5397 }
0x2388   :  { %v5400_v35 = vpop.eup %5399  ;;  %3482 = vrot.lane.b32.xlu1 %v5398_v34, %s5636_s4 }
0x2389   :  { %3380 = vrot.lane.b32.xlu0 %v5400_v35, %s5636_s4 }
0x23fa   :  { %v3483_v37 = vpop.permute.xlu1 %3482 }
0x23fb   :  { %v3485_v40 = vmul.f32 %v3483_v37, %v3480_v36  ;;  %v3381_v41 = vpop.permute.xlu0 %3380  ;;  %v3869_v36 = vld [vmem:[#allocation3 + $0x8] sm:$0xff]  ;;  %v3767_v37 = vld [vmem:[#allocation2 + $0x30] sm:$0xff] }
0x23fc   :  { %v3383_v44 = vmul.f32 %v3381_v41, %v3378_v38 }
0x23fd   :  { %v3487_v45 = vadd.f32 %v3486_v39, %v3485_v40 }
0x23fe   :  { %v6448_v46 = vadd.f32 %v3384_v43, %v3383_v44 }
0x23ff   :  { %3591 = vrot.lane.b32.xlu1 %v3487_v45, %s5636_s4 }
0x2400   :  { %3489 = vrot.lane.b32.xlu0 %v6448_v46, %s5636_s4 }
0x2471   :  { %v3592_v47 = vpop.permute.xlu1 %3591 }
0x2472   :  { %v3490_v48 = vpop.permute.xlu0 %3489  ;;  %4926 = vmatmul.mubr.msk.f32.vlgmr.msra.gmra.mrb[46].mxu1 %vm455_vm4, %v3592_v47 }
0x2473   :  { %4915 = vmatmul.mubr.msk.f32.vlgmr.msra.gmra.mrb[38].mxu0 %vm455_vm4, %v3490_v48  ;;  %5199 = vmatpush3.bf16.msra.mxu1 %v6237_v11 }
0x2474   :  { %5193 = vmatpush3.bf16.msra.mxu0 %v6232_v42  ;;  %5200 = vmatprep.subr.bf16.mxu1 %v5632_v13 }
0x2475   :  { %5194 = vmatprep.subr.bf16.mxu0 %v5632_v13  ;;  %4947 = vmatprep.mubr.msk.f32.mxu1 %vm5633_vm2, %v5634_v20 }
0x2476   :  { %4936 = vmatprep.mubr.msk.f32.mxu0 %vm5633_vm2, %v5634_v20 }
0x2477   :  { %5202 = vmatpush3.bf16.msra.mxu1 %v6252_v23 }
0x2478   :  { %5196 = vmatpush3.bf16.msra.mxu0 %v6249_v8  ;;  %5209 = vmatprep.subr.bf16.mxu1 %v5632_v13 }
0x2479   :  { %5203 = vmatprep.subr.bf16.mxu0 %v5632_v13 }
0x2545   :  { %v3661_v49 = vpop.f32.mrb[46].mxu1 }
0x2546   :  { %v3559_v50 = vpop.f32.mrb[38].mxu0  ;;  %v3662_v51 = vadd.f32 %v6322_v12, %v3661_v49  ;;  %v4927_v52 = vpop.f32.mrb[47].mxu1 }
0x2547   :  { %v3560_v53 = vadd.f32 %v6317_v10, %v3559_v50  ;;  %v4916_v54 = vpop.f32.mrb[39].mxu0 }
0x2548   :  { %3674 = vrot.lane.b32.xlu1 %v3662_v51, %s5635_s20  ;;  %v3666_v57 = vadd.f32 %v3665_v55, %v3662_v51 }
0x2549   :  { %3572 = vrot.lane.b32.xlu0 %v3560_v53, %s5635_s20  ;;  %v3564_v58 = vadd.f32 %v3563_v56, %v3560_v53 }
0x254a   :  { %v4306_v59 = vmul.f32 -1.442695, %v3666_v57 }
0x254b   :  { %v4304_v60 = vmul.f32 -1.442695, %v3564_v58 }
0x254c   :  { %5401 = vpow2.f32 %v4306_v59 }
0x254d   :  { %5403 = vpow2.f32 %v4304_v60 }
0x2556   :  { %v5402_v61 = vpop.eup %5401 }
0x2557   :  { %v5404_v63 = vpop.eup %5403  ;;  %v3670_v0 = vadd.f32 1.0, %v5402_v61 }
0x2558   :  { %v3568_v1 = vadd.f32 1.0, %v5404_v63 }
0x2559   :  { %5405 = vrcp.f32 %v3670_v0 }
0x255a   :  { %5407 = vrcp.f32 %v3568_v1 }
0x2563   :  { %v5406_v2 = vpop.eup %5405 }
0x2564   :  { %v5408_v4 = vpop.eup %5407  ;;  %v3684_v18 = vsub.f32 1.0, %v5406_v2  ;;  %v3690_v24 = vmul.f32 %v5406_v2, %v3487_v45 }
0x2565   :  { %v3582_v22 = vsub.f32 1.0, %v5408_v4  ;;  %v3588_v16 = vmul.f32 %v5408_v4, %v6448_v46 }
0x25ba   :  { %v3675_v3 = vpop.permute.xlu1 %3674 }
0x25bb   :  { %v3677_v5 = vmul.f32 %v5406_v2, %v3675_v3  ;;  %v3573_v62 = vpop.permute.xlu0 %3572 }
0x25bc   :  { %v3575_v6 = vmul.f32 %v5408_v4, %v3573_v62 }
0x25bd   :  { %3679 = vrot.lane.b32.xlu1 %v3677_v5, %s5635_s20 }
0x25be   :  { %3577 = vrot.lane.b32.xlu0 %v3575_v6, %s5635_s20 }
0x262f   :  { %v3680_v7 = vpop.permute.xlu1 %3679 }
0x2630   :  { %v3682_v9 = vadd.f32 %v3680_v7, %v3665_v55  ;;  %v3578_v19 = vpop.permute.xlu0 %3577 }
0x2631   :  { %v3580_v14 = vadd.f32 %v3578_v19, %v3563_v56 }
0x2632   :  { %5409 = vtanh.f32 %v3682_v9 }
0x2633   :  { %5411 = vtanh.f32 %v3580_v14 }
0x263c   :  { %v5410_v15 = vpop.eup %5409 }
0x263d   :  { %v5412_v17 = vpop.eup %5411  ;;  %3686 = vrot.lane.b32.xlu1 %v5410_v15, %s5636_s4  ;;  %v4073_v15 = vld [vmem:[#allocation3] sm:$0xff] }
0x263e   :  { %3584 = vrot.lane.b32.xlu0 %v5412_v17, %s5636_s4  ;;  %v3971_v17 = vld [vmem:[#allocation2 + $0x38] sm:$0xff] }
0x26af   :  { %v3687_v21 = vpop.permute.xlu1 %3686 }
0x26b0   :  { %v3689_v25 = vmul.f32 %v3687_v21, %v3684_v18  ;;  %v3585_v26 = vpop.permute.xlu0 %3584 }
0x26b1   :  { %v3587_v27 = vmul.f32 %v3585_v26, %v3582_v22 }
0x26b2   :  { %v3691_v28 = vadd.f32 %v3690_v24, %v3689_v25 }
0x26b3   :  { %v3589_v29 = vadd.f32 %v3588_v16, %v3587_v27 }
0x26b4   :  { %3795 = vrot.lane.b32.xlu1 %v3691_v28, %s5636_s4 }
0x26b5   :  { %3693 = vrot.lane.b32.xlu0 %v3589_v29, %s5636_s4 }
0x2726   :  { %v3796_v30 = vpop.permute.xlu1 %3795 }
0x2727   :  { %v3694_v31 = vpop.permute.xlu0 %3693  ;;  %4948 = vmatmul.mubr.msk.f32.vlgmr.msra.gmra.mrb[48].mxu1 %vm455_vm4, %v3796_v30 }
0x2728   :  { %4937 = vmatmul.mubr.msk.f32.vlgmr.msra.gmra.mrb[40].mxu0 %vm455_vm4, %v3694_v31  ;;  %5211 = vmatpush3.bf16.msra.mxu1 %v6237_v11 }
0x2729   :  { %5205 = vmatpush3.bf16.msra.mxu0 %v6232_v42  ;;  %5212 = vmatprep.subr.bf16.mxu1 %v5632_v13 }
0x272a   :  { %5206 = vmatprep.subr.bf16.mxu0 %v5632_v13  ;;  %4969 = vmatprep.mubr.msk.f32.mxu1 %vm5633_vm2, %v5634_v20 }
0x272b   :  { %4958 = vmatprep.mubr.msk.f32.mxu0 %vm5633_vm2, %v5634_v20 }
0x272c   :  { %5214 = vmatpush3.bf16.msra.mxu1 %v6252_v23 }
0x272d   :  { %5208 = vmatpush3.bf16.msra.mxu0 %v6249_v8 }
0x272e   :  { %5215 = vmatprep.subr.bf16.mxu0 %v5632_v13 }
0x27fa   :  { %v3865_v32 = vpop.f32.mrb[48].mxu1 }
0x27fb   :  { %v3763_v11 = vpop.f32.mrb[40].mxu0  ;;  %v3866_v42 = vadd.f32 %v6322_v12, %v3865_v32  ;;  %v4949_v33 = vpop.f32.mrb[49].mxu1 }
0x27fc   :  { %v3764_v34 = vadd.f32 %v6317_v10, %v3763_v11  ;;  %v4938_v35 = vpop.f32.mrb[41].mxu0  ;;  %v4105_v33 = vld [vmem:[%s6583_s17] sm:$0xff] }
0x27fd   :  { %3878 = vrot.lane.b32.xlu1 %v3866_v42, %s5635_s20  ;;  %v3870_v38 = vadd.f32 %v3869_v36, %v3866_v42  ;;  %v4107_v35 = vld [vmem:[%s6583_s17 + $0x10] sm:$0xff] }
0x27fe   :  { %3776 = vrot.lane.b32.xlu0 %v3764_v34, %s5635_s20  ;;  %v3768_v23 = vadd.f32 %v3767_v37, %v3764_v34  ;;  %v4106_v34 = vld [vmem:[%s6583_s17 + $0x8] sm:$0xff] }
0x27ff   :  { %v4310_v39 = vmul.f32 -1.442695, %v3870_v38 }
0x2800   :  { %v4308_v8 = vmul.f32 -1.442695, %v3768_v23  ;;  %v4109_v23 = vld [vmem:[%s6583_s17 + $0x20] sm:$0xff] }
0x2801   :  { %5413 = vpow2.f32 %v4310_v39  ;;  %v4110_v39 = vld [vmem:[%s6583_s17 + $0x28] sm:$0xff] }
0x2802   :  { %5415 = vpow2.f32 %v4308_v8 }
0x280b   :  { %v5414_v40 = vpop.eup %5413 }
0x280c   :  { %v5416_v41 = vpop.eup %5415  ;;  %v3874_v43 = vadd.f32 1.0, %v5414_v40  ;;  %v5222_v40 = vpack.c.bf16 %v4110_v39, %v4109_v23 }
0x280d   :  { %v3772_v44 = vadd.f32 1.0, %v5416_v41 }
0x280e   :  { %5417 = vrcp.f32 %v3874_v43  ;;  %v4111_v43 = vld [vmem:[%s6583_s17 + $0x30] sm:$0xff] }
0x280f   :  { %5419 = vrcp.f32 %v3772_v44  ;;  %v4112_v44 = vld [vmem:[%s6583_s17 + $0x38] sm:$0xff] }
0x2818   :  { %v5418_v45 = vpop.eup %5417 }
0x2819   :  { %v5420_v47 = vpop.eup %5419  ;;  %v3888_v57 = vsub.f32 1.0, %v5418_v45  ;;  %v3894_v60 = vmul.f32 %v5418_v45, %v3691_v28 }
0x281a   :  { %v3786_v59 = vsub.f32 1.0, %v5420_v47  ;;  %v3792_v0 = vmul.f32 %v5420_v47, %v3589_v29 }
0x286f   :  { %v3879_v46 = vpop.permute.xlu1 %3878 }
0x2870   :  { %v3881_v48 = vmul.f32 %v5418_v45, %v3879_v46  ;;  %v3777_v49 = vpop.permute.xlu0 %3776  ;;  %v5225_v45 = vpack.c.bf16 %v4112_v44, %v4111_v43 }
0x2871   :  { %v3779_v50 = vmul.f32 %v5420_v47, %v3777_v49 }
0x2872   :  { %3883 = vrot.lane.b32.xlu1 %v3881_v48, %s5635_s20 }
0x2873   :  { %3781 = vrot.lane.b32.xlu0 %v3779_v50, %s5635_s20 }
0x28e4   :  { %v3884_v51 = vpop.permute.xlu1 %3883 }
0x28e5   :  { %v3886_v52 = vadd.f32 %v3884_v51, %v3869_v36  ;;  %v3782_v53 = vpop.permute.xlu0 %3781  ;;  %v5216_v36 = vpack.c.bf16 %v4106_v34, %v4105_v33 }
0x28e6   :  { %v3784_v54 = vadd.f32 %v3782_v53, %v3767_v37  ;;  %v4108_v37 = vld [vmem:[%s6583_s17 + $0x18] sm:$0xff] }
0x28e7   :  { %5421 = vtanh.f32 %v3886_v52  ;;  %v5219_v38 = vpack.c.bf16 %v4108_v37, %v4107_v35 }
0x28e8   :  { %5423 = vtanh.f32 %v3784_v54 }
0x28f1   :  { %v5422_v55 = vpop.eup %5421 }
0x28f2   :  { %v5424_v56 = vpop.eup %5423  ;;  %3890 = vrot.lane.b32.xlu1 %v5422_v55, %s5636_s4 }
0x28f3   :  { %3788 = vrot.lane.b32.xlu0 %v5424_v56, %s5636_s4 }
0x2964   :  { %v3891_v58 = vpop.permute.xlu1 %3890 }
0x2965   :  { %v3893_v61 = vmul.f32 %v3891_v58, %v3888_v57  ;;  %v3789_v63 = vpop.permute.xlu0 %3788 }
0x2966   :  { %v3791_v1 = vmul.f32 %v3789_v63, %v3786_v59 }
0x2967   :  { %v6499_v2 = vadd.f32 %v3894_v60, %v3893_v61 }
0x2968   :  { %v6501_v3 = vadd.f32 %v3792_v0, %v3791_v1 }
0x2969   :  { %3999 = vrot.lane.b32.xlu1 %v6499_v2, %s5636_s4 }
0x296a   :  { %3897 = vrot.lane.b32.xlu0 %v6501_v3, %s5636_s4 }
0x29db   :  { %v4000_v4 = vpop.permute.xlu1 %3999 }
0x29dc   :  { %v3898_v5 = vpop.permute.xlu0 %3897  ;;  %4970 = vmatmul.mubr.msk.f32.vlgmr.msra.gmra.mrb[50].mxu1 %vm455_vm4, %v4000_v4 }
0x29dd   :  { %4959 = vmatmul.mubr.msk.f32.vlgmr.msra.gmra.mrb[42].mxu0 %vm455_vm4, %v3898_v5 }
0x29de   :  { %4988 = vmatprep.mubr.msk.f32.mxu0 %vm5633_vm2, %v5634_v20  ;;  %5217 = vmatpush3.bf16.msra.mxu0 %v5216_v36 }
0x29df   :  { %5218 = vmatprep.subr.bf16.mxu0 %v5632_v13 }
0x29e2   :  { %5220 = vmatpush3.bf16.msra.mxu0 %v5219_v38 }
0x29e3   :  { %5221 = vmatprep.subr.bf16.mxu0 %v5632_v13 }
0x29e6   :  { %5223 = vmatpush3.bf16.msra.mxu0 %v5222_v40 }
0x29e7   :  { %5224 = vmatprep.subr.bf16.mxu0 %v5632_v13  ;;  %v4315_v13 = vld [vmem:[%s6600_s24] ss:$0 sm:$0xff] }
0x29ea   :  { %5226 = vmatpush3.bf16.msra.mxu0 %v5225_v45 }
0x2aaf   :  { %v4069_v62 = vpop.f32.mrb[50].mxu1 }
0x2ab0   :  { %v3967_v6 = vpop.f32.mrb[42].mxu0  ;;  %v4070_v7 = vadd.f32 %v6322_v12, %v4069_v62  ;;  %v4971_v9 = vpop.f32.mrb[51].mxu1 }
0x2ab1   :  { %v3968_v19 = vadd.f32 %v6317_v10, %v3967_v6  ;;  %v4960_v14 = vpop.f32.mrb[43].mxu0 }
0x2ab2   :  { %4082 = vrot.lane.b32.xlu1 %v4070_v7, %s5635_s20  ;;  %v4074_v18 = vadd.f32 %v4073_v15, %v4070_v7 }
0x2ab3   :  { %3980 = vrot.lane.b32.xlu0 %v3968_v19, %s5635_s20  ;;  %v3972_v21 = vadd.f32 %v3971_v17, %v3968_v19 }
0x2ab4   :  { %v4314_v22 = vmul.f32 -1.442695, %v4074_v18 }
0x2ab5   :  { %v4312_v24 = vmul.f32 -1.442695, %v3972_v21 }
0x2ab6   :  { %5425 = vpow2.f32 %v4314_v22 }
0x2ab7   :  { %5427 = vpow2.f32 %v4312_v24 }
0x2ac0   :  { %v5426_v20 = vpop.eup %5425 }
0x2ac1   :  { %v5428_v25 = vpop.eup %5427  ;;  %v4078_v26 = vadd.f32 1.0, %v5426_v20 }
0x2ac2   :  { %v3976_v12 = vadd.f32 1.0, %v5428_v25 }
0x2ac3   :  { %5429 = vrcp.f32 %v4078_v26 }
0x2ac4   :  { %5431 = vrcp.f32 %v3976_v12 }
0x2acd   :  { %v5430_v10 = vpop.eup %5429 }
0x2ace   :  { %v5432_v27 = vpop.eup %5431  ;;  %v4092_v52 = vsub.f32 1.0, %v5430_v10  ;;  %v4098_v54 = vmul.f32 %v5430_v10, %v6499_v2 }
0x2acf   :  { %v3990_v46 = vsub.f32 1.0, %v5432_v27  ;;  %v3996_v48 = vmul.f32 %v5432_v27, %v6501_v3 }
0x2b24   :  { %v4083_v16 = vpop.permute.xlu1 %4082 }
0x2b25   :  { %v4085_v28 = vmul.f32 %v5430_v10, %v4083_v16  ;;  %v3981_v29 = vpop.permute.xlu0 %3980 }
0x2b26   :  { %v3983_v30 = vmul.f32 %v5432_v27, %v3981_v29 }
0x2b27   :  { %4087 = vrot.lane.b32.xlu1 %v4085_v28, %s5635_s20 }
0x2b28   :  { %3985 = vrot.lane.b32.xlu0 %v3983_v30, %s5635_s20 }
0x2b99   :  { %v4088_v31 = vpop.permute.xlu1 %4087 }
0x2b9a   :  { %v4090_v32 = vadd.f32 %v4088_v31, %v4073_v15  ;;  %v3986_v11 = vpop.permute.xlu0 %3985 }
0x2b9b   :  { %v3988_v42 = vadd.f32 %v3986_v11, %v3971_v17 }
0x2b9c   :  { %5433 = vtanh.f32 %v4090_v32 }
0x2b9d   :  { %5435 = vtanh.f32 %v3988_v42 }
0x2ba6   :  { %v5434_v8 = vpop.eup %5433 }
0x2ba7   :  { %v5436_v41 = vpop.eup %5435  ;;  %4094 = vrot.lane.b32.xlu1 %v5434_v8, %s5636_s4 }
0x2ba8   :  { %3992 = vrot.lane.b32.xlu0 %v5436_v41, %s5636_s4 }
0x2c19   :  { %v4095_v51 = vpop.permute.xlu1 %4094 }
0x2c1a   :  { %v3993_v47 = vpop.permute.xlu0 %3992  ;;  %v4097_v53 = vmul.f32 %v4095_v51, %v4092_v52 }
0x2c1b   :  { %v3995_v49 = vmul.f32 %v3993_v47, %v3990_v46 }
0x2c1c   :  { %v4099_v55 = vadd.f32 %v4098_v54, %v4097_v53 }
0x2c1d   :  { %v3997_v50 = vadd.f32 %v3996_v48, %v3995_v49 }
0x2c1f   :  { %4101 = vrot.lane.b32.xlu0 %v3997_v50, %s5636_s4  ;;  %s5591_s4 = scalar_lea.vmem %s4202_s3, 32 }
0x2c20   :  { %p5592_p0 = scmp.ne.s32.totalorder %s4202_s3, %s5591_s4  ;;  %p5597_p2 = scmp.lt.s32.totalorder %s5591_s4, %s5591_s4 }
0x2c22   :  { %p5598_p3 = por %p5597_p2, %p5596_p1 }
0x2c24   :  { %p5599_p4 = pnand %p5598_p3, %p5592_p0 }
0x2c91   :  { %v4102_v56 = vpop.permute.xlu0 %4101 }
0x2c92   :  { %v4104_v57 = vsel %vm455_vm4, %v4102_v56, %v4099_v55 }
0x2c93   :  { %4989 = vmatmul.mubr.msk.f32.vlgmr.msra.gmra.mrb[44].mxu0 %vm2209_vm5, %v4104_v57 }
0x2d66   :  { %v4189_v58 = vpop.f32.mrb[44].mxu0 }
0x2d67   :  { %v4190_v59 = vadd.f32 %v4315_v13, %v4189_v58  ;;  %v4990_v60 = vpop.f32.mrb[45].mxu0 }
0x2d69   :  { %4194 = vst.msk [vmem:[#allocation18] sm:$0x3] %vm4193_vm6, %v4190_v59 }
0x2d6a   :  { %5602 = shalt.err (!%p5599_p4)
}
0x2d6b   :  { %s6601_s6 = sld [smem:[#allocation29_spill]] }
0x2d71   :  { %s5603_s7 = scalar_lea.hbm %s6601_s6, 32 }
0x2d72   :  { %p5604_p5 = scmp.ne.s32.totalorder %s6601_s6, %s5603_s7  ;;  %p5607_p6 = scmp.lt.u32.totalorder %s5603_s7, %s6601_s6 }
0x2d74   :  { %p5609_p7 = pnand %p5607_p6, %p5604_p5 }
0x2d76   :  { %5612 = shalt.err (!%p5609_p7)
}
0x2d77   :  { %4204 = dma.vmem_to_hbm [thread:$0]  %s4202_s3, 32, %s6601_s6, [#allocation8]  }
0x2d78   :  { %5621 = dma.done.wait [#allocation8], 32  }
0x2d79   :  { %5622 = vsyncadd [#allocation8], 4294967264 }
0x2d7a   :  { %4208 = vsyncpa [#allocation7], 1 }
0x2d7b   :  { %4209 = vsyncpa [#allocation10], 1 }
0x2d7c   :  { %4210 = vsyncpa [#allocation13], 1 }
0x2d7d   :  { %4211 = vsyncpa [#allocation16], 1 }
0x2d7e   :  { %4212 = vsyncpa [#allocation8], 1 }

</bundles_post_ra>
